<compile_context>
chip_gen: v7x
topology: tpu7x:2x2x1
jax: 0.10.0
libtpu: 0.0.40
codegen_flags: <defaults>
</compile_context>

<pallas_src>
import jax
import jax.numpy as jnp
import numpy as np
from jax.experimental import pallas as pl
from jax.experimental.pallas import tpu as pltpu


# --------------------------------------------------------------------------- #
# Kernel A: per-subgraph-tile GNN stack + transforms + gates + centroid +
#           subgraph mean pooling.  grid = (G // TG,), "parallel".
# --------------------------------------------------------------------------- #
def gnn_tile_kernel(
    h_ref,       # [TG, K, F0P] bf16  node features (x || hop_emb), F0P = 32
    hop_ref,     # [TG, K, H]   f32   hop embeddings
    adji_ref,    # [TG, K, K]   bf16  (I + A) per subgraph (block adjacency)
    eagg_ref,    # [TG, K, F0P] bf16  per-destination summed edge_attr
    wgnn_ref,    # [L, F0P, F0P] bf16 conv weights with BN scale folded in
    bnt_ref,     # [L, 1, F0P]  f32   folded BN shift
    wout_ref,    # [F0P, NOUTP] bf16  output_encoder
    bout_ref,    # [1, NOUTP]   f32
    wsc_ref,     # [NOUTP, 2*NOUTP] bf16  subgraph|context transforms (Linear+BN), fused
    bsc_ref,     # [1, 2*NOUTP] f32
    wg_ref,      # [H, 2*NOUTP] bf16  gate_mapper_subgraph|context, fused
    bg_ref,      # [1, 2*NOUTP] f32
    wgc_ref,     # [H, NOUTP]   bf16  gate_mapper_centroid
    bgc_ref,     # [1, NOUTP]   f32
    outp_ref,    # [TG, NOUTP]  f32   out: centroid + subgraph-pooled embedding per graph
    ctxg_ref,    # [TG*K, NOUTP] bf16 out: gated context rows (node-pooled in kernel B)
):
    f32, bf16 = jnp.float32, jnp.bfloat16
    tg, k, f0p = h_ref.shape
    m = tg * k
    nout_p = wout_ref.shape[1]
    nlayer = wgnn_ref.shape[0]

    adji = adji_ref[...].astype(f32)       # [tg, k, k]   0/1/2 counts (exact in bf16)
    eagg = eagg_ref[...].astype(f32)       # [tg, k, f0p]
    h = h_ref[...].astype(f32)             # residual chain stays f32
    prev = h

    # ---- GNN stack: GINE-style conv -> BN(eval, folded) -> ReLU -> residual ----
    for l in range(nlayer):
        # (I + A_g) @ h_g as K broadcast-MACs on the VPU (K is tiny; keep MXU free
        # for the weight matmuls instead of TG separate 8x8xF matmuls).
        msg = eagg
        for j in range(k):
            msg = msg + adji[:, :, j:j + 1] * h[:, j:j + 1, :]
        z = jnp.dot(msg.reshape(m, f0p).astype(bf16), wgnn_ref[l],
                    preferred_element_type=f32)
        z = z + bnt_ref[l]                 # BN scale folded into wgnn host-side
        z = jnp.maximum(z, 0.0)            # ReLU  (dropout=0 -> no-op)
        h = z.reshape(tg, k, f0p) + prev   # residual
        prev = h

    # ---- output_encoder: Linear(F0 -> NOUT) ----
    h2 = h.reshape(m, f0p)
    g2 = jnp.dot(h2.astype(bf16), wout_ref[...], preferred_element_type=f32) \
        + bout_ref[...]

    # ---- fused subgraph|context transforms: Linear(+folded BN) -> ReLU ----
    tc = jnp.dot(g2.astype(bf16), wsc_ref[...], preferred_element_type=f32) \
        + bsc_ref[...]
    tc = jnp.maximum(tc, 0.0)
    sub = tc[:, :nout_p]
    ctx = tc[:, nout_p:]

    # ---- fused subgraph|context hop gates: Linear -> sigmoid ----
    hop3 = hop_ref[...]
    hop2 = hop3.reshape(m, hop3.shape[-1])
    gz = jax.nn.sigmoid(
        jnp.dot(hop2.astype(bf16), wg_ref[...], preferred_element_type=f32)
        + bg_ref[...])
    gate_s = gz[:, :nout_p]
    gate_x = gz[:, nout_p:]

    # ---- centroid rows: the data layout stores the root (hop 0) at local index
    #      0 of every subgraph, so centroid selection is a static slice.
    # TODO(synk): requires the data pipeline to place the root first; otherwise
    #             fall back to a one-hot-over-K reduce.
    g_cent = g2.reshape(tg, k, nout_p)[:, 0, :]          # [tg, nout_p]
    hop_cent = hop3[:, 0, :]                             # [tg, H]
    gate_c = jax.nn.sigmoid(
        jnp.dot(hop_cent.astype(bf16), wgc_ref[...], preferred_element_type=f32)
        + bgc_ref[...])
    cent = g_cent * gate_c

    # ---- subgraph mean pooling: each subgraph owns K consecutive rows ----
    # TODO(synk): assumes exactly K real nodes per subgraph; ragged subgraphs
    #             need a per-subgraph count/mask input.
    pooled_sub = jnp.mean((sub * gate_s).reshape(tg, k, nout_p), axis=1)

    # embs_combine_mode == 'add' (context contribution added in kernel B)
    outp_ref[...] = cent + pooled_sub
    ctxg_ref[...] = (ctx * gate_x).astype(bf16)


# --------------------------------------------------------------------------- #
# Kernel B: cross-subgraph context scatter-mean (row-normalized assignment
#           matmul), tiled over the NS contraction with an f32 accumulator,
#           combined with kernel A's output.
# --------------------------------------------------------------------------- #
def context_pool_kernel(outp_ref, ctxg_ref, pctx_ref, out_ref, acc_ref):
    s = pl.program_id(1)

    @pl.when(s == 0)
    def _():
        acc_ref[...] = jnp.zeros_like(acc_ref)

    acc_ref[...] += jnp.dot(pctx_ref[...], ctxg_ref[...],
                            preferred_element_type=jnp.float32)

    @pl.when(s == pl.num_programs(1) - 1)
    def _():
        out_ref[...] = outp_ref[...] + acc_ref[...]


# --------------------------------------------------------------------------- #
# Wrappers
# --------------------------------------------------------------------------- #
def run_gnn_tiles(h3, hop3, adji3, eagg3, wgnn, bnt, wout, bout,
                  wsc, bsc, wg, bg, wgc, bgc, *, tg):
    g, k, f0p = h3.shape
    hdim = hop3.shape[-1]
    nout_p = wout.shape[1]
    ns = g * k
    assert g % tg == 0

    def full_spec(a):
        nd = a.ndim
        return pl.BlockSpec(a.shape, lambda t, _nd=nd: (0,) * _nd)

    in_specs = [
        pl.BlockSpec((tg, k, f0p), lambda t: (t, 0, 0)),    # h (bf16, natural width)
        pl.BlockSpec((tg, k, hdim), lambda t: (t, 0, 0)),   # hop_emb
        pl.BlockSpec((tg, k, k), lambda t: (t, 0, 0)),      # I + A blocks (bf16)
        pl.BlockSpec((tg, k, f0p), lambda t: (t, 0, 0)),    # edge_attr aggregate (bf16)
        full_spec(wgnn), full_spec(bnt),
        full_spec(wout), full_spec(bout),
        full_spec(wsc), full_spec(bsc),
        full_spec(wg), full_spec(bg),
        full_spec(wgc), full_spec(bgc),
    ]
    out_specs = (
        pl.BlockSpec((tg, nout_p), lambda t: (t, 0)),
        pl.BlockSpec((tg * k, nout_p), lambda t: (t, 0)),
    )
    out_shape = (
        jax.ShapeDtypeStruct((g, nout_p), jnp.float32),
        jax.ShapeDtypeStruct((ns, nout_p), jnp.bfloat16),   # bf16 intermediate
    )
    return pl.pallas_call(
        gnn_tile_kernel,
        grid=(g // tg,),
        in_specs=in_specs,
        out_specs=out_specs,
        out_shape=out_shape,
        compiler_params=pltpu.CompilerParams(dimension_semantics=("parallel",)),
    )(h3, hop3, adji3, eagg3, wgnn, bnt, wout, bout, wsc, bsc, wg, bg, wgc, bgc)


def run_context_pool(outp, ctxg, pctx, *, tn, ts):
    n, nout_p = outp.shape
    ns = ctxg.shape[0]
    assert n % tn == 0 and ns % ts == 0
    return pl.pallas_call(
        context_pool_kernel,
        grid=(n // tn, ns // ts),
        in_specs=[
            pl.BlockSpec((tn, nout_p), lambda i, s: (i, 0)),
            pl.BlockSpec((ts, nout_p), lambda i, s: (s, 0)),
            pl.BlockSpec((tn, ts), lambda i, s: (i, s)),
        ],
        out_specs=pl.BlockSpec((tn, nout_p), lambda i, s: (i, 0)),
        out_shape=jax.ShapeDtypeStruct((n, nout_p), jnp.float32),
        scratch_shapes=[pltpu.VMEM((tn, nout_p), jnp.float32)],
        compiler_params=pltpu.CompilerParams(
            dimension_semantics=("parallel", "arbitrary")),
    )(outp, ctxg, pctx)


# --------------------------------------------------------------------------- #
# Pure-JAX f32 reference (module semantics) for verification.
# --------------------------------------------------------------------------- #
def reference_forward(h0, hop_emb, adj_dense, eagg, w_gnn, bn_scale, bn_shift,
                      w_out, b_out, w_sub, b_sub, w_ctx, b_ctx,
                      w_gc, b_gc, w_gs, b_gs, w_gx, b_gx, scent, psub, pctx):
    h = h0
    prev = h0
    for l in range(w_gnn.shape[0]):
        agg = adj_dense @ h + eagg
        z = (h + agg) @ w_gnn[l]
        z = z * bn_scale[l] + bn_shift[l]
        z = jnp.maximum(z, 0.0)
        h = z + prev
        prev = h
    g = h @ w_out + b_out
    sub = jnp.maximum(g @ w_sub + b_sub, 0.0)
    ctx = jnp.maximum(g @ w_ctx + b_ctx, 0.0)
    gc = jax.nn.sigmoid(hop_emb @ w_gc + b_gc)
    gs = jax.nn.sigmoid(hop_emb @ w_gs + b_gs)
    gx = jax.nn.sigmoid(hop_emb @ w_gx + b_gx)
    cent = (scent @ g) * (scent @ gc)
    return cent + psub @ (sub * gs) + pctx @ (ctx * gx)


# --------------------------------------------------------------------------- #
# Main: deterministic synthetic data + parameters, run kernels, verify.
# --------------------------------------------------------------------------- #
if __name__ == "__main__":
    key = jax.random.PRNGKey(0)
    ks = iter(jax.random.split(key, 40))

    # module hyper-params (one gnn_type => nhid == nout)
    N, NIN, HOP_DIM, NOUT, NLAYER, K = 32, 16, 8, 16, 2, 8
    F0 = NIN + HOP_DIM            # GNN input width (x || hop_emb) = 24
    F0P = 32                      # near-natural pad (NOT 128): avoid streaming zero lanes
    NOUTP = 128                   # lane-dense output width
    G = N                         # one subgraph rooted at every node
    NS = G * K                    # combined subgraph nodes
    TG = 16                       # m = TG*K = 128 rows/tile; G//TG >= 2 keeps both v7x TCs busy
                                  # (use TG=32 on v6e/v7x when G is large enough)
    TN = min(N, 256)              # kernel-B output rows per step
    TS = 128                      # kernel-B reduction tile over NS

    # --- synthetic `data` fields -------------------------------------------
    x = 0.5 * jax.random.normal(next(ks), (N, NIN), jnp.float32)

    # subgraph b contains K nodes {(b + off) mod N}; root (hop 0) at local idx 0
    offsets = jnp.array([0, 1, 2, 3, 5, 7, 11, 13], jnp.int32)
    subgraphs_nodes_mapper = (
        (jnp.arange(N, dtype=jnp.int32)[:, None] + offsets[None, :]) % N
    ).reshape(-1)                                                 # [NS]
    subgraphs_batch = jnp.repeat(jnp.arange(G, dtype=jnp.int32), K)
    hop_indicator = jnp.tile(jnp.array([0, 1, 1, 2, 2, 3, 3, 4], jnp.int32), G)

    # combined_subgraphs edge_index: bidirectional chain within each subgraph
    base = jnp.arange(G, dtype=jnp.int32)[:, None] * K
    chain = jnp.arange(K - 1, dtype=jnp.int32)
    src_local = jnp.concatenate([chain, chain + 1])
    dst_local = jnp.concatenate([chain + 1, chain])
    src = (base + src_local[None, :]).reshape(-1)
    dst = (base + dst_local[None, :]).reshape(-1)
    EC = int(src.shape[0])

    # original edge_attr gathered via subgraphs_edges_mapper (edge dim = F0)
    E_ORIG = 40
    edge_attr_orig = 0.1 * jax.random.normal(next(ks), (E_ORIG, F0), jnp.float32)
    subgraphs_edges_mapper = jnp.arange(EC, dtype=jnp.int32) % E_ORIG
    edge_attr_c = edge_attr_orig[subgraphs_edges_mapper]

    # hop embedding table (nn.Embedding(20, hop_dim)), lookup at hop_indicator + 1
    hop_table = 0.2 * jax.random.normal(next(ks), (20, HOP_DIM), jnp.float32)
    hop_emb = hop_table[hop_indicator + 1]                        # [NS, H]

    # glue: gather + concat (x[mapper] || hop_emb)
    h0 = jnp.concatenate([x[subgraphs_nodes_mapper], hop_emb], axis=-1)   # [NS, F0]

    # dense adjacency / scatter matrices (used by the pure-JAX reference)
    adj_dense = jnp.zeros((NS, NS), jnp.float32).at[dst, src].add(1.0)
    eagg = jnp.zeros((NS, F0), jnp.float32).at[dst].add(edge_attr_c)
    onehot_b = jax.nn.one_hot(subgraphs_batch, G, dtype=jnp.float32)
    psub = onehot_b.T / jnp.maximum(onehot_b.sum(0), 1.0)[:, None]        # [G, NS]
    onehot_n = jax.nn.one_hot(subgraphs_nodes_mapper, N, dtype=jnp.float32)
    pctx_f32 = onehot_n.T / jnp.maximum(onehot_n.sum(0), 1.0)[:, None]    # [N, NS]
    is_cent = subgraphs_nodes_mapper == subgraphs_batch
    scent = (is_cent[None, :] &
             (subgraphs_batch[None, :] == jnp.arange(G)[:, None])).astype(jnp.float32)

    # --- deterministic parameter init --------------------------------------
    def linear_w(k_, fan_in, fan_out):
        s = (6.0 / (fan_in + fan_out)) ** 0.5
        return jax.random.uniform(k_, (fan_in, fan_out), jnp.float32, -s, s)

    bn_eps = 1e-5
    # GNN conv weights (bias=False since bn=True) + eval BatchNorm folded
    w_gnn = jnp.stack([linear_w(next(ks), F0, F0) for _ in range(NLAYER)])
    gamma = 1.0 + 0.1 * jax.random.normal(next(ks), (NLAYER, 1, F0), jnp.float32)
    beta = 0.1 * jax.random.normal(next(ks), (NLAYER, 1, F0), jnp.float32)
    run_mean = jnp.zeros((NLAYER, 1, F0), jnp.float32)
    run_var = jnp.ones((NLAYER, 1, F0), jnp.float32)
    bn_scale = gamma / jnp.sqrt(run_var + bn_eps)
    bn_shift = beta - run_mean * bn_scale

    # output_encoder: MLP(nlayer=1, no final activation) == Linear(F0, NOUT)
    w_out = linear_w(next(ks), F0, NOUT)
    b_out = 0.1 * jax.random.normal(next(ks), (1, NOUT), jnp.float32)

    def folded_transform(kw, kb, kg, kbt):
        # MLP(nlayer=1, with_final_activation=True): Linear -> BN(eval) -> ReLU
        w = linear_w(kw, NOUT, NOUT)
        b = 0.1 * jax.random.normal(kb, (1, NOUT), jnp.float32)
        g_ = 1.0 + 0.1 * jax.random.normal(kg, (1, NOUT), jnp.float32)
        bt = 0.1 * jax.random.normal(kbt, (1, NOUT), jnp.float32)
        scale = g_ / jnp.sqrt(1.0 + bn_eps)   # running mean 0 / var 1
        return w * scale, b * scale + bt

    w_sub, b_sub = folded_transform(next(ks), next(ks), next(ks), next(ks))
    w_ctx, b_ctx = folded_transform(next(ks), next(ks), next(ks), next(ks))

    def gate_params(kw, kb):
        return (linear_w(kw, HOP_DIM, NOUT),
                0.1 * jax.random.normal(kb, (1, NOUT), jnp.float32))

    w_gc, b_gc = gate_params(next(ks), next(ks))
    w_gs, b_gs = gate_params(next(ks), next(ks))
    w_gx, b_gx = gate_params(next(ks), next(ks))

    # --- padding (zero pad -> exact) + dtype/blocking for the kernels -------
    def pad_last(a, c):
        return jnp.pad(a, [(0, 0)] * (a.ndim - 1) + [(0, c - a.shape[-1])])

    def pad_last2(a, r, c):
        return jnp.pad(a, [(0, 0)] * (a.ndim - 2)
                       + [(0, r - a.shape[-2]), (0, c - a.shape[-1])])

    bf16 = jnp.bfloat16
    # dominant node streams: natural-ish width (32 lanes), bf16 in HBM
    h3 = pad_last(h0, F0P).reshape(G, K, F0P).astype(bf16)
    hop3 = hop_emb.reshape(G, K, HOP_DIM)                            # f32 (tiny)
    eagg3 = pad_last(eagg, F0P).reshape(G, K, F0P).astype(bf16)
    # block adjacency (I + A): subgraphs are disjoint -> K x K block per subgraph
    adj_blocks = jnp.zeros((G, K, K), jnp.float32).at[dst // K, dst % K, src % K].add(1.0)
    adji3 = (adj_blocks + jnp.eye(K, dtype=jnp.float32)[None]).astype(bf16)  # counts: exact

    # fold BN scale into conv weights (per output column); kernel applies only shift
    w_gnn_fold = w_gnn * bn_scale
    wgnn_p = pad_last2(w_gnn_fold, F0P, F0P).astype(bf16)
    bnt_p = pad_last(bn_shift, F0P)
    wout_p = pad_last2(w_out, F0P, NOUTP).astype(bf16)
    bout_p = pad_last(b_out, NOUTP)
    wsc = jnp.concatenate([pad_last2(w_sub, NOUTP, NOUTP),
                           pad_last2(w_ctx, NOUTP, NOUTP)], axis=1).astype(bf16)
    bsc = jnp.concatenate([pad_last(b_sub, NOUTP), pad_last(b_ctx, NOUTP)], axis=1)
    wg = jnp.concatenate([pad_last(w_gs, NOUTP), pad_last(w_gx, NOUTP)], axis=1).astype(bf16)
    bg = jnp.concatenate([pad_last(b_gs, NOUTP), pad_last(b_gx, NOUTP)], axis=1)
    wgc_p = pad_last(w_gc, NOUTP).astype(bf16)
    bgc_p = pad_last(b_gc, NOUTP)
    pctx_bf16 = pctx_f32.astype(bf16)       # entries are 1/count (1/8 here -> exact)

    # --- run kernels --------------------------------------------------------
    outp, ctxg = run_gnn_tiles(h3, hop3, adji3, eagg3,
                               wgnn_p, bnt_p, wout_p, bout_p,
                               wsc, bsc, wg, bg, wgc_p, bgc_p, tg=TG)
    out_full = run_context_pool(outp, ctxg, pctx_bf16, tn=TN, ts=TS)
    out_full = jax.block_until_ready(out_full)
    out = np.asarray(out_full)[:, :NOUT]

    # --- verify against pure-JAX f32 reference ------------------------------
    ref = reference_forward(h0, hop_emb, adj_dense, eagg, w_gnn, bn_scale, bn_shift,
                            w_out, b_out, w_sub, b_sub, w_ctx, b_ctx,
                            w_gc, b_gc, w_gs, b_gs, w_gx, b_gx, scent, psub, pctx_f32)
    ref = np.asarray(jax.block_until_ready(ref))

    # kernel uses bf16 inputs and matmul operands end-to-end (f32 accumulation
    # and f32 elementwise chain), so compare with bf16-level tolerance
    np.testing.assert_allclose(out, ref, rtol=5e-2, atol=1e-1)
    assert out.shape == (N, NOUT)

    print("KERNEL_OK")
</pallas_src>

<mosaic_0001>
module attributes {stable_mosaic.version = 11 : i64} {
  func.func @gnn_tile_kernel(%arg0: i32, %arg1: memref<16x8x32xbf16, #tpu.memory_space<vmem>>, %arg2: memref<16x8x8xf32, #tpu.memory_space<vmem>>, %arg3: memref<16x8x8xbf16, #tpu.memory_space<vmem>>, %arg4: memref<16x8x32xbf16, #tpu.memory_space<vmem>>, %arg5: memref<2x32x32xbf16, #tpu.memory_space<vmem>>, %arg6: memref<2x1x32xf32, #tpu.memory_space<vmem>>, %arg7: memref<32x128xbf16, #tpu.memory_space<vmem>>, %arg8: memref<1x128xf32, #tpu.memory_space<vmem>>, %arg9: memref<128x256xbf16, #tpu.memory_space<vmem>>, %arg10: memref<1x256xf32, #tpu.memory_space<vmem>>, %arg11: memref<8x256xbf16, #tpu.memory_space<vmem>>, %arg12: memref<1x256xf32, #tpu.memory_space<vmem>>, %arg13: memref<8x128xbf16, #tpu.memory_space<vmem>>, %arg14: memref<1x128xf32, #tpu.memory_space<vmem>>, %arg15: memref<16x128xf32, #tpu.memory_space<vmem>>, %arg16: memref<128x128xbf16, #tpu.memory_space<vmem>>) attributes {dimension_semantics = [#tpu.dimension_semantics<parallel>], iteration_bounds = array<i64: 2>, scalar_prefetch = 0 : i64, scratch_operands = 0 : i64, tpu.core_type = #tpu.core_type<tc>, window_params = [{transform_indices = @transform_0, window_bounds = array<i64: 16, 8, 32>}, {transform_indices = @transform_1, window_bounds = array<i64: 16, 8, 8>}, {transform_indices = @transform_2, window_bounds = array<i64: 16, 8, 8>}, {transform_indices = @transform_3, window_bounds = array<i64: 16, 8, 32>}, {pipeline_mode = #tpu.pipeline_mode<synchronous>, transform_indices = @transform_4, window_bounds = array<i64: 2, 32, 32>}, {pipeline_mode = #tpu.pipeline_mode<synchronous>, transform_indices = @transform_5, window_bounds = array<i64: 2, 1, 32>}, {pipeline_mode = #tpu.pipeline_mode<synchronous>, transform_indices = @transform_6, window_bounds = array<i64: 32, 128>}, {pipeline_mode = #tpu.pipeline_mode<synchronous>, transform_indices = @transform_7, window_bounds = array<i64: 1, 128>}, {pipeline_mode = #tpu.pipeline_mode<synchronous>, transform_indices = @transform_8, window_bounds = array<i64: 128, 256>}, {pipeline_mode = #tpu.pipeline_mode<synchronous>, transform_indices = @transform_9, window_bounds = array<i64: 1, 256>}, {pipeline_mode = #tpu.pipeline_mode<synchronous>, transform_indices = @transform_10, window_bounds = array<i64: 8, 256>}, {pipeline_mode = #tpu.pipeline_mode<synchronous>, transform_indices = @transform_11, window_bounds = array<i64: 1, 256>}, {pipeline_mode = #tpu.pipeline_mode<synchronous>, transform_indices = @transform_12, window_bounds = array<i64: 8, 128>}, {pipeline_mode = #tpu.pipeline_mode<synchronous>, transform_indices = @transform_13, window_bounds = array<i64: 1, 128>}, {transform_indices = @transform_14, window_bounds = array<i64: 16, 128>}, {transform_indices = @transform_15, window_bounds = array<i64: 128, 128>}]} {
    %c0 = arith.constant 0 : index
    %c0_0 = arith.constant 0 : index
    %c0_1 = arith.constant 0 : index
    %0 = vector.load %arg3[%c0, %c0_0, %c0_1] : memref<16x8x8xbf16, #tpu.memory_space<vmem>>, vector<16x8x8xbf16>
    %1 = arith.extf %0 : vector<16x8x8xbf16> to vector<16x8x8xf32>
    %c0_2 = arith.constant 0 : index
    %c0_3 = arith.constant 0 : index
    %c0_4 = arith.constant 0 : index
    %2 = vector.load %arg4[%c0_2, %c0_3, %c0_4] : memref<16x8x32xbf16, #tpu.memory_space<vmem>>, vector<16x8x32xbf16>
    %3 = arith.extf %2 : vector<16x8x32xbf16> to vector<16x8x32xf32>
    %c0_5 = arith.constant 0 : index
    %c0_6 = arith.constant 0 : index
    %c0_7 = arith.constant 0 : index
    %4 = vector.load %arg1[%c0_5, %c0_6, %c0_7] : memref<16x8x32xbf16, #tpu.memory_space<vmem>>, vector<16x8x32xbf16>
    %5 = arith.extf %4 : vector<16x8x32xbf16> to vector<16x8x32xf32>
    %6 = vector.extract_strided_slice %1 {offsets = [0, 0, 0], sizes = [16, 8, 1], strides = [1, 1, 1]} : vector<16x8x8xf32> to vector<16x8x1xf32>
    %7 = vector.extract_strided_slice %5 {offsets = [0, 0, 0], sizes = [16, 1, 32], strides = [1, 1, 1]} : vector<16x8x32xf32> to vector<16x1x32xf32>
    %8 = vector.broadcast %6 : vector<16x8x1xf32> to vector<16x8x32xf32>
    %9 = vector.broadcast %7 : vector<16x1x32xf32> to vector<16x8x32xf32>
    %10 = arith.mulf %8, %9 : vector<16x8x32xf32>
    %11 = arith.addf %3, %10 : vector<16x8x32xf32>
    %12 = vector.extract_strided_slice %1 {offsets = [0, 0, 1], sizes = [16, 8, 1], strides = [1, 1, 1]} : vector<16x8x8xf32> to vector<16x8x1xf32>
    %13 = vector.extract_strided_slice %5 {offsets = [0, 1, 0], sizes = [16, 1, 32], strides = [1, 1, 1]} : vector<16x8x32xf32> to vector<16x1x32xf32>
    %14 = vector.broadcast %12 : vector<16x8x1xf32> to vector<16x8x32xf32>
    %15 = vector.broadcast %13 : vector<16x1x32xf32> to vector<16x8x32xf32>
    %16 = arith.mulf %14, %15 : vector<16x8x32xf32>
    %17 = arith.addf %11, %16 : vector<16x8x32xf32>
    %18 = vector.extract_strided_slice %1 {offsets = [0, 0, 2], sizes = [16, 8, 1], strides = [1, 1, 1]} : vector<16x8x8xf32> to vector<16x8x1xf32>
    %19 = vector.extract_strided_slice %5 {offsets = [0, 2, 0], sizes = [16, 1, 32], strides = [1, 1, 1]} : vector<16x8x32xf32> to vector<16x1x32xf32>
    %20 = vector.broadcast %18 : vector<16x8x1xf32> to vector<16x8x32xf32>
    %21 = vector.broadcast %19 : vector<16x1x32xf32> to vector<16x8x32xf32>
    %22 = arith.mulf %20, %21 : vector<16x8x32xf32>
    %23 = arith.addf %17, %22 : vector<16x8x32xf32>
    %24 = vector.extract_strided_slice %1 {offsets = [0, 0, 3], sizes = [16, 8, 1], strides = [1, 1, 1]} : vector<16x8x8xf32> to vector<16x8x1xf32>
    %25 = vector.extract_strided_slice %5 {offsets = [0, 3, 0], sizes = [16, 1, 32], strides = [1, 1, 1]} : vector<16x8x32xf32> to vector<16x1x32xf32>
    %26 = vector.broadcast %24 : vector<16x8x1xf32> to vector<16x8x32xf32>
    %27 = vector.broadcast %25 : vector<16x1x32xf32> to vector<16x8x32xf32>
    %28 = arith.mulf %26, %27 : vector<16x8x32xf32>
    %29 = arith.addf %23, %28 : vector<16x8x32xf32>
    %30 = vector.extract_strided_slice %1 {offsets = [0, 0, 4], sizes = [16, 8, 1], strides = [1, 1, 1]} : vector<16x8x8xf32> to vector<16x8x1xf32>
    %31 = vector.extract_strided_slice %5 {offsets = [0, 4, 0], sizes = [16, 1, 32], strides = [1, 1, 1]} : vector<16x8x32xf32> to vector<16x1x32xf32>
    %32 = vector.broadcast %30 : vector<16x8x1xf32> to vector<16x8x32xf32>
    %33 = vector.broadcast %31 : vector<16x1x32xf32> to vector<16x8x32xf32>
    %34 = arith.mulf %32, %33 : vector<16x8x32xf32>
    %35 = arith.addf %29, %34 : vector<16x8x32xf32>
    %36 = vector.extract_strided_slice %1 {offsets = [0, 0, 5], sizes = [16, 8, 1], strides = [1, 1, 1]} : vector<16x8x8xf32> to vector<16x8x1xf32>
    %37 = vector.extract_strided_slice %5 {offsets = [0, 5, 0], sizes = [16, 1, 32], strides = [1, 1, 1]} : vector<16x8x32xf32> to vector<16x1x32xf32>
    %38 = vector.broadcast %36 : vector<16x8x1xf32> to vector<16x8x32xf32>
    %39 = vector.broadcast %37 : vector<16x1x32xf32> to vector<16x8x32xf32>
    %40 = arith.mulf %38, %39 : vector<16x8x32xf32>
    %41 = arith.addf %35, %40 : vector<16x8x32xf32>
    %42 = vector.extract_strided_slice %1 {offsets = [0, 0, 6], sizes = [16, 8, 1], strides = [1, 1, 1]} : vector<16x8x8xf32> to vector<16x8x1xf32>
    %43 = vector.extract_strided_slice %5 {offsets = [0, 6, 0], sizes = [16, 1, 32], strides = [1, 1, 1]} : vector<16x8x32xf32> to vector<16x1x32xf32>
    %44 = vector.broadcast %42 : vector<16x8x1xf32> to vector<16x8x32xf32>
    %45 = vector.broadcast %43 : vector<16x1x32xf32> to vector<16x8x32xf32>
    %46 = arith.mulf %44, %45 : vector<16x8x32xf32>
    %47 = arith.addf %41, %46 : vector<16x8x32xf32>
    %48 = vector.extract_strided_slice %1 {offsets = [0, 0, 7], sizes = [16, 8, 1], strides = [1, 1, 1]} : vector<16x8x8xf32> to vector<16x8x1xf32>
    %49 = vector.extract_strided_slice %5 {offsets = [0, 7, 0], sizes = [16, 1, 32], strides = [1, 1, 1]} : vector<16x8x32xf32> to vector<16x1x32xf32>
    %50 = vector.broadcast %48 : vector<16x8x1xf32> to vector<16x8x32xf32>
    %51 = vector.broadcast %49 : vector<16x1x32xf32> to vector<16x8x32xf32>
    %52 = arith.mulf %50, %51 : vector<16x8x32xf32>
    %53 = arith.addf %47, %52 : vector<16x8x32xf32>
    %54 = vector.shape_cast %53 : vector<16x8x32xf32> to vector<128x32xf32>
    %55 = arith.truncf %54 : vector<128x32xf32> to vector<128x32xbf16>
    %c0_8 = arith.constant 0 : index
    %c0_9 = arith.constant 0 : index
    %c0_10 = arith.constant 0 : index
    %56 = vector.load %arg5[%c0_8, %c0_9, %c0_10] : memref<2x32x32xbf16, #tpu.memory_space<vmem>>, vector<1x32x32xbf16>
    %57 = vector.shape_cast %56 : vector<1x32x32xbf16> to vector<32x32xbf16>
    %cst = arith.constant dense<0.000000e+00> : vector<128x32xf32>
    %58 = tpu.matmul %55, %57, %cst {dimension_numbers = #tpu.dot_dimension_numbers<[1], [0], [0], [1], [0, 0, 1, 1], [], []>} : vector<128x32xbf16>, vector<32x32xbf16>, vector<128x32xf32> -> vector<128x32xf32>
    %c0_11 = arith.constant 0 : index
    %c0_12 = arith.constant 0 : index
    %c0_13 = arith.constant 0 : index
    %59 = vector.load %arg6[%c0_11, %c0_12, %c0_13] : memref<2x1x32xf32, #tpu.memory_space<vmem>>, vector<1x1x32xf32>
    %60 = vector.shape_cast %59 : vector<1x1x32xf32> to vector<1x32xf32>
    %61 = vector.broadcast %60 : vector<1x32xf32> to vector<128x32xf32>
    %62 = arith.addf %58, %61 : vector<128x32xf32>
    %cst_14 = arith.constant 0.000000e+00 : f32
    %63 = vector.broadcast %cst_14 : f32 to vector<128x32xf32>
    %64 = arith.maximumf %62, %63 : vector<128x32xf32>
    %65 = vector.shape_cast %64 : vector<128x32xf32> to vector<16x8x32xf32>
    %66 = arith.addf %65, %5 : vector<16x8x32xf32>
    %67 = vector.extract_strided_slice %1 {offsets = [0, 0, 0], sizes = [16, 8, 1], strides = [1, 1, 1]} : vector<16x8x8xf32> to vector<16x8x1xf32>
    %68 = vector.extract_strided_slice %66 {offsets = [0, 0, 0], sizes = [16, 1, 32], strides = [1, 1, 1]} : vector<16x8x32xf32> to vector<16x1x32xf32>
    %69 = vector.broadcast %67 : vector<16x8x1xf32> to vector<16x8x32xf32>
    %70 = vector.broadcast %68 : vector<16x1x32xf32> to vector<16x8x32xf32>
    %71 = arith.mulf %69, %70 : vector<16x8x32xf32>
    %72 = arith.addf %3, %71 : vector<16x8x32xf32>
    %73 = vector.extract_strided_slice %1 {offsets = [0, 0, 1], sizes = [16, 8, 1], strides = [1, 1, 1]} : vector<16x8x8xf32> to vector<16x8x1xf32>
    %74 = vector.extract_strided_slice %66 {offsets = [0, 1, 0], sizes = [16, 1, 32], strides = [1, 1, 1]} : vector<16x8x32xf32> to vector<16x1x32xf32>
    %75 = vector.broadcast %73 : vector<16x8x1xf32> to vector<16x8x32xf32>
    %76 = vector.broadcast %74 : vector<16x1x32xf32> to vector<16x8x32xf32>
    %77 = arith.mulf %75, %76 : vector<16x8x32xf32>
    %78 = arith.addf %72, %77 : vector<16x8x32xf32>
    %79 = vector.extract_strided_slice %1 {offsets = [0, 0, 2], sizes = [16, 8, 1], strides = [1, 1, 1]} : vector<16x8x8xf32> to vector<16x8x1xf32>
    %80 = vector.extract_strided_slice %66 {offsets = [0, 2, 0], sizes = [16, 1, 32], strides = [1, 1, 1]} : vector<16x8x32xf32> to vector<16x1x32xf32>
    %81 = vector.broadcast %79 : vector<16x8x1xf32> to vector<16x8x32xf32>
    %82 = vector.broadcast %80 : vector<16x1x32xf32> to vector<16x8x32xf32>
    %83 = arith.mulf %81, %82 : vector<16x8x32xf32>
    %84 = arith.addf %78, %83 : vector<16x8x32xf32>
    %85 = vector.extract_strided_slice %1 {offsets = [0, 0, 3], sizes = [16, 8, 1], strides = [1, 1, 1]} : vector<16x8x8xf32> to vector<16x8x1xf32>
    %86 = vector.extract_strided_slice %66 {offsets = [0, 3, 0], sizes = [16, 1, 32], strides = [1, 1, 1]} : vector<16x8x32xf32> to vector<16x1x32xf32>
    %87 = vector.broadcast %85 : vector<16x8x1xf32> to vector<16x8x32xf32>
    %88 = vector.broadcast %86 : vector<16x1x32xf32> to vector<16x8x32xf32>
    %89 = arith.mulf %87, %88 : vector<16x8x32xf32>
    %90 = arith.addf %84, %89 : vector<16x8x32xf32>
    %91 = vector.extract_strided_slice %1 {offsets = [0, 0, 4], sizes = [16, 8, 1], strides = [1, 1, 1]} : vector<16x8x8xf32> to vector<16x8x1xf32>
    %92 = vector.extract_strided_slice %66 {offsets = [0, 4, 0], sizes = [16, 1, 32], strides = [1, 1, 1]} : vector<16x8x32xf32> to vector<16x1x32xf32>
    %93 = vector.broadcast %91 : vector<16x8x1xf32> to vector<16x8x32xf32>
    %94 = vector.broadcast %92 : vector<16x1x32xf32> to vector<16x8x32xf32>
    %95 = arith.mulf %93, %94 : vector<16x8x32xf32>
    %96 = arith.addf %90, %95 : vector<16x8x32xf32>
    %97 = vector.extract_strided_slice %1 {offsets = [0, 0, 5], sizes = [16, 8, 1], strides = [1, 1, 1]} : vector<16x8x8xf32> to vector<16x8x1xf32>
    %98 = vector.extract_strided_slice %66 {offsets = [0, 5, 0], sizes = [16, 1, 32], strides = [1, 1, 1]} : vector<16x8x32xf32> to vector<16x1x32xf32>
    %99 = vector.broadcast %97 : vector<16x8x1xf32> to vector<16x8x32xf32>
    %100 = vector.broadcast %98 : vector<16x1x32xf32> to vector<16x8x32xf32>
    %101 = arith.mulf %99, %100 : vector<16x8x32xf32>
    %102 = arith.addf %96, %101 : vector<16x8x32xf32>
    %103 = vector.extract_strided_slice %1 {offsets = [0, 0, 6], sizes = [16, 8, 1], strides = [1, 1, 1]} : vector<16x8x8xf32> to vector<16x8x1xf32>
    %104 = vector.extract_strided_slice %66 {offsets = [0, 6, 0], sizes = [16, 1, 32], strides = [1, 1, 1]} : vector<16x8x32xf32> to vector<16x1x32xf32>
    %105 = vector.broadcast %103 : vector<16x8x1xf32> to vector<16x8x32xf32>
    %106 = vector.broadcast %104 : vector<16x1x32xf32> to vector<16x8x32xf32>
    %107 = arith.mulf %105, %106 : vector<16x8x32xf32>
    %108 = arith.addf %102, %107 : vector<16x8x32xf32>
    %109 = vector.extract_strided_slice %1 {offsets = [0, 0, 7], sizes = [16, 8, 1], strides = [1, 1, 1]} : vector<16x8x8xf32> to vector<16x8x1xf32>
    %110 = vector.extract_strided_slice %66 {offsets = [0, 7, 0], sizes = [16, 1, 32], strides = [1, 1, 1]} : vector<16x8x32xf32> to vector<16x1x32xf32>
    %111 = vector.broadcast %109 : vector<16x8x1xf32> to vector<16x8x32xf32>
    %112 = vector.broadcast %110 : vector<16x1x32xf32> to vector<16x8x32xf32>
    %113 = arith.mulf %111, %112 : vector<16x8x32xf32>
    %114 = arith.addf %108, %113 : vector<16x8x32xf32>
    %115 = vector.shape_cast %114 : vector<16x8x32xf32> to vector<128x32xf32>
    %116 = arith.truncf %115 : vector<128x32xf32> to vector<128x32xbf16>
    %c1 = arith.constant 1 : index
    %c0_15 = arith.constant 0 : index
    %c0_16 = arith.constant 0 : index
    %117 = vector.load %arg5[%c1, %c0_15, %c0_16] : memref<2x32x32xbf16, #tpu.memory_space<vmem>>, vector<1x32x32xbf16>
    %118 = vector.shape_cast %117 : vector<1x32x32xbf16> to vector<32x32xbf16>
    %cst_17 = arith.constant dense<0.000000e+00> : vector<128x32xf32>
    %119 = tpu.matmul %116, %118, %cst_17 {dimension_numbers = #tpu.dot_dimension_numbers<[1], [0], [0], [1], [0, 0, 1, 1], [], []>} : vector<128x32xbf16>, vector<32x32xbf16>, vector<128x32xf32> -> vector<128x32xf32>
    %c1_18 = arith.constant 1 : index
    %c0_19 = arith.constant 0 : index
    %c0_20 = arith.constant 0 : index
    %120 = vector.load %arg6[%c1_18, %c0_19, %c0_20] : memref<2x1x32xf32, #tpu.memory_space<vmem>>, vector<1x1x32xf32>
    %121 = vector.shape_cast %120 : vector<1x1x32xf32> to vector<1x32xf32>
    %122 = vector.broadcast %121 : vector<1x32xf32> to vector<128x32xf32>
    %123 = arith.addf %119, %122 : vector<128x32xf32>
    %cst_21 = arith.constant 0.000000e+00 : f32
    %124 = vector.broadcast %cst_21 : f32 to vector<128x32xf32>
    %125 = arith.maximumf %123, %124 : vector<128x32xf32>
    %126 = vector.shape_cast %125 : vector<128x32xf32> to vector<16x8x32xf32>
    %127 = arith.addf %126, %66 : vector<16x8x32xf32>
    %128 = vector.shape_cast %127 : vector<16x8x32xf32> to vector<128x32xf32>
    %129 = arith.truncf %128 : vector<128x32xf32> to vector<128x32xbf16>
    %c0_22 = arith.constant 0 : index
    %c0_23 = arith.constant 0 : index
    %130 = vector.load %arg7[%c0_22, %c0_23] : memref<32x128xbf16, #tpu.memory_space<vmem>>, vector<32x128xbf16>
    %cst_24 = arith.constant dense<0.000000e+00> : vector<128x128xf32>
    %131 = tpu.matmul %129, %130, %cst_24 {dimension_numbers = #tpu.dot_dimension_numbers<[1], [0], [0], [1], [0, 0, 1, 1], [], []>} : vector<128x32xbf16>, vector<32x128xbf16>, vector<128x128xf32> -> vector<128x128xf32>
    %c0_25 = arith.constant 0 : index
    %c0_26 = arith.constant 0 : index
    %132 = vector.load %arg8[%c0_25, %c0_26] : memref<1x128xf32, #tpu.memory_space<vmem>>, vector<1x128xf32>
    %133 = vector.broadcast %132 : vector<1x128xf32> to vector<128x128xf32>
    %134 = arith.addf %131, %133 : vector<128x128xf32>
    %135 = arith.truncf %134 : vector<128x128xf32> to vector<128x128xbf16>
    %c0_27 = arith.constant 0 : index
    %c0_28 = arith.constant 0 : index
    %136 = vector.load %arg9[%c0_27, %c0_28] : memref<128x256xbf16, #tpu.memory_space<vmem>>, vector<128x256xbf16>
    %cst_29 = arith.constant dense<0.000000e+00> : vector<128x256xf32>
    %137 = tpu.matmul %135, %136, %cst_29 {dimension_numbers = #tpu.dot_dimension_numbers<[1], [0], [0], [1], [0, 0, 1, 1], [], []>} : vector<128x128xbf16>, vector<128x256xbf16>, vector<128x256xf32> -> vector<128x256xf32>
    %c0_30 = arith.constant 0 : index
    %c0_31 = arith.constant 0 : index
    %138 = vector.load %arg10[%c0_30, %c0_31] : memref<1x256xf32, #tpu.memory_space<vmem>>, vector<1x256xf32>
    %139 = vector.broadcast %138 : vector<1x256xf32> to vector<128x256xf32>
    %140 = arith.addf %137, %139 : vector<128x256xf32>
    %cst_32 = arith.constant 0.000000e+00 : f32
    %141 = vector.broadcast %cst_32 : f32 to vector<128x256xf32>
    %142 = arith.maximumf %140, %141 : vector<128x256xf32>
    %143 = vector.extract_strided_slice %142 {offsets = [0, 0], sizes = [128, 128], strides = [1, 1]} : vector<128x256xf32> to vector<128x128xf32>
    %144 = vector.extract_strided_slice %142 {offsets = [0, 128], sizes = [128, 128], strides = [1, 1]} : vector<128x256xf32> to vector<128x128xf32>
    %c0_33 = arith.constant 0 : index
    %c0_34 = arith.constant 0 : index
    %c0_35 = arith.constant 0 : index
    %145 = vector.load %arg2[%c0_33, %c0_34, %c0_35] : memref<16x8x8xf32, #tpu.memory_space<vmem>>, vector<16x8x8xf32>
    %146 = vector.shape_cast %145 : vector<16x8x8xf32> to vector<128x8xf32>
    %147 = arith.truncf %146 : vector<128x8xf32> to vector<128x8xbf16>
    %c0_36 = arith.constant 0 : index
    %c0_37 = arith.constant 0 : index
    %148 = vector.load %arg11[%c0_36, %c0_37] : memref<8x256xbf16, #tpu.memory_space<vmem>>, vector<8x256xbf16>
    %cst_38 = arith.constant dense<0.000000e+00> : vector<128x256xf32>
    %149 = tpu.matmul %147, %148, %cst_38 {dimension_numbers = #tpu.dot_dimension_numbers<[1], [0], [0], [1], [0, 0, 1, 1], [], []>} : vector<128x8xbf16>, vector<8x256xbf16>, vector<128x256xf32> -> vector<128x256xf32>
    %c0_39 = arith.constant 0 : index
    %c0_40 = arith.constant 0 : index
    %150 = vector.load %arg12[%c0_39, %c0_40] : memref<1x256xf32, #tpu.memory_space<vmem>>, vector<1x256xf32>
    %151 = vector.broadcast %150 : vector<1x256xf32> to vector<128x256xf32>
    %152 = arith.addf %149, %151 : vector<128x256xf32>
    %153 = arith.negf %152 : vector<128x256xf32>
    %154 = math.exp %153 : vector<128x256xf32>
    %cst_41 = arith.constant 1.000000e+00 : f32
    %155 = vector.broadcast %cst_41 : f32 to vector<128x256xf32>
    %156 = arith.addf %155, %154 : vector<128x256xf32>
    %157 = arith.divf %155, %156 : vector<128x256xf32>
    %158 = vector.extract_strided_slice %157 {offsets = [0, 0], sizes = [128, 128], strides = [1, 1]} : vector<128x256xf32> to vector<128x128xf32>
    %159 = vector.extract_strided_slice %157 {offsets = [0, 128], sizes = [128, 128], strides = [1, 1]} : vector<128x256xf32> to vector<128x128xf32>
    %160 = vector.shape_cast %134 : vector<128x128xf32> to vector<16x8x128xf32>
    %161 = vector.extract_strided_slice %160 {offsets = [0, 0, 0], sizes = [16, 1, 128], strides = [1, 1, 1]} : vector<16x8x128xf32> to vector<16x1x128xf32>
    %162 = vector.shape_cast %161 : vector<16x1x128xf32> to vector<16x128xf32>
    %163 = vector.extract_strided_slice %145 {offsets = [0, 0, 0], sizes = [16, 1, 8], strides = [1, 1, 1]} : vector<16x8x8xf32> to vector<16x1x8xf32>
    %164 = vector.shape_cast %163 : vector<16x1x8xf32> to vector<16x8xf32>
    %165 = arith.truncf %164 : vector<16x8xf32> to vector<16x8xbf16>
    %c0_42 = arith.constant 0 : index
    %c0_43 = arith.constant 0 : index
    %166 = vector.load %arg13[%c0_42, %c0_43] : memref<8x128xbf16, #tpu.memory_space<vmem>>, vector<8x128xbf16>
    %cst_44 = arith.constant dense<0.000000e+00> : vector<16x128xf32>
    %167 = tpu.matmul %165, %166, %cst_44 {dimension_numbers = #tpu.dot_dimension_numbers<[1], [0], [0], [1], [0, 0, 1, 1], [], []>} : vector<16x8xbf16>, vector<8x128xbf16>, vector<16x128xf32> -> vector<16x128xf32>
    %c0_45 = arith.constant 0 : index
    %c0_46 = arith.constant 0 : index
    %168 = vector.load %arg14[%c0_45, %c0_46] : memref<1x128xf32, #tpu.memory_space<vmem>>, vector<1x128xf32>
    %169 = vector.broadcast %168 : vector<1x128xf32> to vector<16x128xf32>
    %170 = arith.addf %167, %169 : vector<16x128xf32>
    %171 = arith.negf %170 : vector<16x128xf32>
    %172 = math.exp %171 : vector<16x128xf32>
    %cst_47 = arith.constant 1.000000e+00 : f32
    %173 = vector.broadcast %cst_47 : f32 to vector<16x128xf32>
    %174 = arith.addf %173, %172 : vector<16x128xf32>
    %175 = arith.divf %173, %174 : vector<16x128xf32>
    %176 = arith.mulf %162, %175 : vector<16x128xf32>
    %177 = arith.mulf %143, %158 : vector<128x128xf32>
    %178 = vector.shape_cast %177 : vector<128x128xf32> to vector<16x8x128xf32>
    %cst_48 = arith.constant dense<0.000000e+00> : vector<16x128xf32>
    %179 = vector.multi_reduction <add>, %178, %cst_48 [1] : vector<16x8x128xf32> to vector<16x128xf32>
    %cst_49 = arith.constant 8.000000e+00 : f32
    %180 = vector.broadcast %cst_49 : f32 to vector<16x128xf32>
    %181 = arith.divf %179, %180 : vector<16x128xf32>
    %182 = arith.addf %176, %181 : vector<16x128xf32>
    %c0_50 = arith.constant 0 : index
    %c0_51 = arith.constant 0 : index
    %183 = vector.load %arg15[%c0_50, %c0_51] : memref<16x128xf32, #tpu.memory_space<vmem>>, vector<16x128xf32>
    tpu.vector_store %arg15[%c0_50, %c0_51], %182 {strides = array<i32>} : memref<16x128xf32, #tpu.memory_space<vmem>>, vector<16x128xf32>,
    %184 = arith.mulf %144, %159 : vector<128x128xf32>
    %185 = arith.truncf %184 : vector<128x128xf32> to vector<128x128xbf16>
    %c0_52 = arith.constant 0 : index
    %c0_53 = arith.constant 0 : index
    %186 = vector.load %arg16[%c0_52, %c0_53] : memref<128x128xbf16, #tpu.memory_space<vmem>>, vector<128x128xbf16>
    tpu.vector_store %arg16[%c0_52, %c0_53], %185 {strides = array<i32>} : memref<128x128xbf16, #tpu.memory_space<vmem>>, vector<128x128xbf16>,
    return
  }
  func.func @transform_0(%arg0: i32) -> (i32, i32, i32) {
    %c0_i32 = arith.constant 0 : i32
    %c0_i32_0 = arith.constant 0 : i32
    %c0_i32_1 = arith.constant 0 : i32
    return %arg0, %c0_i32, %c0_i32_0 : i32, i32, i32
  }
  func.func @transform_1(%arg0: i32) -> (i32, i32, i32) {
    %c0_i32 = arith.constant 0 : i32
    %c0_i32_0 = arith.constant 0 : i32
    %c0_i32_1 = arith.constant 0 : i32
    return %arg0, %c0_i32, %c0_i32_0 : i32, i32, i32
  }
  func.func @transform_2(%arg0: i32) -> (i32, i32, i32) {
    %c0_i32 = arith.constant 0 : i32
    %c0_i32_0 = arith.constant 0 : i32
    %c0_i32_1 = arith.constant 0 : i32
    return %arg0, %c0_i32, %c0_i32_0 : i32, i32, i32
  }
  func.func @transform_3(%arg0: i32) -> (i32, i32, i32) {
    %c0_i32 = arith.constant 0 : i32
    %c0_i32_0 = arith.constant 0 : i32
    %c0_i32_1 = arith.constant 0 : i32
    return %arg0, %c0_i32, %c0_i32_0 : i32, i32, i32
  }
  func.func @transform_4(%arg0: i32) -> (i32, i32, i32) {
    %c0_i32 = arith.constant 0 : i32
    %c0_i32_0 = arith.constant 0 : i32
    %c0_i32_1 = arith.constant 0 : i32
    %c0_i32_2 = arith.constant 0 : i32
    return %c0_i32, %c0_i32_0, %c0_i32_1 : i32, i32, i32
  }
  func.func @transform_5(%arg0: i32) -> (i32, i32, i32) {
    %c0_i32 = arith.constant 0 : i32
    %c0_i32_0 = arith.constant 0 : i32
    %c0_i32_1 = arith.constant 0 : i32
    %c0_i32_2 = arith.constant 0 : i32
    return %c0_i32, %c0_i32_0, %c0_i32_1 : i32, i32, i32
  }
  func.func @transform_6(%arg0: i32) -> (i32, i32) {
    %c0_i32 = arith.constant 0 : i32
    %c0_i32_0 = arith.constant 0 : i32
    %c0_i32_1 = arith.constant 0 : i32
    return %c0_i32, %c0_i32_0 : i32, i32
  }
  func.func @transform_7(%arg0: i32) -> (i32, i32) {
    %c0_i32 = arith.constant 0 : i32
    %c0_i32_0 = arith.constant 0 : i32
    %c0_i32_1 = arith.constant 0 : i32
    return %c0_i32, %c0_i32_0 : i32, i32
  }
  func.func @transform_8(%arg0: i32) -> (i32, i32) {
    %c0_i32 = arith.constant 0 : i32
    %c0_i32_0 = arith.constant 0 : i32
    %c0_i32_1 = arith.constant 0 : i32
    return %c0_i32, %c0_i32_0 : i32, i32
  }
  func.func @transform_9(%arg0: i32) -> (i32, i32) {
    %c0_i32 = arith.constant 0 : i32
    %c0_i32_0 = arith.constant 0 : i32
    %c0_i32_1 = arith.constant 0 : i32
    return %c0_i32, %c0_i32_0 : i32, i32
  }
  func.func @transform_10(%arg0: i32) -> (i32, i32) {
    %c0_i32 = arith.constant 0 : i32
    %c0_i32_0 = arith.constant 0 : i32
    %c0_i32_1 = arith.constant 0 : i32
    return %c0_i32, %c0_i32_0 : i32, i32
  }
  func.func @transform_11(%arg0: i32) -> (i32, i32) {
    %c0_i32 = arith.constant 0 : i32
    %c0_i32_0 = arith.constant 0 : i32
    %c0_i32_1 = arith.constant 0 : i32
    return %c0_i32, %c0_i32_0 : i32, i32
  }
  func.func @transform_12(%arg0: i32) -> (i32, i32) {
    %c0_i32 = arith.constant 0 : i32
    %c0_i32_0 = arith.constant 0 : i32
    %c0_i32_1 = arith.constant 0 : i32
    return %c0_i32, %c0_i32_0 : i32, i32
  }
  func.func @transform_13(%arg0: i32) -> (i32, i32) {
    %c0_i32 = arith.constant 0 : i32
    %c0_i32_0 = arith.constant 0 : i32
    %c0_i32_1 = arith.constant 0 : i32
    return %c0_i32, %c0_i32_0 : i32, i32
  }
  func.func @transform_14(%arg0: i32) -> (i32, i32) {
    %c0_i32 = arith.constant 0 : i32
    %c0_i32_0 = arith.constant 0 : i32
    return %arg0, %c0_i32 : i32, i32
  }
  func.func @transform_15(%arg0: i32) -> (i32, i32) {
    %c0_i32 = arith.constant 0 : i32
    %c0_i32_0 = arith.constant 0 : i32
    return %arg0, %c0_i32 : i32, i32
  }
}

</mosaic_0001>

<bundles_post_ra>
// kernel: tpu_custom_call.1
= control target key start
LH: loop header
LB: loop body
LE: loop exit
PB: predicated region body
PF: predicated region fallthrough
CT: control target
= control target key end

     0   :  { %s8559_s0 = inlined_call_operand.vmem [shape: bf16[32,8,32], index: 0, kind: input, shape index: {}]   ;;  %s8560_s1 = inlined_call_operand.vmem [shape: f32[32,8,8], index: 1, kind: input, shape index: {}]   ;;  %s8561_s2 = inlined_call_operand.vmem [shape: bf16[32,8,8], index: 2, kind: input, shape index: {}]   ;;  %s8562_s3 = inlined_call_operand.vmem [shape: bf16[32,8,32], index: 3, kind: input, shape index: {}]   ;;  %s8563_s4 = inlined_call_operand.vmem [shape: bf16[2,32,32], index: 4, kind: input, shape index: {}]   ;;  %s8564_s5 = inlined_call_operand.vmem [shape: f32[2,1,32], index: 5, kind: input, shape index: {}]   ;;  %s8565_s6 = inlined_call_operand.vmem [shape: bf16[32,128], index: 6, kind: input, shape index: {}]   ;;  %s8566_s7 = inlined_call_operand.hbm [shape: f32[1,128], index: 7, kind: input, shape index: {}]   ;;  %s8567_s8 = inlined_call_operand.vmem [shape: bf16[128,256], index: 8, kind: input, shape index: {}]   ;;  %s8568_s9 = inlined_call_operand.hbm [shape: f32[1,256], index: 9, kind: input, shape index: {}]   ;;  %s8569_s10 = inlined_call_operand.vmem [shape: bf16[8,256], index: 10, kind: input, shape index: {}]   ;;  %s8570_s11 = inlined_call_operand.vmem [shape: f32[1,256], index: 11, kind: input, shape index: {}]   ;;  %s8571_s12 = inlined_call_operand.vmem [shape: bf16[8,128], index: 12, kind: input, shape index: {}]   ;;  %s8572_s13 = inlined_call_operand.vmem [shape: f32[1,128], index: 13, kind: input, shape index: {}]   ;;  %s8573_s14 = inlined_call_operand.hbm [shape: f32[32,128], index: 14, kind: output, shape index: {0}]   ;;  %s8574_s15 = inlined_call_operand.hbm [shape: bf16[256,128], index: 15, kind: output, shape index: {1}]  }
   0x1   :  { %8794 = sst [smem:[#allocation88_spill]] %s8573_s14 }
   0x2   :  { %21 = vsyncpa [#allocation3], 0 }
   0x3   :  { %22 = vsyncpa [#allocation6], 0 }
   0x4   :  { %23 = vsyncpa [#allocation4], 0 }
   0x5   :  { %25 = vsyncpa [#allocation4 + $0x1], 0 }
   0x6   :  { %26 = vsyncpa [#allocation9], 0 }
   0x7   :  { %28 = vsyncpa [#allocation9 + $0x1], 0  ;;  %s5897_s18 = smov 0   ;;  %s5899_s19 = smov 0  }
   0x8   :  { %s5901_s20 = smov 0   ;;  %s5903_s21 = smov 0  }
   0x9 LB: > { %8795 = sst [smem:[#allocation14_spill]] %s5785_s18  ;;  %s5918_s22 = sadd.s32 4294967295, %s5797_s21   ;;  %s5797_s21 = sphi %s5903_s21, %s9246_s21   ;;  %s5793_s20 = sphi %s5901_s20, %s9248_s20   ;;  %s5789_s19 = sphi %s5899_s19, %s9250_s19   ;;  %s5785_s18 = sphi %s5897_s18, %s9249_s18  }
   0xa   : > { %8796 = sst [smem:[#allocation15_spill]] %s5793_s20  ;;  %s4599_s23 = sadd.s32 4294967294, %s5797_s21  }
   0xb   : > { %8797 = sst [smem:[#allocation16_spill]] %s5797_s21  ;;  %s5922_s24 = sadd.s32 1, %s5797_s21  }
   0xc   : > { %8798 = sst [smem:[#allocation17_spill]] %s5922_s24  ;;  %s355_s25 = sadd.s32 1, %s5793_s20 }
   0xd   : > { %s352_s26 = ssub.s32 %s5797_s21, %s5922_s24  ;;  %p365_p0 = scmp.ne.s32.totalorder %s5793_s20, %s5789_s19 }
   0xe   : > { %p353_p1 = scmp.eq.s32.totalorder %s352_s26, 0  ;;  %p366_p2 = scmp.eq.s32.totalorder %s5918_s22, 1 }
   0xf   : > { %p371_p3 = scmp.ne.s32.totalorder %s5789_s19, %s5785_s18  ;;  %p372_p4 = scmp.eq.s32.totalorder %s4599_s23, 1 }
  0x10   : > { %s5933_s27 = scalar_select %p353_p1, %s5793_s20, %s355_s25  }
  0x11   : > { %p5935_p5 = por %p366_p2, %p365_p0  ;;  %p5939_p6 = por %p372_p4, %p371_p3 }
  0x12   : > { %8799 = sst [smem:[#allocation18_spill]] %s5933_s27  ;;  %p4600_p7 = scmp.ge.s32.totalorder %s5797_s21, 1 }
  0x13   : > { %s8800_s28 = scalar_select %p5935_p5, 1, 0 }
  0x14   : > { %s8801_s29 = scalar_select %p5939_p6, 1, 0 }
  0x15   : > { %p405_p8 = scmp.lt.s32.totalorder %s5797_s21, 3  ;;  %p8581_p9 = scmp.eq.s32.totalorder %s5918_s22, 0 }
  0x16   : > { %8802 = sst [smem:[#allocation19_spill]] %s8801_s29  ;;  %s5799_s16 = smov [#allocation2]  }
  0x17   : > { %p5946_p10 = pnand %p4600_p7, %p405_p8  ;;  %s427_s17 = sshll.u32 %s5799_s16, 4  ;;  %s428_s17 = int_to_ptr.vmem [resolvable:$true] %s427_s17 }
  0x18   : > { %s5800_s23 = smov [#allocation5]   ;;  %s5639_s24 = scalar_lea.hbm %s8566_s7, 16 }
  0x19   : > { %s8803_s30 = scalar_select %p5946_p10, 1, 0 }
  0x1a   : > { %p5038_p11 = pneg %p5946_p10  ;;  %s441_s25 = sshll.u32 %s5800_s23, 4  ;;  %s5958_s25 = int_to_ptr.vmem [resolvable:$true] %s441_s25 }
  0x1b   : > { %p5640_p13 = scmp.ne.s32.totalorder %s8566_s7, %s5639_s24  ;;  %p5646_p3 = scmp.lt.u32.totalorder %s5639_s24, %s8566_s7 }
  0x1c   : > { %p5954_p12 = pnand %p8581_p9, %p5038_p11 }
  0x1e   : > { %p5641_p0 = pneg %p5954_p12 }
  0x20   : > { %p5642_p1 = pnand %p5641_p0, %p5640_p13 }
  0x22   : > { %p5643_p2 = pneg %p5642_p1 }
  0x24   : > { %p5648_p4 = pnand %p5646_p3, %p5643_p2 }
  0x26   : > { %5651 = shalt.err (!%p5648_p4)
}
  0x27   : > { %s5652_s21 = scalar_lea.vmem %s428_s17, 16  ;;  %s5659_s20 = scalar_lea.vmem %s428_s17, 32 }
  0x28   : > { %p5653_p7 = scmp.ne.s32.totalorder %s428_s17, %s5652_s21  ;;  %p5660_p9 = scmp.lt.s32.totalorder %s428_s17, %s428_s17 }
  0x29   : > { %p5661_p6 = scmp.lt.s32.totalorder %s5659_s20, %s5652_s21 }
  0x2a   : > { %p5655_p8 = pnand %p5653_p7, %p5641_p0 }
  0x2b   : > { %p5662_p5 = por %p5661_p6, %p5660_p9 }
  0x2c   : > { %p5656_p11 = pneg %p5655_p8 }
  0x2e   : > { %p5663_p10 = pnand %p5662_p5, %p5656_p11 }
  0x30   : > { %5666 = shalt.err (!%p5663_p10)
}
  0x31   : > { %5041 = dma.hbm_to_vmem [thread:$0]  (!%p5954_p12), %s8566_s7, 16, %s428_s17, [#allocation3]  }
  0x32   : > { %s5667_s16 = scalar_lea.hbm %s8568_s9, 32 }
  0x33   : > { %p5668_p13 = scmp.ne.s32.totalorder %s8568_s9, %s5667_s16  ;;  %p5674_p9 = scmp.lt.u32.totalorder %s5667_s16, %s8568_s9 }
  0x35   : > { %p5670_p6 = pnand %p5668_p13, %p5641_p0 }
  0x37   : > { %p5671_p5 = pneg %p5670_p6 }
  0x39   : > { %p5676_p10 = pnand %p5674_p9, %p5671_p5 }
  0x3b   : > { %5679 = shalt.err (!%p5676_p10)
}
  0x3c   : > { %s5680_s17 = scalar_lea.vmem %s5958_s25, 32  ;;  %p5688_p4 = scmp.lt.s32.totalorder %s5958_s25, %s5958_s25 }
  0x3d   : > { %p5681_p1 = scmp.ne.s32.totalorder %s5958_s25, %s5680_s17  ;;  %p5689_p7 = scmp.lt.s32.totalorder %s5680_s17, %s5680_s17 }
  0x3f   : > { %p5683_p2 = pnand %p5681_p1, %p5641_p0  ;;  %p5690_p8 = por %p5689_p7, %p5688_p4 }
  0x41   : > { %p5684_p3 = pneg %p5683_p2 }
  0x43   : > { %p5691_p11 = pnand %p5690_p8, %p5684_p3 }
  0x45   : > { %5694 = shalt.err (!%p5691_p11)
}
  0x46   : > { %5044 = dma.hbm_to_vmem [thread:$0]  (!%p5954_p12), %s8568_s9, 32, %s5958_s25, [#allocation6]  }
  0x47   : > { %p8805_p13 = scmp.ne.s32.totalorder %s8803_s30, 0 }
  0x49   : > { %502 = sbr.rel (%p8805_p13) target bundleno = 1437 (0x59d), region = 76 }
  0x50   : > { %p8806_p6 = scmp.eq.s32.totalorder %s5918_s22, 0 }
  0x52   : > { %5768 = dma.done.wait (%p8806_p6), [#allocation3], 16   ;;  %p8807_p0 = pmov %p8806_p6 }
  0x54   : > { %5770 = vsyncadd (%p8807_p0), [#allocation3], 4294967280  ;;  %p8808_p5 = pmov %p8807_p0 }
  0x55   : > { %p8809_p9 = pmov %p8807_p0 }
  0x56   : > { %5772 = dma.done.wait (%p8808_p5), [#allocation6], 32  }
  0x57   : > { %5774 = vsyncadd (%p8809_p9), [#allocation6], 4294967264  ;;  %s4609_s26 = sshll.u32 %s5918_s22, 4  ;;  %v5801_v0 = vmov 1   ;;  %v8585_v1 = vmov 0   ;;  %v5803_v13 = vmov 2   ;;  %v777_v48 = vlaneseq }
  0x58   : > { %5111 = vset.pattern.permute.xlu1 %v5801_v0  ;;  %5105 = vset.pattern.permute.xlu0 %v8585_v1  ;;  %p575_p12 = scmp.lt.s32.totalorder %s4609_s26, 31  ;;  %v5804_v23 = vmov 3   ;;  %v5805_v25 = vmov 4   ;;  %v8589_v33 = vmov 5   ;;  %v8588_v34 = vmov 6   ;;  %v5471_v40 = vld [vmem:[%s8563_s4] sm:$0xff]  }
  0x59   : > { %v8587_v39 = vmov 7   ;;  %4956 = vmatprep.subr.bf16.mxu0 %v5471_v40  ;;  %5022 = vmatprep.subr.bf16.mxu1 %v5471_v40  ;;  %v5472_v41 = vld [vmem:[%s8563_s4 + $0x8] sm:$0xff]   ;;  %v6152_v51 = vshrl.u32 %v777_v48, 7  ;;  %vm2024_vm0 = vcmask 261120   ;;  %vm3612_vm1 = vcmask 1043456   ;;  %s8282_s21 = sand.u32 1, %s5789_s19  }
  0x5a   : > { %s9252_s26 = smov (!%p575_p12, %s4609_s26), 31  ;;  %4957 = vmatpush3.bf16.msra.mxu0 %v5471_v40  ;;  %5024 = vmatpush3.bf16.msra.mxu1 %v5471_v40  ;;  %vm3981_vm2 = vcmask 1041409   ;;  %vm3984_vm3 = vcmask 1042434   ;;  %vm3987_vm4 = vcmask 1043459   ;;  %vm3990_vm5 = vcmask 1044484   ;;  %s4759_s17 = sshll.u32 %s5918_s22, 10 }
  0x5b   : > { %s6023_s30 = sshll.u32 %s9252_s26, 2  ;;  %4958 = vmatprep.subr.bf16.mxu0 %v5472_v41  ;;  %5023 = vmatprep.subr.bf16.mxu1 %v5472_v41  ;;  %v6171_v57 = vsub.s32 1, %v6152_v51  ;;  %v6179_v60 = vsub.s32 0, %v6152_v51  ;;  %s4612_s23 = sshll.u32 %s9252_s26, 3  ;;  %vm3993_vm6 = vcmask 1045509   ;;  %vm3996_vm7 = vcmask 1046534  }
  0x5c   : > { %s6029_s24 = scalar_lea.vmem %s8561_s2, %s6023_s30  ;;  %s6149_s14 = scalar_lea.vmem %s8559_s0, %s6023_s30  ;;  %vm3999_vm8 = vcmask 1047559   ;;  %vm3587_vm9 = vcmask 64512   ;;  %vm5810_vm10 = vmmov 0  }
  0x5d   : > { %v4761_v2 = vld [vmem:[%s6029_s24] sm:$0xff]   ;;  %v4896_v3 = vld [vmem:[%s6029_s24 + $0x8] sm:$0xff]   ;;  %v4897_v10 = vld [vmem:[%s6029_s24 + $0x10] sm:$0xff]   ;;  %s6159_s18 = scalar_lea.vmem %s8562_s3, %s6023_s30  ;;  %s7945_s26 = scalar_lea.vmem %s8560_s1, %s4612_s23 }
  0x5e   : > { %v4762_v4 = vunpack.c.l.bf16 %v4761_v2  ;;  %v4763_v5 = vunpack.c.h.bf16 %v4761_v2  ;;  %v4766_v6 = vunpack.c.l.bf16 %v4896_v3  ;;  %v4767_v7 = vunpack.c.h.bf16 %v4896_v3  ;;  %v4899_v11 = vld [vmem:[%s6029_s24 + $0x20] sm:$0xff]   ;;  %v4900_v12 = vld [vmem:[%s6029_s24 + $0x28] sm:$0xff]   ;;  %v4901_v24 = vld [vmem:[%s6029_s24 + $0x30] sm:$0xff]   ;;  %4959 = vmatpush3.bf16.msra.mxu0 %v5472_v41  ;;  %5025 = vmatpush3.bf16.msra.mxu1 %v5472_v41  ;;  %s4608_s23 = sshll.u32 %s8282_s21, 6  ;;  %p9236_p1 = scmp.ne.s32.totalorder %s8800_s28, 0 }
  0x5f   : > { %v4770_v14 = vunpack.c.l.bf16 %v4897_v10  ;;  %v4771_v15 = vunpack.c.h.bf16 %v4897_v10  ;;  %v4778_v16 = vunpack.c.l.bf16 %v4899_v11  ;;  %v4779_v17 = vunpack.c.h.bf16 %v4899_v11  ;;  %v4902_v28 = vld [vmem:[%s6029_s24 + $0x38] sm:$0xff]   ;;  %v4825_v52 = vld [vmem:[%s6149_s14] sm:$0xff]   ;;  %v4910_v55 = vld [vmem:[%s6149_s14 + $0x8] sm:$0xff]   ;;  %s8300_s20 = scalar_lea.vmem [#allocation8], %s4608_s23  ;;  %s5811_s16 = smov [#allocation8]  }
  0x60   : > { %v6033_v8 = vpack.i.bf16 %v4763_v5, %v4762_v4  ;;  %v5117_v9 = vpack.i.bf16 %v4767_v7, %v4766_v6  ;;  %v4782_v19 = vunpack.c.l.bf16 %v4900_v12  ;;  %v4783_v20 = vunpack.c.h.bf16 %v4900_v12  ;;  %v4898_v32 = vld [vmem:[%s6029_s24 + $0x18] sm:$0xff]   ;;  %v6174_v58 = vld [vmem:[%s6159_s18] sm:$0xff]   ;;  %v6182_v61 = vld [vmem:[%s6159_s18 + $0x8] sm:$0xff]   ;;  %s4418_s24 = scalar_lea.sflag [#allocation9], %s8282_s21  ;;  %s5699_s23 = sshll.u32 %s5811_s16, 4  ;;  %s5700_s23 = int_to_ptr.vmem [resolvable:$false] %s5699_s23 }
  0x61   : > { %v6042_v18 = vpack.i.bf16 %v4771_v15, %v4770_v14  ;;  %v6046_v21 = vpack.i.bf16 %v4779_v17, %v4778_v16  ;;  %v4786_v26 = vunpack.c.l.bf16 %v4901_v24  ;;  %v4787_v27 = vunpack.c.h.bf16 %v4901_v24  ;;  %8818 = vst [vmem:[#allocation28_spill] sm:$0xff] %v6174_v58  ;;  %8819 = vst [vmem:[#allocation29_spill] sm:$0xff] %v6182_v61  ;;  %v4911_v11 = vld [vmem:[%s6149_s14 + $0x10] sm:$0xff]  }
  0x62   : > { %5113 = vperm.xlu1 %5111, %v6033_v8   ;;  %5107 = vperm.xlu0 %5105, %v6033_v8   ;;  %v6048_v22 = vpack.i.bf16 %v4783_v20, %v4782_v19  ;;  %v4790_v30 = vunpack.c.l.bf16 %v4902_v28  ;;  %v4791_v31 = vunpack.c.h.bf16 %v4902_v28  ;;  %v4774_v36 = vunpack.c.l.bf16 %v4898_v32  ;;  %v6225_v20 = vld [vmem:[%s6159_s18 + $0x10] sm:$0xff]  }
  0x63   : > { %v6059_v29 = vpack.i.bf16 %v4787_v27, %v4786_v26  ;;  %v4775_v37 = vunpack.c.h.bf16 %v4898_v32  ;;  %v6168_v56 = vunpack.c.l.bf16 %v4825_v52  ;;  %v6176_v59 = vunpack.c.h.bf16 %v4825_v52  ;;  %8822 = vst [vmem:[#allocation32_spill] sm:$0xff] %v6225_v20 }
  0x64   : > { %v6064_v35 = vpack.i.bf16 %v4791_v31, %v4790_v30  ;;  %v6184_v62 = vunpack.c.l.bf16 %v4910_v55  ;;  %v6186_v63 = vunpack.c.h.bf16 %v4910_v55  ;;  %v6189_v2 = vsub.s32 2, %v6152_v51 }
  0x65   : > { %v5254_v38 = vpack.i.bf16 %v4775_v37, %v4774_v36  ;;  %v8595_v5 = vunpack.c.l.bf16 %v6174_v58  ;;  %v8594_v6 = vunpack.c.h.bf16 %v6174_v58  ;;  %v940_v7 = vrot.slane %v6168_v56, %v6171_v57  ;;  %v4912_v36 = vld [vmem:[%s6149_s14 + $0x18] sm:$0xff]  }
  0x66   : > { %5118 = vperm.xlu1 %5111, %v5117_v9   ;;  %5122 = vset.pattern.permute.xlu0 %v5803_v13  ;;  %v6203_v10 = vsub.s32 3, %v6152_v51  ;;  %v944_v12 = vrot.slane %v6176_v59, %v6171_v57  ;;  %v780_v14 = vrot.slane %v6168_v56, %v6179_v60  ;;  %v6214_v15 = vsub.s32 4, %v6152_v51 }
  0x67   : > { %5124 = vperm.xlu0 %5122, %v6033_v8   ;;  %v948_v16 = vrot.slane %v6184_v62, %v6171_v57  ;;  %v952_v17 = vrot.slane %v6186_v63, %v6171_v57  ;;  %v1104_v19 = vrot.slane %v6176_v59, %v6189_v2  ;;  %v6231_v24 = vunpack.c.l.bf16 %v4911_v11 }
  0x68   : > { %v6233_v26 = vunpack.c.h.bf16 %v4911_v11  ;;  %v788_v30 = vrot.slane %v6184_v62, %v6179_v60  ;;  %v792_v31 = vrot.slane %v6186_v63, %v6179_v60  ;;  %v6253_v41 = vsub.s32 5, %v6152_v51 }
  0x69   : > { %8823 = vst [vmem:[#allocation33_spill] sm:$0xff] %v6231_v24  ;;  %v6260_v11 = vsub.s32 6, %v6152_v51  ;;  %v6282_v55 = vsub.s32 7, %v6152_v51 }
  0x6a   : > { %5134 = vset.pattern.permute.xlu1 %v5803_v13  ;;  %8824 = vst [vmem:[#allocation34_spill] sm:$0xff] %v6233_v26 }
  0x6b   : > { %5136 = vperm.xlu1 %5134, %v5117_v9   ;;  %5128 = vset.pattern.permute.xlu0 %v8585_v1 }
  0x6c   : > { %5130 = vperm.xlu0 %5128, %v5117_v9  }
  0x6f   : > { %5140 = vset.pattern.permute.xlu1 %v5804_v23 }
  0x70   : > { %5142 = vperm.xlu1 %5140, %v6033_v8   ;;  %5181 = vperm.xlu0 %5128, %v6042_v18  }
  0x74   : > { %5146 = vset.pattern.permute.xlu1 %v5805_v25  ;;  %5185 = vset.pattern.permute.xlu0 %v5804_v23 }
  0x75   : > { %5148 = vperm.xlu1 %5146, %v6033_v8   ;;  %5187 = vperm.xlu0 %5185, %v5117_v9  }
  0x79   : > { %5153 = vperm.xlu1 %5146, %v5117_v9   ;;  %5215 = vperm.xlu0 %5185, %v6042_v18  }
  0x7d   : > { %5157 = vset.pattern.permute.xlu1 %v8589_v33  ;;  %5219 = vset.pattern.permute.xlu0 %v8588_v34 }
  0x7e   : > { %5159 = vperm.xlu1 %5157, %v5117_v9   ;;  %5221 = vperm.xlu0 %5219, %v5117_v9  }
  0x82   : > { %5163 = vset.pattern.permute.xlu1 %v8588_v34  ;;  %5249 = vperm.xlu0 %5219, %v6042_v18  }
  0x83   : > { %5165 = vperm.xlu1 %5163, %v6033_v8  }
  0x86   : > { %5253 = vset.pattern.permute.xlu0 %v5801_v0 }
  0x87   : > { %5169 = vset.pattern.permute.xlu1 %v8587_v39  ;;  %5255 = vperm.xlu0 %5253, %v5254_v38  }
  0x88   : > { %5171 = vperm.xlu1 %5169, %v6033_v8  }
  0x8b   : > { %5283 = vperm.xlu0 %5253, %v6046_v21  }
  0x8c   : > { %5176 = vperm.xlu1 %5169, %v5117_v9   ;;  %v8598_v9 = vunpack.c.h.bf16 %v6182_v61 }
  0x8f   : > { %5287 = vset.pattern.permute.xlu0 %v5805_v25 }
  0x90   : > { %5191 = vset.pattern.permute.xlu1 %v8585_v1  ;;  %5289 = vperm.xlu0 %5287, %v5254_v38  }
  0x91   : > { %5193 = vperm.xlu1 %5191, %v5254_v38  }
  0x94   : > { %5317 = vperm.xlu0 %5287, %v6046_v21  }
  0x95   : > { %5197 = vset.pattern.permute.xlu1 %v5801_v0 }
  0x96   : > { %5199 = vperm.xlu1 %5197, %v6042_v18  }
  0x98   : > { %5321 = vset.pattern.permute.xlu0 %v8589_v33 }
  0x99   : > { %5323 = vperm.xlu0 %5321, %v6033_v8   ;;  %v8599_v8 = vunpack.c.l.bf16 %v6182_v61 }
  0x9a   : > { %5203 = vset.pattern.permute.xlu1 %v5803_v13 }
  0x9b   : > { %5205 = vperm.xlu1 %5203, %v6042_v18  }
  0x9d   : > { %5340 = vperm.xlu0 %5321, %v6048_v22  }
  0x9f   : > { %5210 = vperm.xlu1 %5203, %v5254_v38  }
  0xa1   : > { %5344 = vset.pattern.permute.xlu0 %v8587_v39 }
  0xa2   : > { %5346 = vperm.xlu0 %5344, %v5254_v38  }
  0xa3   : > { %5225 = vset.pattern.permute.xlu1 %v5804_v23 }
  0xa4   : > { %5227 = vperm.xlu1 %5225, %v5254_v38  }
  0xa6   : > { %5362 = vperm.xlu0 %5344, %v6046_v21  }
  0xa8   : > { %5231 = vset.pattern.permute.xlu1 %v5805_v25 }
  0xa9   : > { %5233 = vperm.xlu1 %5231, %v6042_v18  }
  0xaa   : > { %5378 = vset.pattern.permute.xlu0 %v8585_v1 }
  0xab   : > { %5380 = vperm.xlu0 %5378, %v6064_v35  }
  0xad   : > { %5237 = vset.pattern.permute.xlu1 %v8589_v33 }
  0xae   : > { %5239 = vperm.xlu1 %5237, %v6042_v18  }
  0xaf   : > { %5384 = vset.pattern.permute.xlu0 %v5803_v13 }
  0xb0   : > { %5386 = vperm.xlu0 %5384, %v6048_v22  }
  0xb2   : > { %5244 = vperm.xlu1 %5237, %v5254_v38  }
  0xb4   : > { %5402 = vperm.xlu0 %5384, %v6059_v29  }
  0xb6   : > { %5259 = vset.pattern.permute.xlu1 %v8588_v34 }
  0xb7   : > { %5261 = vperm.xlu1 %5259, %v5254_v38  }
  0xb8   : > { %5418 = vset.pattern.permute.xlu0 %v5804_v23 }
  0xb9   : > { %5420 = vperm.xlu0 %5418, %v6064_v35  }
  0xbb   : > { %5265 = vset.pattern.permute.xlu1 %v8587_v39 }
  0xbc   : > { %5267 = vperm.xlu1 %5265, %v6042_v18   ;;  %v1100_v18 = vrot.slane %v6168_v56, %v6189_v2 }
  0xbd   : > { %5435 = vset.pattern.permute.xlu0 %v8589_v33 }
  0xbe   : > { %5437 = vperm.xlu0 %5435, %v6059_v29  }
  0xc0   : > { %5271 = vset.pattern.permute.xlu1 %v8585_v1 }
  0xc1   : > { %5273 = vperm.xlu1 %5271, %v6046_v21  }
  0xc2   : > { %5453 = vset.pattern.permute.xlu0 %v8588_v34 }
  0xc3   : > { %5455 = vperm.xlu0 %5453, %v6064_v35  }
  0xc5   : > { %5278 = vperm.xlu1 %5271, %v6048_v22  }
  0xc7   : > { %5470 = vset.pattern.permute.xlu0 %v8587_v39 }
  0xc9   : > { %5293 = vset.pattern.permute.xlu1 %v5801_v0 }
  0xca   : > { %5295 = vperm.xlu1 %5293, %v6048_v22  }
  0xce   : > { %5299 = vset.pattern.permute.xlu1 %v5803_v13 }
  0xcf   : > { %5301 = vperm.xlu1 %5299, %v6046_v21  }
  0xd3   : > { %5305 = vset.pattern.permute.xlu1 %v5804_v23 }
  0xd4   : > { %5307 = vperm.xlu1 %5305, %v6046_v21  }
  0xd8   : > { %5312 = vperm.xlu1 %5305, %v6048_v22  }
  0xdc   : > { %5327 = vset.pattern.permute.xlu1 %v5805_v25 }
  0xdd   : > { %5329 = vperm.xlu1 %5327, %v6048_v22  }
  0xe1   : > { %5333 = vset.pattern.permute.xlu1 %v8589_v33  ;;  %v6124_v42 = vpop.permute.xlu1 %5113  ;;  %v6126_v43 = vpop.permute.xlu0 %5107 }
  0xe2   : > { %5335 = vperm.xlu1 %5333, %v6046_v21   ;;  %v8590_v48 = vunpack.i.h.bf16 %v6126_v43  ;;  %v8591_v52 = vunpack.i.l.bf16 %v6126_v43 }
  0xe5   : > { %v6129_v44 = vpop.permute.xlu1 %5118 }
  0xe6   : > { %8810 = vst [vmem:[#allocation20_spill] sm:$0xff] %v6129_v44  ;;  %5350 = vset.pattern.permute.xlu1 %v8588_v34  ;;  %v6132_v45 = vpop.permute.xlu0 %5124 }
  0xe7   : > { %8811 = vst [vmem:[#allocation21_spill] sm:$0xff] %v6132_v45  ;;  %5352 = vperm.xlu1 %5350, %v6046_v21  }
  0xea   : > { %v6135_v46 = vpop.permute.xlu1 %5136 }
  0xeb   : > { %8812 = vst [vmem:[#allocation22_spill] sm:$0xff] %v6135_v46  ;;  %5357 = vperm.xlu1 %5350, %v6048_v22   ;;  %v6138_v47 = vpop.permute.xlu0 %5130 }
  0xec   : > { %8813 = vst [vmem:[#allocation23_spill] sm:$0xff] %v6138_v47  ;;  %v8592_v38 = vunpack.i.h.bf16 %v6138_v47 }
  0xee   : > { %v844_v40 = vmul.f32 %v8592_v38, %v792_v31  ;;  %v8600_v31 = vunpack.i.h.bf16 %v6129_v44  ;;  %v8601_v38 = vunpack.i.l.bf16 %v6129_v44 }
  0xef   : > { %5366 = vset.pattern.permute.xlu1 %v8587_v39  ;;  %v6141_v49 = vpop.permute.xlu1 %5142  ;;  %v6143_v50 = vpop.permute.xlu0 %5181  ;;  %v8593_v39 = vunpack.i.l.bf16 %v6138_v47 }
  0xf0   : > { %8814 = vst [vmem:[#allocation24_spill] sm:$0xff] %v6141_v49  ;;  %8815 = vst [vmem:[#allocation25_spill] sm:$0xff] %v6143_v50  ;;  %5368 = vperm.xlu1 %5366, %v6048_v22   ;;  %v6325_v22 = vunpack.c.l.bf16 %v4912_v36 }
  0xf1   : > { %v843_v21 = vmul.f32 %v8593_v39, %v788_v30 }
  0xf2   : > { %8831 = vst [vmem:[#allocation41_spill] sm:$0xff] %v6325_v22 }
  0xf3   : > { %v859_v39 = vadd.f32 %v8599_v8, %v843_v21  ;;  %v1003_v21 = vmul.f32 %v8601_v38, %v948_v16  ;;  %v6378_v8 = vld [vmem:[%s6159_s18 + $0x18] sm:$0xff]   ;;  %v8841_v38 = vunpack.i.h.bf16 %v6141_v49 }
  0xf4   : > { %5372 = vset.pattern.permute.xlu1 %v8585_v1  ;;  %v6162_v53 = vpop.permute.xlu1 %5148  ;;  %v6164_v54 = vpop.permute.xlu0 %5187  ;;  %v841_v1 = vmul.f32 %v8591_v52, %v780_v14  ;;  %v8596_v14 = vunpack.i.h.bf16 %v6124_v42  ;;  %8835 = vst [vmem:[#allocation45_spill] sm:$0xff] %v6378_v8 }
  0xf5   : > { %8816 = vst [vmem:[#allocation26_spill] sm:$0xff] %v6162_v53  ;;  %8817 = vst [vmem:[#allocation27_spill] sm:$0xff] %v6164_v54  ;;  %5374 = vperm.xlu1 %5372, %v6059_v29  }
  0xf6   : > { %v857_v32 = vadd.f32 %v8595_v5, %v841_v1  ;;  %v1002_v1 = vmul.f32 %v8596_v14, %v944_v12  ;;  %v8603_v5 = vunpack.i.l.bf16 %v6132_v45  ;;  %v8604_v12 = vunpack.i.h.bf16 %v6135_v46 }
  0xf8   : > { %v6191_v3 = vpop.permute.xlu1 %5153  ;;  %v6193_v4 = vpop.permute.xlu0 %5215 }
  0xf9   : > { %8820 = vst [vmem:[#allocation30_spill] sm:$0xff] %v6191_v3  ;;  %8821 = vst [vmem:[#allocation31_spill] sm:$0xff] %v6193_v4  ;;  %5390 = vset.pattern.permute.xlu1 %v5801_v0  ;;  %v784_v0 = vrot.slane %v6176_v59, %v6179_v60 }
  0xfa   : > { %5392 = vperm.xlu1 %5390, %v6059_v29  }
  0xfd   : > { %v6235_v27 = vpop.permute.xlu1 %5159  ;;  %v6237_v28 = vpop.permute.xlu0 %5221 }
  0xfe   : > { %8825 = vst [vmem:[#allocation35_spill] sm:$0xff] %v6235_v27  ;;  %8826 = vst [vmem:[#allocation36_spill] sm:$0xff] %v6237_v28  ;;  %5397 = vperm.xlu1 %5390, %v6064_v35  }
 0x101   : > { %v6270_v34 = vpop.permute.xlu0 %5249 }
 0x102   : > { %8827 = vst [vmem:[#allocation37_spill] sm:$0xff] %v6270_v34  ;;  %5406 = vset.pattern.permute.xlu1 %v5803_v13  ;;  %v6279_v37 = vpop.permute.xlu1 %5165  ;;  %v842_v13 = vmul.f32 %v8590_v48, %v784_v0  ;;  %v8597_v48 = vunpack.i.l.bf16 %v6124_v42  ;;  %v860_v0 = vadd.f32 %v8598_v9, %v844_v40 }
 0x103   : > { %8828 = vst [vmem:[#allocation38_spill] sm:$0xff] %v6279_v37  ;;  %5408 = vperm.xlu1 %5406, %v6064_v35  }
 0x104   : > { %v858_v52 = vadd.f32 %v8594_v6, %v842_v13  ;;  %v8602_v6 = vunpack.i.h.bf16 %v6132_v45  ;;  %v8842_v13 = vrot.slane %v6168_v56, %v6203_v10 }
 0x106   : > { %v6314_v33 = vpop.permute.xlu0 %5255  ;;  %v1018_v9 = vadd.f32 %v1002_v1, %v858_v52  ;;  %v1162_v16 = vmul.f32 %v8602_v6, %v1104_v19  ;;  %v8843_v6 = vunpack.i.l.bf16 %v6141_v49  ;;  %v8844_v52 = vrot.slane %v6186_v63, %v6203_v10 }
 0x107   : > { %8829 = vst [vmem:[#allocation39_spill] sm:$0xff] %v6314_v33  ;;  %5412 = vset.pattern.permute.xlu1 %v5804_v23  ;;  %v6323_v51 = vpop.permute.xlu1 %5171  ;;  %v6334_v23 = vunpack.c.h.bf16 %v4912_v36  ;;  %v1001_v36 = vmul.f32 %v8597_v48, %v940_v7  ;;  %v1004_v48 = vmul.f32 %v8600_v31, %v952_v17  ;;  %v8605_v7 = vunpack.i.l.bf16 %v6135_v46 }
 0x108   : > { %8830 = vst [vmem:[#allocation40_spill] sm:$0xff] %v6323_v51  ;;  %5414 = vperm.xlu1 %5412, %v6059_v29   ;;  %v8840_v31 = vrot.slane %v6176_v59, %v6203_v10  ;;  %v1321_v19 = vmul.f32 %v8843_v6, %v8842_v13 }
 0x109   : > { %8832 = vst [vmem:[#allocation42_spill] sm:$0xff] %v6334_v23  ;;  %v1017_v40 = vadd.f32 %v1001_v36, %v857_v32  ;;  %v8610_v32 = vunpack.i.h.bf16 %v6164_v54  ;;  %v1020_v1 = vadd.f32 %v1004_v48, %v860_v0  ;;  %v1019_v36 = vadd.f32 %v1003_v21, %v859_v39 }
 0x10a   : > { %v6354_v30 = vpop.permute.xlu0 %5283  ;;  %v8838_v39 = vrot.slane %v6186_v63, %v6189_v2  ;;  %v8839_v0 = vrot.slane %v6184_v62, %v6189_v2 }
 0x10b   : > { %8833 = vst [vmem:[#allocation43_spill] sm:$0xff] %v6354_v30  ;;  %v6362_v14 = vpop.permute.xlu1 %5176 }
 0x10c   : > { %8834 = vst [vmem:[#allocation44_spill] sm:$0xff] %v6362_v14  ;;  %5424 = vset.pattern.permute.xlu1 %v5805_v25  ;;  %v1161_v25 = vmul.f32 %v8603_v5, %v1100_v18  ;;  %v1164_v48 = vmul.f32 %v8604_v12, %v8838_v39  ;;  %v1163_v21 = vmul.f32 %v8605_v7, %v8839_v0 }
 0x10d   : > { %5426 = vperm.xlu1 %5424, %v6059_v29   ;;  %v1322_v18 = vmul.f32 %v8841_v38, %v8840_v31  ;;  %v1178_v12 = vadd.f32 %v1162_v16, %v1018_v9  ;;  %v1324_v0 = vmul.f32 %v8610_v32, %v8844_v52  ;;  %v8845_v7 = vrot.slane %v6184_v62, %v6203_v10 }
 0x10e   : > { %v1177_v39 = vadd.f32 %v1161_v25, %v1017_v40  ;;  %v8846_v38 = vunpack.i.l.bf16 %v6164_v54  ;;  %v1179_v46 = vadd.f32 %v1163_v21, %v1019_v36  ;;  %v1180_v44 = vadd.f32 %v1164_v48, %v1020_v1 }
 0x10f   : > { %v6400_v17 = vpop.permute.xlu0 %5289  ;;  %v8848_v9 = vrot.slane %v6176_v59, %v6214_v15  ;;  %v8849_v16 = vunpack.i.h.bf16 %v6162_v53  ;;  %v8850_v52 = vrot.slane %v6168_v56, %v6214_v15  ;;  %v8851_v32 = vunpack.i.l.bf16 %v6162_v53 }
 0x110   : > { %8836 = vst [vmem:[#allocation46_spill] sm:$0xff] %v6400_v17  ;;  %v6406_v5 = vpop.permute.xlu1 %5193  ;;  %v1323_v31 = vmul.f32 %v8846_v38, %v8845_v7  ;;  %v8852_v1 = vrot.slane %v6186_v63, %v6214_v15  ;;  %v8853_v36 = vunpack.i.h.bf16 %v6191_v3  ;;  %v8854_v21 = vrot.slane %v6184_v62, %v6214_v15 }
 0x111   : > { %8837 = vst [vmem:[#allocation47_spill] sm:$0xff] %v6406_v5  ;;  %5431 = vperm.xlu1 %5424, %v6064_v35   ;;  %v1482_v25 = vmul.f32 %v8849_v16, %v8848_v9  ;;  %v1481_v7 = vmul.f32 %v8851_v32, %v8850_v52  ;;  %v8855_v38 = vunpack.i.l.bf16 %v6191_v3  ;;  %v1337_v6 = vadd.f32 %v1321_v19, %v1177_v39 }
 0x112   : > { %v1484_v48 = vmul.f32 %v8853_v36, %v8852_v1  ;;  %v1338_v9 = vadd.f32 %v1322_v18, %v1178_v12  ;;  %v8856_v32 = vmov 5   ;;  %v1339_v61 = vadd.f32 %v1323_v31, %v1179_v46 }
 0x113   : > { %v6441_v40 = vpop.permute.xlu0 %5317  ;;  %v1483_v13 = vmul.f32 %v8855_v38, %v8854_v21  ;;  %v1340_v47 = vadd.f32 %v1324_v0, %v1180_v44  ;;  %v8619_v1 = vunpack.i.h.bf16 %v6237_v28  ;;  %v8858_v12 = vrot.slane %v6186_v63, %v6253_v41 }
 0x114   : > { %8847 = vst [vmem:[#allocation48_spill] sm:$0xff] %v6441_v40  ;;  %v8859_v19 = vunpack.i.h.bf16 %v6235_v27  ;;  %v8860_v39 = vrot.slane %v6184_v62, %v6253_v41  ;;  %v8861_v21 = vunpack.i.l.bf16 %v6235_v27  ;;  %v1580_v44 = vrot.slane %v6168_v56, %v6253_v41 }
 0x115   : > { %5441 = vset.pattern.permute.xlu1 %v8856_v32  ;;  %v6467_v52 = vpop.permute.xlu1 %5199  ;;  %v1584_v46 = vrot.slane %v6176_v59, %v6253_v41  ;;  %v1497_v0 = vadd.f32 %v1481_v7, %v1337_v6  ;;  %v1498_v31 = vadd.f32 %v1482_v25, %v1338_v9  ;;  %v1499_v32 = vadd.f32 %v1483_v13, %v1339_v61 }
 0x116   : > { %8857 = vst [vmem:[#allocation49_spill] sm:$0xff] %v6467_v52  ;;  %5443 = vperm.xlu1 %5441, %v6064_v35   ;;  %v1644_v18 = vmul.f32 %v8859_v19, %v8858_v12  ;;  %v1643_v38 = vmul.f32 %v8861_v21, %v8860_v39  ;;  %v1500_v54 = vadd.f32 %v1484_v48, %v1340_v47  ;;  %v8865_v47 = vunpack.i.l.bf16 %v6237_v28 }
 0x117   : > { %v8863_v21 = vrot.slane %v6186_v63, %v6260_v11  ;;  %v8864_v61 = vrot.slane %v6184_v62, %v6260_v11  ;;  %v8622_v13 = vunpack.i.h.bf16 %v6279_v37  ;;  %v8623_v25 = vunpack.i.l.bf16 %v6279_v37 }
 0x118   : > { %v6486_v16 = vpop.permute.xlu0 %5323  ;;  %v8866_v7 = vmov 6   ;;  %v1659_v9 = vadd.f32 %v1643_v38, %v1499_v32  ;;  %v1660_v19 = vadd.f32 %v1644_v18, %v1500_v54  ;;  %v8868_v54 = vrot.slane %v6186_v63, %v6282_v55 }
 0x119   : > { %8862 = vst [vmem:[#allocation50_spill] sm:$0xff] %v6486_v16  ;;  %v8620_v36 = vunpack.i.h.bf16 %v6486_v16  ;;  %v8621_v39 = vunpack.i.l.bf16 %v6486_v16  ;;  %v1804_v27 = vmul.f32 %v8619_v1, %v8863_v21  ;;  %v1803_v6 = vmul.f32 %v8865_v47, %v8864_v61 }
 0x11a   : > { %5447 = vset.pattern.permute.xlu1 %v8866_v7  ;;  %v6505_v48 = vpop.permute.xlu1 %5205  ;;  %v8626_v61 = vunpack.i.h.bf16 %v6323_v51  ;;  %v8869_v18 = vunpack.i.h.bf16 %v6362_v14  ;;  %v8872_v1 = vrot.slane %v6176_v59, %v6260_v11  ;;  %v8873_v47 = vrot.slane %v6168_v56, %v6260_v11 }
 0x11b   : > { %8867 = vst [vmem:[#allocation51_spill] sm:$0xff] %v6505_v48  ;;  %v1642_v12 = vmul.f32 %v8620_v36, %v1584_v46  ;;  %v1641_v21 = vmul.f32 %v8621_v39, %v1580_v44  ;;  %5449 = vperm.xlu1 %5447, %v6059_v29   ;;  %v8870_v44 = vrot.slane %v6184_v62, %v6282_v55  ;;  %v8871_v46 = vunpack.i.l.bf16 %v6362_v14 }
 0x11c   : > { %v1964_v38 = vmul.f32 %v8869_v18, %v8868_v54  ;;  %v1802_v7 = vmul.f32 %v8622_v13, %v8872_v1  ;;  %v1801_v54 = vmul.f32 %v8623_v25, %v8873_v47  ;;  %v960_v18 = vrot.slane %v6233_v26, %v6171_v57 }
 0x11d   : > { %v1963_v32 = vmul.f32 %v8871_v46, %v8870_v44  ;;  %v1657_v36 = vadd.f32 %v1641_v21, %v1497_v0  ;;  %v1658_v39 = vadd.f32 %v1642_v12, %v1498_v31  ;;  %v1819_v21 = vadd.f32 %v1803_v6, %v1659_v9 }
 0x11e   : > { %v6542_v0 = vpop.permute.xlu1 %5210  ;;  %v1820_v1 = vadd.f32 %v1804_v27, %v1660_v19  ;;  %v8875_v46 = vmov 7   ;;  %v8876_v13 = vrot.slane %v6176_v59, %v6282_v55  ;;  %v8877_v25 = vrot.slane %v6168_v56, %v6282_v55 }
 0x11f   : > { %8874 = vst [vmem:[#allocation52_spill] sm:$0xff] %v6542_v0  ;;  %5459 = vset.pattern.permute.xlu1 %v8875_v46  ;;  %v8878_v44 = vunpack.i.l.bf16 %v6323_v51  ;;  %v1817_v31 = vadd.f32 %v1801_v54, %v1657_v36  ;;  %v1818_v12 = vadd.f32 %v1802_v7, %v1658_v39  ;;  %v1979_v6 = vadd.f32 %v1963_v32, %v1819_v21 }
 0x120   : > { %v1962_v47 = vmul.f32 %v8626_v61, %v8876_v13  ;;  %5461 = vperm.xlu1 %5459, %v6059_v29   ;;  %v1980_v27 = vadd.f32 %v1964_v38, %v1820_v1  ;;  %v1120_v19 = vrot.slane %v6233_v26, %v6189_v2  ;;  %v1124_v9 = vrot.slane %v6325_v22, %v6189_v2 }
 0x121   : > { %v1961_v14 = vmul.f32 %v8878_v44, %v8877_v25  ;;  %v8629_v13 = vunpack.i.h.bf16 %v6406_v5  ;;  %v8630_v46 = vunpack.i.l.bf16 %v6406_v5  ;;  %v1128_v25 = vrot.slane %v6334_v23, %v6189_v2 }
 0x122   : > { %v1978_v28 = vadd.f32 %v1962_v47, %v1818_v12  ;;  %v1284_v29 = vrot.slane %v6325_v22, %v6203_v10  ;;  %v1288_v36 = vrot.slane %v6334_v23, %v6203_v10  ;;  %v8880_v7 = vrot.slane %v6233_v26, %v6179_v60 }
 0x123   : > { %v1977_v61 = vadd.f32 %v1961_v14, %v1817_v31  ;;  %v6570_v39 = vpop.permute.xlu1 %5227  ;;  %v8881_v38 = vunpack.i.h.bf16 %v6143_v50  ;;  %v8882_v14 = vrot.slane %v6231_v24, %v6179_v60  ;;  %v8883_v54 = vunpack.i.l.bf16 %v6143_v50 }
 0x124   : > { %8879 = vst [vmem:[#allocation53_spill] sm:$0xff] %v6570_v39  ;;  %5466 = vperm.xlu1 %5459, %v6064_v35   ;;  %v1994_v21 = vpack.c.bf16 %v1980_v27, %v1979_v6  ;;  %v8884_v35 = vrot.slane %v6334_v23, %v6179_v60  ;;  %v1604_v47 = vrot.slane %v6325_v22, %v6253_v41  ;;  %v8887_v12 = vunpack.c.l.bf16 %v6225_v20 }
 0x125   : > { %v846_v32 = vmul.f32 %v8881_v38, %v8880_v7  ;;  %v845_v44 = vmul.f32 %v8883_v54, %v8882_v14  ;;  %v1993_v31 = vpack.c.bf16 %v1978_v28, %v1977_v61  ;;  %v8635_v38 = vunpack.i.h.bf16 %v6314_v33 }
 0x126   : > { %v848_v28 = vmul.f32 %v8629_v13, %v8884_v35  ;;  %v8885_v61 = vrot.slane %v6325_v22, %v6179_v60  ;;  %v1608_v35 = vrot.slane %v6334_v23, %v6253_v41  ;;  %v8886_v13 = vunpack.c.h.bf16 %v6225_v20 }
 0x127   : > { %4960 = vmatprep.mubr.msk.bf16.mxu0 %vm2024_vm0, %v1993_v31  ;;  %v8893_v54 = vunpack.c.l.bf16 %v6378_v8  ;;  %v8894_v14 = vunpack.i.h.bf16 %v6467_v52  ;;  %v8895_v20 = vrot.slane %v6231_v24, %v6171_v57 }
 0x128   : > { %v847_v6 = vmul.f32 %v8630_v46, %v8885_v61  ;;  %4961 = vmatmul.mubr.msk.bf16.vlgmr.msra.gmra.mrb[0].mxu0 %vm2024_vm0, %v1994_v21  ;;  %v862_v7 = vadd.f32 %v8886_v13, %v846_v32  ;;  %v861_v61 = vadd.f32 %v8887_v12, %v845_v44  ;;  %v6615_v46 = vpop.permute.xlu1 %5233  ;;  %v8889_v13 = vrot.slane %v6334_v23, %v6171_v57 }
 0x129   : > { %8888 = vst [vmem:[#allocation54_spill] sm:$0xff] %v6615_v46  ;;  %v8890_v44 = vrot.slane %v6325_v22, %v6171_v57  ;;  %v8891_v12 = vunpack.i.l.bf16 %v6314_v33  ;;  %v8892_v21 = vunpack.c.h.bf16 %v6378_v8  ;;  %v1006_v5 = vmul.f32 %v8894_v14, %v960_v18 }
 0x12a   : > { %v1008_v32 = vmul.f32 %v8635_v38, %v8889_v13  ;;  %v863_v27 = vadd.f32 %v8893_v54, %v847_v6  ;;  %v8896_v13 = vunpack.i.l.bf16 %v6467_v52  ;;  %v8897_v14 = vunpack.i.h.bf16 %v6505_v48  ;;  %v6667_v6 = vpop.permute.xlu0 %5340 }
 0x12b   : > { %v1007_v31 = vmul.f32 %v8891_v12, %v8890_v44  ;;  %v864_v1 = vadd.f32 %v8892_v21, %v848_v28  ;;  %v8899_v21 = vunpack.i.l.bf16 %v6505_v48  ;;  %v8901_v28 = vunpack.i.l.bf16 %v6542_v0  ;;  %8903 = vst [vmem:[#allocation56_spill] sm:$0xff] %v6667_v6 }
 0x12c   : > { %v1005_v38 = vmul.f32 %v8896_v13, %v8895_v20  ;;  %v1166_v54 = vmul.f32 %v8897_v14, %v1120_v19  ;;  %v8898_v20 = vrot.slane %v6231_v24, %v6189_v2  ;;  %v8900_v13 = vunpack.i.h.bf16 %v6542_v0 }
 0x12d   : > { %v1167_v33 = vmul.f32 %v8901_v28, %v1124_v9  ;;  %v6665_v50 = vpop.permute.xlu1 %5239  ;;  %v8648_v19 = vunpack.i.l.bf16 %v6400_v17  ;;  %v1023_v14 = vadd.f32 %v1007_v31, %v863_v27  ;;  %v1024_v8 = vadd.f32 %v1008_v32, %v864_v1 }
 0x12e   : > { %v1165_v12 = vmul.f32 %v8899_v21, %v8898_v20  ;;  %v1168_v44 = vmul.f32 %v8900_v13, %v1128_v25  ;;  %8902 = vst [vmem:[#allocation55_spill] sm:$0xff] %v6665_v50  ;;  %v1021_v52 = vadd.f32 %v1005_v38, %v861_v61  ;;  %v1022_v3 = vadd.f32 %v1006_v5, %v862_v7 }
 0x12f   : > { %v8904_v20 = vunpack.i.h.bf16 %v6570_v39  ;;  %v8905_v25 = vunpack.i.l.bf16 %v6570_v39  ;;  %v8906_v9 = vrot.slane %v6233_v26, %v6203_v10  ;;  %v8907_v28 = vunpack.i.h.bf16 %v6193_v4 }
 0x130   : > { %v8908_v18 = vrot.slane %v6231_v24, %v6203_v10  ;;  %v8909_v27 = vunpack.i.l.bf16 %v6193_v4  ;;  %v8649_v5 = vunpack.i.h.bf16 %v6615_v46  ;;  %v8654_v7 = vunpack.i.l.bf16 %v6615_v46 }
 0x131   : > { %v1328_v21 = vmul.f32 %v8904_v20, %v1288_v36  ;;  %v1327_v13 = vmul.f32 %v8905_v25, %v1284_v29  ;;  %v1326_v0 = vmul.f32 %v8907_v28, %v8906_v9  ;;  %v1181_v36 = vadd.f32 %v1165_v12, %v1021_v52  ;;  %v6687_v31 = vpop.permute.xlu1 %5244 }
 0x132   : > { %v1325_v1 = vmul.f32 %v8909_v27, %v8908_v18  ;;  %v1182_v38 = vadd.f32 %v1166_v54, %v1022_v3  ;;  %v1183_v61 = vadd.f32 %v1167_v33, %v1023_v14  ;;  %v1184_v29 = vadd.f32 %v1168_v44, %v1024_v8  ;;  %8910 = vst [vmem:[#allocation57_spill] sm:$0xff] %v6687_v31  ;;  %v6703_v44 = vpop.permute.xlu0 %5346 }
 0x133   : > { %v8652_v32 = vunpack.i.h.bf16 %v6665_v50  ;;  %v8653_v20 = vunpack.i.l.bf16 %v6665_v50  ;;  %v8650_v25 = vunpack.i.h.bf16 %v6687_v31  ;;  %v8651_v9 = vunpack.i.l.bf16 %v6687_v31  ;;  %8914 = vst [vmem:[#allocation58_spill] sm:$0xff] %v6703_v44 }
 0x134   : > { %v8911_v18 = vrot.slane %v6334_v23, %v6214_v15  ;;  %v8912_v28 = vunpack.i.h.bf16 %v6400_v17  ;;  %v8913_v33 = vrot.slane %v6325_v22, %v6214_v15  ;;  %v1343_v8 = vadd.f32 %v1327_v13, %v1183_v61 }
 0x135   : > { %v1344_v52 = vadd.f32 %v1328_v21, %v1184_v29  ;;  %v8658_v54 = vunpack.i.h.bf16 %v6270_v34  ;;  %v8661_v12 = vunpack.i.l.bf16 %v6270_v34  ;;  %v8915_v14 = vrot.slane %v6233_v26, %v6214_v15 }
 0x136   : > { %v1488_v27 = vmul.f32 %v8912_v28, %v8911_v18  ;;  %v1487_v3 = vmul.f32 %v8648_v19, %v8913_v33  ;;  %v8916_v28 = vrot.slane %v6231_v24, %v6214_v15  ;;  %v1341_v13 = vadd.f32 %v1325_v1, %v1181_v36  ;;  %v6731_v1 = vpop.permute.xlu1 %5261 }
 0x137   : > { %v1486_v18 = vmul.f32 %v8649_v5, %v8915_v14  ;;  %v1342_v21 = vadd.f32 %v1326_v0, %v1182_v38  ;;  %v1648_v61 = vmul.f32 %v8650_v25, %v1608_v35  ;;  %v1647_v29 = vmul.f32 %v8651_v9, %v1604_v47  ;;  %8919 = vst [vmem:[#allocation59_spill] sm:$0xff] %v6731_v1 }
 0x138   : > { %v1485_v33 = vmul.f32 %v8654_v7, %v8916_v28  ;;  %v8917_v19 = vrot.slane %v6233_v26, %v6253_v41  ;;  %v8918_v5 = vrot.slane %v6231_v24, %v6253_v41  ;;  %v8657_v35 = vunpack.i.l.bf16 %v6703_v44 }
 0x139   : > { %v1503_v36 = vadd.f32 %v1487_v3, %v1343_v8  ;;  %v1504_v47 = vadd.f32 %v1488_v27, %v1344_v52  ;;  %v8655_v38 = vunpack.i.h.bf16 %v6731_v1  ;;  %v8656_v25 = vunpack.i.l.bf16 %v6731_v1 }
 0x13a   : > { %v1646_v14 = vmul.f32 %v8652_v32, %v8917_v19  ;;  %v1645_v28 = vmul.f32 %v8653_v20, %v8918_v5  ;;  %v1501_v9 = vadd.f32 %v1485_v33, %v1341_v13  ;;  %v1502_v19 = vadd.f32 %v1486_v18, %v1342_v21 }
 0x13b   : > { %v1916_v32 = vrot.slane %v6231_v24, %v6282_v55  ;;  %v1920_v5 = vrot.slane %v6233_v26, %v6282_v55  ;;  %v1663_v20 = vadd.f32 %v1647_v29, %v1503_v36  ;;  %v1664_v7 = vadd.f32 %v1648_v61, %v1504_v47 }
 0x13c   : > { %v8920_v0 = vrot.slane %v6334_v23, %v6260_v11  ;;  %v8921_v3 = vrot.slane %v6325_v22, %v6260_v11  ;;  %v8922_v52 = vrot.slane %v6233_v26, %v6260_v11  ;;  %v8923_v33 = vrot.slane %v6231_v24, %v6260_v11 }
 0x13d   : > { %v1661_v21 = vadd.f32 %v1645_v28, %v1501_v9  ;;  %v1662_v61 = vadd.f32 %v1646_v14, %v1502_v19  ;;  %v8924_v36 = vrot.slane %v6334_v23, %v6282_v55  ;;  %v8925_v47 = vunpack.i.h.bf16 %v6703_v44 }
 0x13e   : > { %v1808_v27 = vmul.f32 %v8655_v38, %v8920_v0  ;;  %v1807_v8 = vmul.f32 %v8656_v25, %v8921_v3  ;;  %v1806_v18 = vmul.f32 %v8658_v54, %v8922_v52  ;;  %v1805_v13 = vmul.f32 %v8661_v12, %v8923_v33  ;;  %v6771_v25 = vpop.permute.xlu1 %5267 }
 0x13f   : > { %v1968_v3 = vmul.f32 %v8925_v47, %v8924_v36  ;;  %v8926_v38 = vrot.slane %v6325_v22, %v6282_v55  ;;  %8927 = vst [vmem:[#allocation60_spill] sm:$0xff] %v6771_v25  ;;  %v8659_v33 = vunpack.i.h.bf16 %v6771_v25  ;;  %v8660_v9 = vunpack.i.l.bf16 %v6771_v25 }
 0x140   : > { %v1823_v29 = vadd.f32 %v1807_v8, %v1663_v20  ;;  %v1824_v0 = vadd.f32 %v1808_v27, %v1664_v7  ;;  %v1821_v20 = vadd.f32 %v1805_v13, %v1661_v21  ;;  %v1822_v14 = vadd.f32 %v1806_v18, %v1662_v61  ;;  %v4913_v18 = vld [vmem:[%s6149_s14 + $0x20] sm:$0xff]   ;;  %v4914_v13 = vld [vmem:[%s6149_s14 + $0x28] sm:$0xff]  }
 0x141   : > { %v1967_v52 = vmul.f32 %v8657_v35, %v8926_v38  ;;  %v1966_v7 = vmul.f32 %v8659_v33, %v1920_v5  ;;  %v1965_v28 = vmul.f32 %v8660_v9, %v1916_v32  ;;  %v6789_v32 = vunpack.c.l.bf16 %v4913_v18 }
 0x142   : > { %v1984_v27 = vadd.f32 %v1968_v3, %v1824_v0  ;;  %v6779_v36 = vpop.permute.xlu1 %5273  ;;  %v6791_v21 = vunpack.c.h.bf16 %v4913_v18  ;;  %v6797_v0 = vunpack.c.h.bf16 %v4914_v13  ;;  %v6800_v3 = vld [vmem:[%s6159_s18 + $0x20] sm:$0xff]   ;;  %v8940_v24 = vunpack.i.l.bf16 %v6354_v30 }
 0x143   : > { %v1983_v19 = vadd.f32 %v1967_v52, %v1823_v29  ;;  %v1981_v8 = vadd.f32 %v1965_v28, %v1821_v20  ;;  %v1982_v38 = vadd.f32 %v1966_v7, %v1822_v14  ;;  %8928 = vst [vmem:[#allocation61_spill] sm:$0xff] %v6779_v36  ;;  %v6795_v29 = vunpack.c.l.bf16 %v4914_v13  ;;  %8931 = vst [vmem:[#allocation64_spill] sm:$0xff] %v6800_v3  ;;  %v6802_v52 = vpop.permute.xlu0 %5362 }
 0x144   : > { %8932 = vst [vmem:[#allocation65_spill] sm:$0xff] %v6802_v52  ;;  %v976_v7 = vrot.slane %v6791_v21, %v6171_v57  ;;  %v1452_v20 = vrot.slane %v6789_v32, %v6214_v15  ;;  %v1456_v14 = vrot.slane %v6791_v21, %v6214_v15  ;;  %v984_v33 = vrot.slane %v6797_v0, %v6171_v57 }
 0x145   : > { %v1995_v47 = vpack.c.bf16 %v1982_v38, %v1981_v8  ;;  %v1996_v35 = vpack.c.bf16 %v1984_v27, %v1983_v19  ;;  %v812_v27 = vrot.slane %v6789_v32, %v6179_v60  ;;  %v816_v8 = vrot.slane %v6791_v21, %v6179_v60  ;;  %v6821_v38 = vld [vmem:[%s6159_s18 + $0x28] sm:$0xff]  }
 0x146   : > { %v6781_v54 = vpop.permute.xlu1 %5278  ;;  %8933 = vst [vmem:[#allocation66_spill] sm:$0xff] %v6821_v38  ;;  %v820_v28 = vrot.slane %v6795_v29, %v6179_v60  ;;  %v824_v19 = vrot.slane %v6797_v0, %v6179_v60  ;;  %v980_v13 = vrot.slane %v6795_v29, %v6171_v57  ;;  %v1140_v12 = vrot.slane %v6795_v29, %v6189_v2 }
 0x147   : > { %8929 = vst [vmem:[#allocation62_spill] sm:$0xff] %v6781_v54  ;;  %4964 = vmatprep.mubr.msk.bf16.mxu0 %vm2024_vm0, %v1995_v47  ;;  %v6843_v9 = vpop.permute.xlu0 %5380  ;;  %v1144_v1 = vrot.slane %v6797_v0, %v6189_v2  ;;  %v1132_v31 = vrot.slane %v6789_v32, %v6189_v2  ;;  %v1136_v47 = vrot.slane %v6791_v21, %v6189_v2  ;;  %v8936_v34 = vunpack.i.h.bf16 %v6779_v36 }
 0x148   : > { %4965 = vmatmul.mubr.msk.bf16.gmra.mrb[4].mxu0 %vm2024_vm0, %v1996_v35  ;;  %v972_v35 = vrot.slane %v6789_v32, %v6171_v57  ;;  %8935 = vst [vmem:[#allocation68_spill] sm:$0xff] %v6843_v9  ;;  %v1292_v39 = vrot.slane %v6789_v32, %v6203_v10  ;;  %v1296_v25 = vrot.slane %v6791_v21, %v6203_v10  ;;  %v8937_v46 = vunpack.i.l.bf16 %v6779_v36 }
 0x149   : > { %v850_v50 = vmul.f32 %v8936_v34, %v816_v8  ;;  %v1612_v34 = vrot.slane %v6789_v32, %v6253_v41  ;;  %v8939_v36 = vunpack.i.h.bf16 %v6354_v30  ;;  %v8708_v22 = vunpack.i.h.bf16 %v6441_v40 }
 0x14a   : > { %v6785_v5 = vpop.permute.xlu1 %5295  ;;  %v849_v4 = vmul.f32 %v8937_v46, %v812_v27  ;;  %v1616_v46 = vrot.slane %v6791_v21, %v6253_v41  ;;  %v1009_v23 = vmul.f32 %v8940_v24, %v972_v35  ;;  %v8941_v37 = vunpack.c.h.bf16 %v6800_v3 }
 0x14b   : > { %8930 = vst [vmem:[#allocation63_spill] sm:$0xff] %v6785_v5  ;;  %v1010_v17 = vmul.f32 %v8939_v36, %v976_v7  ;;  %v8942_v27 = vunpack.c.l.bf16 %v6800_v3  ;;  %v6891_v53 = vpop.permute.xlu0 %5386  ;;  %v1772_v7 = vrot.slane %v6789_v32, %v6260_v11  ;;  %v1490_v3 = vmul.f32 %v8708_v22, %v1456_v14 }
 0x14c   : > { %v866_v16 = vadd.f32 %v8941_v37, %v850_v50  ;;  %8943 = vst [vmem:[#allocation70_spill] sm:$0xff] %v6891_v53  ;;  %v1776_v50 = vrot.slane %v6791_v21, %v6260_v11  ;;  %v8949_v30 = vunpack.i.l.bf16 %v6441_v40  ;;  %v8710_v58 = vunpack.i.h.bf16 %v6891_v53 }
 0x14d   : > { %v865_v8 = vadd.f32 %v8942_v27, %v849_v4  ;;  %v8945_v4 = vunpack.i.h.bf16 %v6781_v54  ;;  %v8946_v27 = vunpack.i.l.bf16 %v6781_v54  ;;  %v8952_v14 = vunpack.i.h.bf16 %v6785_v5 }
 0x14e   : > { %v6793_v61 = vpop.permute.xlu1 %5301  ;;  %v1489_v49 = vmul.f32 %v8949_v30, %v1452_v20  ;;  %v8953_v30 = vunpack.i.l.bf16 %v6785_v5  ;;  %v8954_v45 = vunpack.c.h.bf16 %v6821_v38 }
 0x14f   : > { %v852_v37 = vmul.f32 %v8945_v4, %v824_v19  ;;  %v851_v18 = vmul.f32 %v8946_v27, %v820_v28  ;;  %v8947_v48 = vunpack.i.h.bf16 %v6793_v61  ;;  %v8948_v36 = vunpack.i.l.bf16 %v6793_v61 }
 0x150   : > { %v1025_v19 = vadd.f32 %v1009_v23, %v865_v8  ;;  %v1026_v4 = vadd.f32 %v1010_v17, %v866_v16  ;;  %v1012_v22 = vmul.f32 %v8952_v14, %v984_v33  ;;  %v1011_v20 = vmul.f32 %v8953_v30, %v980_v13 }
 0x151   : > { %v1170_v51 = vmul.f32 %v8947_v48, %v1136_v47  ;;  %v1169_v24 = vmul.f32 %v8948_v36, %v1132_v31  ;;  %v8709_v31 = vunpack.i.h.bf16 %v6802_v52  ;;  %v868_v23 = vadd.f32 %v8954_v45, %v852_v37 }
 0x152   : > { %v8955_v17 = vunpack.c.l.bf16 %v6821_v38  ;;  %v1172_v13 = vmul.f32 %v8710_v58, %v1144_v1  ;;  %v8957_v45 = vunpack.i.l.bf16 %v6891_v53  ;;  %v8713_v30 = vunpack.i.h.bf16 %v6667_v6 }
 0x153   : > { %v6835_v44 = vpop.permute.xlu1 %5307  ;;  %v1186_v8 = vadd.f32 %v1170_v51, %v1026_v4  ;;  %v1028_v51 = vadd.f32 %v1012_v22, %v868_v23  ;;  %v8961_v23 = vrot.slane %v6797_v0, %v6203_v10  ;;  %v8975_v38 = vunpack.i.l.bf16 %v6843_v9 }
 0x154   : > { %8934 = vst [vmem:[#allocation67_spill] sm:$0xff] %v6835_v44  ;;  %v8950_v28 = vunpack.i.h.bf16 %v6835_v44  ;;  %v8951_v48 = vunpack.i.l.bf16 %v6835_v44  ;;  %v867_v16 = vadd.f32 %v8955_v17, %v851_v18  ;;  %v1171_v37 = vmul.f32 %v8957_v45, %v1140_v12 }
 0x155   : > { %v8718_v17 = vunpack.i.l.bf16 %v6667_v6  ;;  %v8958_v12 = vrot.slane %v6791_v21, %v6282_v55 }
 0x156   : > { %v1330_v27 = vmul.f32 %v8950_v28, %v1296_v25  ;;  %v1329_v47 = vmul.f32 %v8951_v48, %v1292_v39  ;;  %v1185_v25 = vadd.f32 %v1169_v24, %v1025_v19  ;;  %v1027_v24 = vadd.f32 %v1011_v20, %v867_v16 }
 0x157   : > { %v6867_v26 = vpop.permute.xlu1 %5312  ;;  %v1970_v22 = vmul.f32 %v8709_v31, %v8958_v12 }
 0x158   : > { %8938 = vst [vmem:[#allocation69_spill] sm:$0xff] %v6867_v26  ;;  %v8712_v39 = vunpack.i.h.bf16 %v6867_v26  ;;  %v1345_v14 = vadd.f32 %v1329_v47, %v1185_v25  ;;  %v1346_v18 = vadd.f32 %v1330_v27, %v1186_v8  ;;  %v8959_v27 = vrot.slane %v6789_v32, %v6282_v55 }
 0x159   : > { %v8960_v47 = vunpack.i.l.bf16 %v6802_v52  ;;  %v8963_v16 = vunpack.i.l.bf16 %v6867_v26  ;;  %v1187_v58 = vadd.f32 %v1171_v37, %v1027_v24  ;;  %v1780_v24 = vrot.slane %v6795_v29, %v6260_v11 }
 0x15a   : > { %v1505_v45 = vadd.f32 %v1489_v49, %v1345_v14  ;;  %v1506_v12 = vadd.f32 %v1490_v3, %v1346_v18 }
 0x15b   : > { %v1969_v20 = vmul.f32 %v8960_v47, %v8959_v27  ;;  %v1188_v47 = vadd.f32 %v1172_v13, %v1028_v51 }
 0x15c   : > { %v6897_v35 = vpop.permute.xlu1 %5329 }
 0x15d   : > { %8944 = vst [vmem:[#allocation71_spill] sm:$0xff] %v6897_v35  ;;  %v8719_v19 = vunpack.i.h.bf16 %v6897_v35  ;;  %v8720_v4 = vunpack.i.l.bf16 %v6897_v35 }
 0x161   : > { %v6931_v28 = vpop.permute.xlu1 %5335 }
 0x162   : > { %8956 = vst [vmem:[#allocation72_spill] sm:$0xff] %v6931_v28  ;;  %v8711_v36 = vunpack.i.h.bf16 %v6931_v28  ;;  %v8723_v33 = vunpack.i.l.bf16 %v6931_v28 }
 0x164   : > { %v1650_v48 = vmul.f32 %v8711_v36, %v1616_v46  ;;  %v1649_v1 = vmul.f32 %v8723_v33, %v1612_v34  ;;  %v1332_v46 = vmul.f32 %v8712_v39, %v8961_v23  ;;  %v8962_v34 = vrot.slane %v6795_v29, %v6203_v10 }
 0x165   : > { %v8965_v36 = vrot.slane %v6797_v0, %v6214_v15  ;;  %v8966_v39 = vrot.slane %v6795_v29, %v6214_v15 }
 0x166   : > { %v1331_v25 = vmul.f32 %v8963_v16, %v8962_v34  ;;  %v6969_v8 = vpop.permute.xlu1 %5352  ;;  %v1665_v49 = vadd.f32 %v1649_v1, %v1505_v45  ;;  %v1666_v3 = vadd.f32 %v1650_v48, %v1506_v12  ;;  %v1348_v18 = vadd.f32 %v1332_v46, %v1188_v47 }
 0x167   : > { %8964 = vst [vmem:[#allocation73_spill] sm:$0xff] %v6969_v8  ;;  %v8721_v31 = vunpack.i.h.bf16 %v6969_v8  ;;  %v8722_v27 = vunpack.i.l.bf16 %v6969_v8  ;;  %v1492_v23 = vmul.f32 %v8719_v19, %v8965_v36  ;;  %v1491_v34 = vmul.f32 %v8720_v4, %v8966_v39 }
 0x168   : > { %v1347_v37 = vadd.f32 %v1331_v25, %v1187_v58  ;;  %v1784_v36 = vrot.slane %v6797_v0, %v6260_v11 }
 0x169   : > { %v1810_v14 = vmul.f32 %v8721_v31, %v1776_v50  ;;  %v1809_v13 = vmul.f32 %v8722_v27, %v1772_v7  ;;  %v8968_v50 = vrot.slane %v6797_v0, %v6253_v41  ;;  %v8969_v7 = vrot.slane %v6795_v29, %v6253_v41 }
 0x16a   : > { %v6991_v51 = vpop.permute.xlu1 %5357  ;;  %v1507_v25 = vadd.f32 %v1491_v34, %v1347_v37  ;;  %v1508_v45 = vadd.f32 %v1492_v23, %v1348_v18  ;;  %v8974_v31 = vunpack.i.h.bf16 %v6843_v9 }
 0x16b   : > { %8967 = vst [vmem:[#allocation74_spill] sm:$0xff] %v6991_v51  ;;  %v1825_v16 = vadd.f32 %v1809_v13, %v1665_v49  ;;  %v1826_v39 = vadd.f32 %v1810_v14, %v1666_v3  ;;  %v8716_v48 = vunpack.i.h.bf16 %v6991_v51  ;;  %v8717_v1 = vunpack.i.l.bf16 %v6991_v51 }
 0x16c   : > { %v1652_v58 = vmul.f32 %v8713_v30, %v8968_v50  ;;  %v1651_v46 = vmul.f32 %v8718_v17, %v8969_v7  ;;  %v1940_v14 = vrot.slane %v6795_v29, %v6282_v55  ;;  %v1944_v13 = vrot.slane %v6797_v0, %v6282_v55 }
 0x16d   : > { %v1985_v12 = vadd.f32 %v1969_v20, %v1825_v16  ;;  %v1986_v47 = vadd.f32 %v1970_v22, %v1826_v39  ;;  %v1812_v49 = vmul.f32 %v8716_v48, %v1784_v36  ;;  %v1811_v3 = vmul.f32 %v8717_v1, %v1780_v24 }
 0x16e   : > { %v1667_v7 = vadd.f32 %v1651_v46, %v1507_v25  ;;  %v1668_v23 = vadd.f32 %v1652_v58, %v1508_v45  ;;  %v4915_v45 = vld [vmem:[%s6149_s14 + $0x30] sm:$0xff]  }
 0x16f   : > { %v7013_v50 = vpop.permute.xlu1 %5368  ;;  %v1997_v30 = vpack.c.bf16 %v1986_v47, %v1985_v12  ;;  %v7032_v12 = vld [vmem:[%s6159_s18 + $0x38] sm:$0xff]  }
 0x170   : > { %8970 = vst [vmem:[#allocation75_spill] sm:$0xff] %v7013_v50  ;;  %v8714_v22 = vunpack.i.h.bf16 %v7013_v50  ;;  %v8715_v20 = vunpack.i.l.bf16 %v7013_v50  ;;  %v1827_v34 = vadd.f32 %v1811_v3, %v1667_v7  ;;  %v1828_v37 = vadd.f32 %v1812_v49, %v1668_v23  ;;  %8973 = vst [vmem:[#allocation78_spill] sm:$0xff] %v7032_v12  ;;  %v7039_v3 = vld [vmem:[%s6159_s18 + $0x30] sm:$0xff]   ;;  %v7095_v50 = vpop.permute.xlu0 %5402 }
 0x171   : > { %4968 = vmatprep.mubr.msk.bf16.mxu0 %vm2024_vm0, %v1997_v30  ;;  %v4916_v30 = vld [vmem:[%s6149_s14 + $0x38] sm:$0xff]   ;;  %v7050_v23 = vld [vmem:[%s8563_s4 + $0x10] sm:$0xff]   ;;  %v8987_v4 = vunpack.i.l.bf16 %v7095_v50  ;;  %s4447_s14 = sshll.u32 %s8300_s20, 4  ;;  %s8415_s14 = int_to_ptr.vmem [resolvable:$true] %s4447_s14 }
 0x172   : > { %v1972_v18 = vmul.f32 %v8714_v22, %v1944_v13  ;;  %v1971_v24 = vmul.f32 %v8715_v20, %v1940_v14  ;;  %v7034_v47 = vunpack.c.l.bf16 %v4916_v30  ;;  %v7036_v49 = vunpack.c.h.bf16 %v4916_v30  ;;  %4976 = vmatprep.subr.bf16.mxu1 %v7050_v23  ;;  %s5695_s29 = scalar_lea.vmem %s8415_s14, 1024  ;;  %p5702_p4 = scmp.lt.s32.totalorder %s8415_s14, %s5700_s23 }
 0x173   : > { %v7041_v14 = vunpack.c.l.bf16 %v4915_v45  ;;  %v7043_v13 = vunpack.c.h.bf16 %v4915_v45  ;;  %p5696_p10 = scmp.ne.s32.totalorder %s8415_s14, %s5695_s29 }
 0x174   : > { %v1987_v36 = vadd.f32 %v1971_v24, %v1827_v34  ;;  %v1988_v16 = vadd.f32 %v1972_v18, %v1828_v37  ;;  %v7022_v39 = vpop.permute.xlu1 %5374  ;;  %v836_v18 = vrot.slane %v7034_v47, %v6179_v60  ;;  %v840_v24 = vrot.slane %v7036_v49, %v6179_v60  ;;  %v7129_v54 = vpop.permute.xlu0 %5420 }
 0x175   : > { %8971 = vst [vmem:[#allocation76_spill] sm:$0xff] %v7022_v39  ;;  %v832_v30 = vrot.slane %v7043_v13, %v6179_v60  ;;  %v988_v45 = vrot.slane %v7041_v14, %v6171_v57  ;;  %v992_v22 = vrot.slane %v7043_v13, %v6171_v57  ;;  %v1148_v20 = vrot.slane %v7041_v14, %v6189_v2  ;;  %p5697_p2 = pnand %p5696_p10, %p9236_p1 }
 0x176   : > { %v1998_v58 = vpack.c.bf16 %v1988_v16, %v1987_v36  ;;  %v1152_v48 = vrot.slane %v7043_v13, %v6189_v2  ;;  %v996_v1 = vrot.slane %v7034_v47, %v6171_v57  ;;  %v1000_v17 = vrot.slane %v7036_v49, %v6171_v57  ;;  %8978 = vst [vmem:[#allocation79_spill] sm:$0xff] %v7129_v54 }
 0x177   : > { %v1156_v27 = vrot.slane %v7034_v47, %v6189_v2  ;;  %v1160_v33 = vrot.slane %v7036_v49, %v6189_v2  ;;  %v1316_v36 = vrot.slane %v7034_v47, %v6203_v10  ;;  %v1320_v16 = vrot.slane %v7036_v49, %v6203_v10  ;;  %p5698_p3 = pneg %p5697_p2 }
 0x178   : > { %4969 = vmatmul.mubr.msk.bf16.gmra.mrb[8].mxu0 %vm2024_vm0, %v1998_v58  ;;  %v828_v58 = vrot.slane %v7041_v14, %v6179_v60  ;;  %v1308_v34 = vrot.slane %v7041_v14, %v6203_v10  ;;  %v1312_v37 = vrot.slane %v7043_v13, %v6203_v10  ;;  %v1468_v51 = vrot.slane %v7041_v14, %v6214_v15 }
 0x179   : > { %v7025_v46 = vpop.permute.xlu1 %5392  ;;  %v1472_v6 = vrot.slane %v7043_v13, %v6214_v15  ;;  %v856_v5 = vmul.f32 %v8974_v31, %v840_v24  ;;  %v855_v52 = vmul.f32 %v8975_v38, %v836_v18  ;;  %v8976_v38 = vunpack.i.h.bf16 %v7022_v39 }
 0x17a   : > { %8972 = vst [vmem:[#allocation77_spill] sm:$0xff] %v7025_v46  ;;  %v8977_v24 = vunpack.i.l.bf16 %v7022_v39  ;;  %v8981_v39 = vunpack.i.h.bf16 %v7025_v46  ;;  %v8982_v40 = vunpack.i.l.bf16 %v7025_v46  ;;  %v1173_v31 = vmul.f32 %v8987_v4, %v1148_v20 }
 0x17b   : > { %v854_v18 = vmul.f32 %v8976_v38, %v832_v30  ;;  %v8979_v30 = vunpack.c.h.bf16 %v7032_v12  ;;  %v8992_v20 = vunpack.i.h.bf16 %v7129_v54 }
 0x17c   : > { %v853_v8 = vmul.f32 %v8977_v24, %v828_v58  ;;  %v8980_v58 = vunpack.c.l.bf16 %v7032_v12  ;;  %v1014_v26 = vmul.f32 %v8981_v39, %v992_v22  ;;  %v1013_v53 = vmul.f32 %v8982_v40, %v988_v45 }
 0x17d   : > { %v7027_v25 = vpop.permute.xlu1 %5397  ;;  %v872_v38 = vadd.f32 %v8979_v30, %v856_v5  ;;  %v8984_v5 = vunpack.c.h.bf16 %v7039_v3  ;;  %v8986_v39 = vunpack.i.h.bf16 %v7095_v50 }
 0x17e   : > { %v871_v24 = vadd.f32 %v8980_v58, %v855_v52  ;;  %v8985_v52 = vunpack.c.l.bf16 %v7039_v3  ;;  %v8988_v28 = vunpack.i.h.bf16 %v7027_v25  ;;  %v8989_v9 = vunpack.i.l.bf16 %v7027_v25 }
 0x17f   : > { %v870_v30 = vadd.f32 %v8984_v5, %v854_v18  ;;  %v1174_v45 = vmul.f32 %v8986_v39, %v1152_v48  ;;  %v7167_v18 = vpop.permute.xlu0 %5437 }
 0x180   : > { %v869_v58 = vadd.f32 %v8985_v52, %v853_v8  ;;  %v1016_v12 = vmul.f32 %v8988_v28, %v1000_v17  ;;  %v1015_v46 = vmul.f32 %v8989_v9, %v996_v1  ;;  %v1336_v28 = vmul.f32 %v8992_v20, %v1320_v16 }
 0x181   : > { %v1030_v8 = vadd.f32 %v1014_v26, %v870_v30  ;;  %v8993_v17 = vunpack.i.l.bf16 %v7129_v54  ;;  %v8769_v40 = vunpack.i.h.bf16 %v7167_v18 }
 0x182   : > { %v7045_v7 = vpop.permute.xlu1 %5408  ;;  %v1029_v5 = vadd.f32 %v1013_v53, %v869_v58 }
 0x183   : > { %v8990_v22 = vunpack.i.h.bf16 %v7045_v7  ;;  %v8991_v39 = vunpack.i.l.bf16 %v7045_v7  ;;  %v1335_v9 = vmul.f32 %v8993_v17, %v1316_v36  ;;  %v1190_v20 = vadd.f32 %v1174_v45, %v1030_v8 }
 0x184   : > { %v1189_v36 = vadd.f32 %v1173_v31, %v1029_v5  ;;  %v9002_v8 = vrot.slane %v7036_v49, %v6214_v15 }
 0x185   : > { %v1176_v48 = vmul.f32 %v8990_v22, %v1160_v33  ;;  %v1175_v4 = vmul.f32 %v8991_v39, %v1156_v27  ;;  %v1031_v22 = vadd.f32 %v1015_v46, %v871_v24  ;;  %v1032_v27 = vadd.f32 %v1016_v12, %v872_v38  ;;  %v7195_v46 = vpop.permute.xlu0 %5455 }
 0x186   : > { %8998 = vst [vmem:[#allocation82_spill] sm:$0xff] %v7195_v46  ;;  %v8999_v24 = vrot.slane %v7043_v13, %v6253_v41 }
 0x187   : > { %v7077_v19 = vpop.permute.xlu1 %5414  ;;  %v1191_v54 = vadd.f32 %v1175_v4, %v1031_v22  ;;  %v9003_v4 = vrot.slane %v7034_v47, %v6214_v15 }
 0x188   : > { %v8995_v53 = vunpack.i.h.bf16 %v7077_v19  ;;  %v8996_v30 = vunpack.i.l.bf16 %v7077_v19  ;;  %v1654_v31 = vmul.f32 %v8769_v40, %v8999_v24 }
 0x189   : > { %v1351_v24 = vadd.f32 %v1335_v9, %v1191_v54  ;;  %v9007_v54 = vrot.slane %v7041_v14, %v6260_v11  ;;  %v1948_v9 = vrot.slane %v7041_v14, %v6282_v55 }
 0x18a   : > { %v1334_v26 = vmul.f32 %v8995_v53, %v1312_v37  ;;  %v1333_v58 = vmul.f32 %v8996_v30, %v1308_v34  ;;  %v1192_v34 = vadd.f32 %v1176_v48, %v1032_v27 }
 0x18c   : > { %v7115_v35 = vpop.permute.xlu1 %5426  ;;  %v1349_v12 = vadd.f32 %v1333_v58, %v1189_v36  ;;  %v1350_v38 = vadd.f32 %v1334_v26, %v1190_v20  ;;  %v8768_v36 = vunpack.i.h.bf16 %v7195_v46 }
 0x18d   : > { %v8775_v52 = vunpack.i.h.bf16 %v7115_v35  ;;  %v8997_v37 = vunpack.i.l.bf16 %v7115_v35 }
 0x18f   : > { %v1494_v17 = vmul.f32 %v8775_v52, %v1472_v6  ;;  %v1493_v53 = vmul.f32 %v8997_v37, %v1468_v51  ;;  %v9000_v6 = vrot.slane %v7041_v14, %v6253_v41  ;;  %v9001_v51 = vunpack.i.l.bf16 %v7167_v18 }
 0x190   : > { %v7147_v44 = vpop.permute.xlu1 %5431  ;;  %v8770_v37 = vunpack.i.l.bf16 %v7195_v46 }
 0x191   : > { %8983 = vst [vmem:[#allocation80_spill] sm:$0xff] %v7147_v44  ;;  %v8762_v39 = vunpack.i.h.bf16 %v7147_v44  ;;  %v8765_v16 = vunpack.i.l.bf16 %v7147_v44  ;;  %v1653_v45 = vmul.f32 %v9001_v51, %v9000_v6  ;;  %v1509_v27 = vadd.f32 %v1493_v53, %v1349_v12 }
 0x192   : > { %v1510_v20 = vadd.f32 %v1494_v17, %v1350_v38  ;;  %v1352_v6 = vadd.f32 %v1336_v28, %v1192_v34  ;;  %v9004_v51 = vrot.slane %v7036_v49, %v6253_v41  ;;  %v9006_v17 = vrot.slane %v7043_v13, %v6260_v11 }
 0x193   : > { %v1496_v48 = vmul.f32 %v8762_v39, %v9002_v8  ;;  %v1495_v26 = vmul.f32 %v8765_v16, %v9003_v4  ;;  %v9005_v4 = vrot.slane %v7034_v47, %v6253_v41  ;;  %v1952_v34 = vrot.slane %v7043_v13, %v6282_v55 }
 0x195   : > { %v7179_v1 = vpop.permute.xlu1 %5443  ;;  %v1511_v12 = vadd.f32 %v1495_v26, %v1351_v24  ;;  %v1512_v38 = vadd.f32 %v1496_v48, %v1352_v6  ;;  %v9008_v26 = vrot.slane %v7036_v49, %v6260_v11  ;;  %v9009_v24 = vrot.slane %v7034_v47, %v6260_v11 }
 0x196   : > { %8994 = vst [vmem:[#allocation81_spill] sm:$0xff] %v7179_v1  ;;  %v8763_v30 = vunpack.i.h.bf16 %v7179_v1  ;;  %v8764_v33 = vunpack.i.l.bf16 %v7179_v1 }
 0x197   : > { %v1816_v48 = vmul.f32 %v8768_v36, %v9008_v26  ;;  %v1815_v6 = vmul.f32 %v8770_v37, %v9009_v24 }
 0x198   : > { %v1656_v8 = vmul.f32 %v8763_v30, %v9004_v51  ;;  %v1655_v39 = vmul.f32 %v8764_v33, %v9005_v4  ;;  %v1956_v4 = vrot.slane %v7034_v47, %v6282_v55  ;;  %v1669_v30 = vadd.f32 %v1653_v45, %v1509_v27 }
 0x199   : > { %v1670_v33 = vadd.f32 %v1654_v31, %v1510_v20 }
 0x19a   : > { %v7207_v5 = vpop.permute.xlu1 %5449 }
 0x19b   : > { %v8766_v58 = vunpack.i.h.bf16 %v7207_v5  ;;  %v8767_v22 = vunpack.i.l.bf16 %v7207_v5 }
 0x19d   : > { %v1814_v53 = vmul.f32 %v8766_v58, %v9006_v17  ;;  %v1813_v28 = vmul.f32 %v8767_v22, %v9007_v54  ;;  %v1960_v17 = vrot.slane %v7036_v49, %v6282_v55  ;;  %v1671_v58 = vadd.f32 %v1655_v39, %v1511_v12 }
 0x19e   : > { %v1672_v22 = vadd.f32 %v1656_v8, %v1512_v38 }
 0x19f   : > { %v7247_v51 = vpop.permute.xlu1 %5461  ;;  %v1829_v39 = vadd.f32 %v1813_v28, %v1669_v30  ;;  %v1830_v27 = vadd.f32 %v1814_v53, %v1670_v33  ;;  %v1831_v36 = vadd.f32 %v1815_v6, %v1671_v58  ;;  %v5474_v53 = vld [vmem:[%s8563_s4 + $0x18] sm:$0xff]   ;;  %v7286_v58 = vld [vmem:[%s8564_s5] ss:$0 sm:$0xff] }
 0x1a0   : > { %v8773_v54 = vunpack.i.h.bf16 %v7247_v51  ;;  %v8774_v16 = vunpack.i.l.bf16 %v7247_v51  ;;  %v1832_v40 = vadd.f32 %v1816_v48, %v1672_v22 }
 0x1a2   : > { %v1974_v31 = vmul.f32 %v8773_v54, %v1952_v34  ;;  %v1973_v45 = vmul.f32 %v8774_v16, %v1948_v9  ;;  %v9022_v54 = vld [vmem:[#allocation24_spill] sm:$0xff] }
 0x1a3   : > { %v7269_v20 = vpop.permute.xlu1 %5466  ;;  %v9023_v16 = vunpack.i.l.bf16 %v9022_v54  ;;  %v9026_v46 = vunpack.i.h.bf16 %v9022_v54 }
 0x1a4   : > { %9010 = vst [vmem:[#allocation83_spill] sm:$0xff] %v7269_v20  ;;  %v8771_v8 = vunpack.i.h.bf16 %v7269_v20  ;;  %v8772_v12 = vunpack.i.l.bf16 %v7269_v20  ;;  %v1989_v38 = vadd.f32 %v1973_v45, %v1829_v39  ;;  %v1990_v26 = vadd.f32 %v1974_v31, %v1830_v27 }
 0x1a6   : > { %v1976_v24 = vmul.f32 %v8771_v8, %v1960_v17  ;;  %v1975_v34 = vmul.f32 %v8772_v12, %v1956_v4  ;;  %v1999_v37 = vpack.c.bf16 %v1990_v26, %v1989_v38 }
 0x1a8   : > { %v1991_v9 = vadd.f32 %v1975_v34, %v1831_v36  ;;  %v1992_v30 = vadd.f32 %v1976_v24, %v1832_v40  ;;  %4972 = vmatprep.mubr.msk.bf16.mxu1 %vm2024_vm0, %v1999_v37 }
 0x1aa   : > { %v2000_v33 = vpack.c.bf16 %v1992_v30, %v1991_v9 }
 0x1ac   : > { %4973 = vmatmul.mubr.msk.bf16.vlgmr.msra.gmra.mrb[0].mxu1 %vm2024_vm0, %v2000_v33 }
 0x1ad   : > { %4977 = vmatpush3.bf16.msra.mxu1 %v7050_v23 }
 0x1ae   : > { %4978 = vmatprep.subr.bf16.mxu1 %v5474_v53 }
 0x1b1   : > { %4979 = vmatpush3.bf16.msra.mxu1 %v5474_v53 }
 0x1fb   : > { %v4962_v22 = vpop.f32.mrb[0].mxu0 }
 0x1fc   : > { %v2092_v40 = vadd.f32 %v4962_v22, %v7286_v58  ;;  %v2083_v36 = vpop.f32.mrb[1].mxu0  ;;  %v9015_v22 = vunpack.i.l.bf16 %v6126_v43 }
 0x1fd   : > { %v2084_v37 = vadd.f32 %v7286_v58, %v2083_v36  ;;  %v4963_v28 = vpop.f32.mrb[2].mxu0 }
 0x1fe   : > { %v2148_v4 = vmax.f32 %v2092_v40, 0.0  ;;  %v2095_v17 = vadd.f32 %v4963_v28, %v7286_v58  ;;  %v2086_v48 = vpop.f32.mrb[3].mxu0  ;;  %v9016_v28 = vunpack.i.l.bf16 %v6124_v42 }
 0x1ff   : > { %v2146_v6 = vmax.f32 %v2084_v37, 0.0  ;;  %v2087_v23 = vadd.f32 %v7286_v58, %v2086_v48  ;;  %v9017_v48 = vld [vmem:[#allocation21_spill] sm:$0xff] }
 0x200   : > { %v7293_v31 = vadd.f32 %v6184_v62, %v2148_v4  ;;  %v2149_v45 = vmax.f32 %v2095_v17, 0.0 }
 0x201   : > { %v7296_v39 = vadd.f32 %v6168_v56, %v2146_v6  ;;  %v2147_v27 = vmax.f32 %v2087_v23, 0.0  ;;  %v9018_v6 = vunpack.i.l.bf16 %v9017_v48 }
 0x202   : > { %9011 = vst [vmem:[#allocation84_spill] sm:$0xff] %v7293_v31  ;;  %v7299_v38 = vadd.f32 %v6186_v63, %v2149_v45  ;;  %v2189_v26 = vrot.slane %v7293_v31, %v6179_v60  ;;  %v2285_v24 = vrot.slane %v7293_v31, %v6171_v57 }
 0x203   : > { %9012 = vst [vmem:[#allocation85_spill] sm:$0xff] %v7296_v39  ;;  %v7306_v34 = vadd.f32 %v6176_v59, %v2147_v27  ;;  %v2181_v62 = vrot.slane %v7296_v39, %v6179_v60  ;;  %v2277_v56 = vrot.slane %v7296_v39, %v6171_v57  ;;  %v2373_v9 = vrot.slane %v7296_v39, %v6189_v2 }
 0x204   : > { %9013 = vst [vmem:[#allocation86_spill] sm:$0xff] %v7299_v38  ;;  %v2469_v63 = vrot.slane %v7296_v39, %v6203_v10  ;;  %v2565_v30 = vrot.slane %v7296_v39, %v6214_v15  ;;  %v2661_v33 = vrot.slane %v7296_v39, %v6253_v41  ;;  %v2381_v59 = vrot.slane %v7293_v31, %v6189_v2 }
 0x205   : > { %9014 = vst [vmem:[#allocation87_spill] sm:$0xff] %v7306_v34  ;;  %v2185_v53 = vrot.slane %v7306_v34, %v6179_v60  ;;  %v2242_v40 = vmul.f32 %v9015_v22, %v2181_v62  ;;  %v2281_v36 = vrot.slane %v7306_v34, %v6171_v57  ;;  %v2757_v37 = vrot.slane %v7296_v39, %v6260_v11  ;;  %v9020_v22 = vld [vmem:[#allocation28_spill] sm:$0xff] }
 0x206   : > { %v2338_v4 = vmul.f32 %v9016_v28, %v2277_v56  ;;  %v2377_v17 = vrot.slane %v7306_v34, %v6189_v2  ;;  %v2434_v23 = vmul.f32 %v9018_v6, %v2373_v9  ;;  %v2473_v45 = vrot.slane %v7306_v34, %v6203_v10 }
 0x207   : > { %v9019_v27 = vunpack.i.h.bf16 %v6126_v43  ;;  %v9021_v8 = vunpack.c.l.bf16 %v9020_v22  ;;  %v2530_v52 = vmul.f32 %v9023_v16, %v2469_v63  ;;  %v2569_v56 = vrot.slane %v7306_v34, %v6214_v15  ;;  %v9028_v16 = vld [vmem:[#allocation26_spill] sm:$0xff] }
 0x208   : > { %v9024_v28 = vunpack.i.h.bf16 %v6124_v42  ;;  %v9025_v9 = vunpack.i.h.bf16 %v9017_v48  ;;  %v2531_v1 = vmul.f32 %v9026_v46, %v2473_v45  ;;  %v2665_v43 = vrot.slane %v7306_v34, %v6253_v41 }
 0x209   : > { %v2243_v62 = vmul.f32 %v9019_v27, %v2185_v53  ;;  %v2258_v12 = vadd.f32 %v9021_v8, %v2242_v40  ;;  %v9027_v8 = vunpack.c.h.bf16 %v9020_v22  ;;  %v9029_v63 = vunpack.i.l.bf16 %v9028_v16 }
 0x20a   : > { %v2339_v20 = vmul.f32 %v9024_v28, %v2281_v36  ;;  %v2435_v6 = vmul.f32 %v9025_v9, %v2377_v17  ;;  %v9030_v44 = vunpack.i.h.bf16 %v9028_v16  ;;  %v9031_v36 = vld [vmem:[#allocation50_spill] sm:$0xff]  ;;  %v2761_v46 = vrot.slane %v7306_v34, %v6260_v11 }
 0x20b   : > { %v2259_v53 = vadd.f32 %v9027_v8, %v2243_v62  ;;  %v2354_v40 = vadd.f32 %v2338_v4, %v2258_v12  ;;  %v2626_v27 = vmul.f32 %v9029_v63, %v2565_v30  ;;  %v9032_v28 = vunpack.i.l.bf16 %v9031_v36  ;;  %v9034_v4 = vld [vmem:[#allocation38_spill] sm:$0xff] }
 0x20c   : > { %v2627_v42 = vmul.f32 %v9030_v44, %v2569_v56  ;;  %v9033_v17 = vunpack.i.h.bf16 %v9031_v36  ;;  %v2853_v45 = vrot.slane %v7296_v39, %v6282_v55  ;;  %v9035_v22 = vunpack.i.l.bf16 %v9034_v4 }
 0x20d   : > { %v2722_v48 = vmul.f32 %v9032_v28, %v2661_v33  ;;  %v2355_v62 = vadd.f32 %v2339_v20, %v2259_v53  ;;  %v2450_v12 = vadd.f32 %v2434_v23, %v2354_v40  ;;  %v2193_v44 = vrot.slane %v7299_v38, %v6179_v60  ;;  %v9039_v53 = vld [vmem:[#allocation40_spill] sm:$0xff] }
 0x20e   : > { %v2723_v54 = vmul.f32 %v9033_v17, %v2665_v43  ;;  %v2818_v30 = vmul.f32 %v9035_v22, %v2757_v37  ;;  %v9036_v56 = vunpack.i.h.bf16 %v9034_v4  ;;  %v2857_v9 = vrot.slane %v7306_v34, %v6282_v55  ;;  %v9037_v43 = vld [vmem:[#allocation23_spill] sm:$0xff]  ;;  %v9042_v17 = vld [vmem:[#allocation29_spill] sm:$0xff]  ;;  %v9044_v22 = vld [vmem:[#allocation20_spill] sm:$0xff] }
 0x20f   : > { %v9038_v8 = vunpack.i.l.bf16 %v9037_v43  ;;  %v2289_v63 = vrot.slane %v7299_v38, %v6171_v57  ;;  %v2451_v20 = vadd.f32 %v2435_v6, %v2355_v62  ;;  %v2546_v23 = vadd.f32 %v2530_v52, %v2450_v12  ;;  %v9048_v12 = vld [vmem:[#allocation22_spill] sm:$0xff] }
 0x210   : > { %v2819_v33 = vmul.f32 %v9036_v56, %v2761_v46  ;;  %v9040_v40 = vunpack.i.l.bf16 %v9039_v53  ;;  %v9041_v36 = vunpack.i.h.bf16 %v9037_v43  ;;  %v9043_v4 = vunpack.c.l.bf16 %v9042_v17 }
 0x211   : > { %v2244_v16 = vmul.f32 %v9038_v8, %v2189_v26  ;;  %v9045_v56 = vunpack.i.l.bf16 %v9044_v22  ;;  %v9046_v39 = vunpack.i.h.bf16 %v9044_v22  ;;  %v2385_v8 = vrot.slane %v7299_v38, %v6189_v2 }
 0x212   : > { %v2914_v37 = vmul.f32 %v9040_v40, %v2853_v45  ;;  %v2245_v28 = vmul.f32 %v9041_v36, %v2193_v44  ;;  %v2547_v6 = vadd.f32 %v2531_v1, %v2451_v20  ;;  %v2642_v52 = vadd.f32 %v2626_v27, %v2546_v23 }
 0x213   : > { %v2260_v46 = vadd.f32 %v9043_v4, %v2244_v16  ;;  %v2340_v34 = vmul.f32 %v9045_v56, %v2285_v24  ;;  %v2341_v26 = vmul.f32 %v9046_v39, %v2289_v63  ;;  %v9047_v62 = vunpack.c.h.bf16 %v9042_v17 }
 0x214   : > { %v9049_v43 = vunpack.i.l.bf16 %v9048_v12  ;;  %v9050_v16 = vunpack.i.h.bf16 %v9048_v12  ;;  %v2477_v24 = vrot.slane %v7293_v31, %v6203_v10  ;;  %v2481_v39 = vrot.slane %v7299_v38, %v6203_v10 }
 0x215   : > { %v2261_v45 = vadd.f32 %v9047_v62, %v2245_v28  ;;  %v2356_v40 = vadd.f32 %v2340_v34, %v2260_v46  ;;  %v2643_v63 = vadd.f32 %v2627_v42, %v2547_v6  ;;  %v2738_v4 = vadd.f32 %v2722_v48, %v2642_v52  ;;  %v9052_v34 = vld [vmem:[#allocation27_spill] sm:$0xff]  ;;  %v9055_v6 = vld [vmem:[#allocation30_spill] sm:$0xff] }
 0x216   : > { %v2436_v44 = vmul.f32 %v9049_v43, %v2381_v59  ;;  %v2437_v36 = vmul.f32 %v9050_v16, %v2385_v8  ;;  %v2573_v27 = vrot.slane %v7293_v31, %v6214_v15  ;;  %v9051_v20 = vunpack.i.h.bf16 %v9039_v53  ;;  %v9058_v16 = vld [vmem:[#allocation35_spill] sm:$0xff] }
 0x217   : > { %v2357_v1 = vadd.f32 %v2341_v26, %v2261_v45  ;;  %v9053_v28 = vunpack.i.l.bf16 %v9052_v34  ;;  %v2577_v46 = vrot.slane %v7299_v38, %v6214_v15  ;;  %v2739_v22 = vadd.f32 %v2723_v54, %v2643_v63 }
 0x218   : > { %v2915_v23 = vmul.f32 %v9051_v20, %v2857_v9  ;;  %v2452_v59 = vadd.f32 %v2436_v44, %v2356_v40  ;;  %v2834_v56 = vadd.f32 %v2818_v30, %v2738_v4  ;;  %v9054_v42 = vunpack.i.h.bf16 %v9052_v34 }
 0x219   : > { %v2532_v17 = vmul.f32 %v9053_v28, %v2477_v24  ;;  %v2453_v8 = vadd.f32 %v2437_v36, %v2357_v1  ;;  %v9056_v52 = vunpack.i.l.bf16 %v9055_v6  ;;  %v2669_v9 = vrot.slane %v7293_v31, %v6253_v41 }
 0x21a   : > { %v2533_v48 = vmul.f32 %v9054_v42, %v2481_v39  ;;  %v2673_v53 = vrot.slane %v7299_v38, %v6253_v41  ;;  %v2835_v45 = vadd.f32 %v2819_v33, %v2739_v22  ;;  %v9057_v43 = vunpack.i.h.bf16 %v9055_v6 }
 0x21b   : > { %v2548_v26 = vadd.f32 %v2532_v17, %v2452_v59  ;;  %v2628_v62 = vmul.f32 %v9056_v52, %v2573_v27  ;;  %v2765_v30 = vrot.slane %v7293_v31, %v6260_v11  ;;  %v2930_v44 = vadd.f32 %v2914_v37, %v2834_v56  ;;  %v9061_v59 = vld [vmem:[#allocation36_spill] sm:$0xff]  ;;  %v4966_v17 = vpop.f32.mrb[4].mxu0 }
 0x21c   : > { %v2549_v12 = vadd.f32 %v2533_v48, %v2453_v8  ;;  %v2629_v54 = vmul.f32 %v9057_v43, %v2577_v46  ;;  %v9059_v36 = vunpack.i.l.bf16 %v9058_v16  ;;  %v2769_v39 = vrot.slane %v7299_v38, %v6260_v11  ;;  %v2099_v42 = vpop.f32.mrb[5].mxu0 }
 0x21d   : > { %v2644_v40 = vadd.f32 %v2628_v62, %v2548_v26  ;;  %v2931_v63 = vadd.f32 %v2915_v23, %v2835_v45  ;;  %v9060_v1 = vunpack.i.h.bf16 %v9058_v16  ;;  %v2861_v27 = vrot.slane %v7293_v31, %v6282_v55  ;;  %v4967_v6 = vpop.f32.mrb[6].mxu0  ;;  %v9064_v62 = vld [vmem:[#allocation44_spill] sm:$0xff] }
 0x21e   : > { %v2724_v24 = vmul.f32 %v9059_v36, %v2669_v9  ;;  %v2645_v4 = vadd.f32 %v2629_v54, %v2549_v12  ;;  %v9062_v34 = vunpack.i.l.bf16 %v9061_v59  ;;  %v2865_v37 = vrot.slane %v7299_v38, %v6282_v55 }
 0x21f   : > { %v2725_v33 = vmul.f32 %v9060_v1, %v2673_v53  ;;  %v2946_v46 = vpack.c.bf16 %v2931_v63, %v2930_v44  ;;  %v9063_v56 = vunpack.i.h.bf16 %v9061_v59  ;;  %v2108_v8 = vadd.f32 %v4966_v17, %v7286_v58 }
 0x220   : > { %v2740_v20 = vadd.f32 %v2724_v24, %v2644_v40  ;;  %v2820_v28 = vmul.f32 %v9062_v34, %v2765_v30  ;;  %v2100_v26 = vadd.f32 %v7286_v58, %v2099_v42  ;;  %v9065_v9 = vunpack.i.l.bf16 %v9064_v62  ;;  %v2102_v30 = vpop.f32.mrb[7].mxu0  ;;  %v9067_v24 = vld [vmem:[#allocation41_spill] sm:$0xff] }
 0x221   : > { %v2741_v22 = vadd.f32 %v2725_v33, %v2645_v4  ;;  %v2821_v23 = vmul.f32 %v9063_v56, %v2769_v39  ;;  %4980 = vmatprep.mubr.msk.bf16.mxu1 %vm2024_vm0, %v2946_v46  ;;  %v9066_v45 = vunpack.i.h.bf16 %v9064_v62  ;;  %v2152_v43 = vmax.f32 %v2108_v8, 0.0  ;;  %v9068_v4 = vld [vmem:[#allocation33_spill] sm:$0xff] }
 0x222   : > { %v2836_v48 = vadd.f32 %v2820_v28, %v2740_v20  ;;  %v2916_v53 = vmul.f32 %v9065_v9, %v2861_v27  ;;  %v2111_v54 = vadd.f32 %v4967_v6, %v7286_v58  ;;  %v2150_v44 = vmax.f32 %v2100_v26, 0.0  ;;  %v9070_v20 = vld [vmem:[#allocation42_spill] sm:$0xff]  ;;  %v9073_v6 = vld [vmem:[#allocation25_spill] sm:$0xff] }
 0x223   : > { %v2837_v52 = vadd.f32 %v2821_v23, %v2741_v22  ;;  %v2917_v12 = vmul.f32 %v9066_v45, %v2865_v37  ;;  %v2103_v36 = vadd.f32 %v7286_v58, %v2102_v30  ;;  %v7446_v39 = vadd.f32 %v9067_v24, %v2152_v43  ;;  %v9071_v37 = vld [vmem:[#allocation34_spill] sm:$0xff]  ;;  %v9075_v45 = vld [vmem:[#allocation49_spill] sm:$0xff]  ;;  %v9077_v30 = vld [vmem:[#allocation51_spill] sm:$0xff] }
 0x224   : > { %v2932_v40 = vadd.f32 %v2916_v53, %v2836_v48  ;;  %v2153_v63 = vmax.f32 %v2111_v54, 0.0  ;;  %v7449_v1 = vadd.f32 %v9068_v4, %v2150_v44  ;;  %v9078_v44 = vunpack.i.l.bf16 %v9077_v30 }
 0x225   : > { %v2933_v16 = vadd.f32 %v2917_v12, %v2837_v52  ;;  %v2151_v27 = vmax.f32 %v2103_v36, 0.0  ;;  %v2205_v34 = vrot.slane %v7446_v39, %v6179_v60  ;;  %v2301_v28 = vrot.slane %v7446_v39, %v6171_v57 }
 0x226   : > { %9069 = vst [vmem:[#allocation21_spill] sm:$0xff] %v7449_v1  ;;  %v7452_v59 = vadd.f32 %v9070_v20, %v2153_v63  ;;  %v2197_v46 = vrot.slane %v7449_v1, %v6179_v60  ;;  %v2293_v22 = vrot.slane %v7449_v1, %v6171_v57  ;;  %v2389_v56 = vrot.slane %v7449_v1, %v6189_v2  ;;  %v9080_v63 = vld [vmem:[#allocation32_spill] sm:$0xff] }
 0x227   : > { %v2947_v33 = vpack.c.bf16 %v2933_v16, %v2932_v40  ;;  %v7460_v17 = vadd.f32 %v9071_v37, %v2151_v27  ;;  %v2485_v23 = vrot.slane %v7449_v1, %v6203_v10  ;;  %v2581_v8 = vrot.slane %v7449_v1, %v6214_v15  ;;  %v9082_v27 = vld [vmem:[#allocation31_spill] sm:$0xff] }
 0x228   : > { %v2677_v42 = vrot.slane %v7449_v1, %v6253_v41  ;;  %v2397_v48 = vrot.slane %v7446_v39, %v6189_v2  ;;  %v9074_v52 = vunpack.i.l.bf16 %v9073_v6  ;;  %v2773_v53 = vrot.slane %v7449_v1, %v6260_v11 }
 0x229   : > { %4981 = vmatmul.mubr.msk.bf16.vlgmr.msra.gmra.mrb[4].mxu1 %vm2024_vm0, %v2947_v33  ;;  %9072 = vst [vmem:[#allocation28_spill] sm:$0xff] %v7460_v17  ;;  %v2201_v26 = vrot.slane %v7460_v17, %v6179_v60  ;;  %v2297_v9 = vrot.slane %v7460_v17, %v6171_v57  ;;  %v9076_v12 = vunpack.i.l.bf16 %v9075_v45  ;;  %v2393_v54 = vrot.slane %v7460_v17, %v6189_v2 }
 0x22a   : > { %v2246_v62 = vmul.f32 %v9074_v52, %v2197_v46  ;;  %v2438_v40 = vmul.f32 %v9078_v44, %v2389_v56  ;;  %v2489_v16 = vrot.slane %v7460_v17, %v6203_v10  ;;  %v9079_v36 = vunpack.i.h.bf16 %v9073_v6 }
 0x22b   : > { %v2342_v43 = vmul.f32 %v9076_v12, %v2293_v22  ;;  %v9081_v4 = vunpack.c.l.bf16 %v9080_v63  ;;  %v9083_v20 = vunpack.i.l.bf16 %v9082_v27  ;;  %v2585_v46 = vrot.slane %v7460_v17, %v6214_v15 }
 0x22c   : > { %v2247_v24 = vmul.f32 %v9079_v36, %v2201_v26  ;;  %v9084_v22 = vunpack.i.h.bf16 %v9075_v45  ;;  %v9085_v56 = vunpack.i.h.bf16 %v9077_v30  ;;  %v9086_v44 = vunpack.i.h.bf16 %v9082_v27 }
 0x22d   : > { %v2262_v33 = vadd.f32 %v9081_v4, %v2246_v62  ;;  %v2534_v37 = vmul.f32 %v9083_v20, %v2485_v23  ;;  %v2681_v26 = vrot.slane %v7460_v17, %v6253_v41  ;;  %v9087_v6 = vunpack.c.h.bf16 %v9080_v63  ;;  %v9088_v23 = vld [vmem:[#allocation54_spill] sm:$0xff] }
 0x22e   : > { %v2343_v52 = vmul.f32 %v9084_v22, %v2297_v9  ;;  %v2439_v12 = vmul.f32 %v9085_v56, %v2393_v54  ;;  %v2535_v38 = vmul.f32 %v9086_v44, %v2489_v16  ;;  %v9089_v4 = vunpack.i.l.bf16 %v9088_v23  ;;  %v9091_v9 = vld [vmem:[#allocation55_spill] sm:$0xff] }
 0x22f   : > { %v2263_v62 = vadd.f32 %v9087_v6, %v2247_v24  ;;  %v2358_v36 = vadd.f32 %v2342_v43, %v2262_v33  ;;  %v9090_v31 = vunpack.i.h.bf16 %v9088_v23  ;;  %v9092_v22 = vunpack.i.l.bf16 %v9091_v9  ;;  %v9094_v33 = vld [vmem:[#allocation37_spill] sm:$0xff] }
 0x230   : > { %v2630_v20 = vmul.f32 %v9089_v4, %v2581_v8  ;;  %v9093_v54 = vunpack.i.h.bf16 %v9091_v9  ;;  %v2777_v16 = vrot.slane %v7460_v17, %v6260_v11  ;;  %v2869_v63 = vrot.slane %v7449_v1, %v6282_v55 }
 0x231   : > { %v2631_v45 = vmul.f32 %v9090_v31, %v2585_v46  ;;  %v2726_v30 = vmul.f32 %v9092_v22, %v2677_v42  ;;  %v2359_v24 = vadd.f32 %v2343_v52, %v2263_v62  ;;  %v2454_v43 = vadd.f32 %v2438_v40, %v2358_v36  ;;  %v9099_v62 = vld [vmem:[#allocation60_spill] sm:$0xff] }
 0x232   : > { %v2727_v27 = vmul.f32 %v9093_v54, %v2681_v26  ;;  %v9095_v56 = vunpack.i.l.bf16 %v9094_v33  ;;  %v2209_v31 = vrot.slane %v7452_v59, %v6179_v60  ;;  %v9096_v46 = vunpack.i.h.bf16 %v9094_v33  ;;  %v9097_v26 = vld [vmem:[#allocation47_spill] sm:$0xff]  ;;  %v9102_v54 = vld [vmem:[#allocation45_spill] sm:$0xff] }
 0x233   : > { %v2873_v44 = vrot.slane %v7460_v17, %v6282_v55  ;;  %v9098_v6 = vunpack.i.l.bf16 %v9097_v26  ;;  %v2305_v4 = vrot.slane %v7452_v59, %v6171_v57  ;;  %v2455_v52 = vadd.f32 %v2439_v12, %v2359_v24 }
 0x234   : > { %v2822_v8 = vmul.f32 %v9095_v56, %v2773_v53  ;;  %v2823_v42 = vmul.f32 %v9096_v46, %v2777_v16  ;;  %v2550_v40 = vadd.f32 %v2534_v37, %v2454_v43  ;;  %v9100_v36 = vunpack.i.l.bf16 %v9099_v62  ;;  %v9104_v56 = vld [vmem:[#allocation39_spill] sm:$0xff]  ;;  %v9108_v43 = vld [vmem:[#allocation52_spill] sm:$0xff] }
 0x235   : > { %v2248_v23 = vmul.f32 %v9098_v6, %v2205_v34  ;;  %v9101_v9 = vunpack.i.h.bf16 %v9097_v26  ;;  %v9103_v33 = vunpack.c.l.bf16 %v9102_v54  ;;  %v9105_v46 = vunpack.i.l.bf16 %v9104_v56 }
 0x236   : > { %v2918_v53 = vmul.f32 %v9100_v36, %v2869_v63  ;;  %v9106_v1 = vunpack.i.h.bf16 %v9104_v56  ;;  %v2401_v6 = vrot.slane %v7452_v59, %v6189_v2  ;;  %v2551_v12 = vadd.f32 %v2535_v38, %v2455_v52 }
 0x237   : > { %v2249_v22 = vmul.f32 %v9101_v9, %v2209_v31  ;;  %v2264_v16 = vadd.f32 %v9103_v33, %v2248_v23  ;;  %v2344_v17 = vmul.f32 %v9105_v46, %v2301_v28  ;;  %v2646_v37 = vadd.f32 %v2630_v20, %v2550_v40 }
 0x238   : > { %v2345_v34 = vmul.f32 %v9106_v1, %v2305_v4  ;;  %v9107_v24 = vunpack.c.h.bf16 %v9102_v54  ;;  %v9109_v26 = vunpack.i.l.bf16 %v9108_v43  ;;  %v9110_v23 = vunpack.i.h.bf16 %v9108_v43 }
 0x239   : > { %v2360_v36 = vadd.f32 %v2344_v17, %v2264_v16  ;;  %v2493_v28 = vrot.slane %v7446_v39, %v6203_v10  ;;  %v2497_v1 = vrot.slane %v7452_v59, %v6203_v10  ;;  %v2647_v4 = vadd.f32 %v2631_v45, %v2551_v12  ;;  %v9112_v17 = vld [vmem:[#allocation53_spill] sm:$0xff]  ;;  %v9115_v12 = vld [vmem:[#allocation46_spill] sm:$0xff] }
 0x23a   : > { %v2265_v63 = vadd.f32 %v9107_v24, %v2249_v22  ;;  %v2440_v31 = vmul.f32 %v9109_v26, %v2397_v48  ;;  %v2441_v9 = vmul.f32 %v9110_v23, %v2401_v6  ;;  %v2742_v33 = vadd.f32 %v2726_v30, %v2646_v37  ;;  %v9118_v23 = vld [vmem:[#allocation57_spill] sm:$0xff] }
 0x23b   : > { %v2589_v20 = vrot.slane %v7446_v39, %v6214_v15  ;;  %v9111_v52 = vunpack.i.h.bf16 %v9099_v62  ;;  %v9113_v22 = vunpack.i.l.bf16 %v9112_v17  ;;  %v2593_v16 = vrot.slane %v7452_v59, %v6214_v15 }
 0x23c   : > { %v2361_v38 = vadd.f32 %v2345_v34, %v2265_v63  ;;  %v2456_v48 = vadd.f32 %v2440_v31, %v2360_v36  ;;  %v2743_v56 = vadd.f32 %v2727_v27, %v2647_v4  ;;  %v2838_v46 = vadd.f32 %v2822_v8, %v2742_v33 }
 0x23d   : > { %v2919_v40 = vmul.f32 %v9111_v52, %v2873_v44  ;;  %v2536_v54 = vmul.f32 %v9113_v22, %v2493_v28  ;;  %v9114_v45 = vunpack.i.h.bf16 %v9112_v17  ;;  %v9116_v37 = vunpack.i.l.bf16 %v9115_v12 }
 0x23e   : > { %v2457_v6 = vadd.f32 %v2441_v9, %v2361_v38  ;;  %v2685_v44 = vrot.slane %v7446_v39, %v6253_v41  ;;  %v2689_v62 = vrot.slane %v7452_v59, %v6253_v41  ;;  %v2839_v63 = vadd.f32 %v2823_v42, %v2743_v56 }
 0x23f   : > { %v2537_v30 = vmul.f32 %v9114_v45, %v2497_v1  ;;  %v2552_v34 = vadd.f32 %v2536_v54, %v2456_v48  ;;  %v2632_v24 = vmul.f32 %v9116_v37, %v2589_v20  ;;  %v9117_v26 = vunpack.i.h.bf16 %v9115_v12  ;;  %v9121_v48 = vld [vmem:[#allocation59_spill] sm:$0xff]  ;;  %v9124_v45 = vld [vmem:[#allocation58_spill] sm:$0xff] }
 0x240   : > { %v2781_v8 = vrot.slane %v7446_v39, %v6260_v11  ;;  %v2934_v31 = vadd.f32 %v2918_v53, %v2838_v46  ;;  %v9119_v9 = vunpack.i.l.bf16 %v9118_v23  ;;  %v2785_v1 = vrot.slane %v7452_v59, %v6260_v11 }
 0x241   : > { %v2553_v43 = vadd.f32 %v2537_v30, %v2457_v6  ;;  %v2633_v27 = vmul.f32 %v9117_v26, %v2593_v16  ;;  %v2648_v36 = vadd.f32 %v2632_v24, %v2552_v34  ;;  %v2935_v4 = vadd.f32 %v2919_v40, %v2839_v63 }
 0x242   : > { %v2728_v28 = vmul.f32 %v9119_v9, %v2685_v44  ;;  %v9120_v38 = vunpack.i.h.bf16 %v9118_v23  ;;  %v2877_v20 = vrot.slane %v7446_v39, %v6282_v55  ;;  %v9122_v17 = vunpack.i.l.bf16 %v9121_v48 }
 0x243   : > { %v2649_v33 = vadd.f32 %v2633_v27, %v2553_v43  ;;  %v2881_v53 = vrot.slane %v7452_v59, %v6282_v55  ;;  %v2948_v54 = vpack.c.bf16 %v2935_v4, %v2934_v31  ;;  %v9123_v56 = vunpack.i.h.bf16 %v9121_v48 }
 0x244   : > { %v2729_v42 = vmul.f32 %v9120_v38, %v2689_v62  ;;  %v2744_v52 = vadd.f32 %v2728_v28, %v2648_v36  ;;  %v2824_v22 = vmul.f32 %v9122_v17, %v2781_v8  ;;  %v9125_v30 = vunpack.i.l.bf16 %v9124_v45 }
 0x245   : > { %v2825_v46 = vmul.f32 %v9123_v56, %v2785_v1  ;;  %4984 = vmatprep.mubr.msk.bf16.mxu1 %vm2024_vm0, %v2948_v54  ;;  %v9126_v12 = vunpack.i.h.bf16 %v9124_v45  ;;  %v9129_v45 = vld [vmem:[#allocation43_spill] sm:$0xff] }
 0x246   : > { %v2745_v16 = vadd.f32 %v2729_v42, %v2649_v33  ;;  %v2840_v40 = vadd.f32 %v2824_v22, %v2744_v52  ;;  %v2920_v34 = vmul.f32 %v9125_v30, %v2877_v20  ;;  %v9130_v30 = vunpack.i.l.bf16 %v9129_v45 }
 0x247   : > { %v2921_v37 = vmul.f32 %v9126_v12, %v2881_v53 }
 0x248   : > { %v2841_v6 = vadd.f32 %v2825_v46, %v2745_v16  ;;  %v2936_v24 = vadd.f32 %v2920_v34, %v2840_v40  ;;  %v9127_v16 = vld [vmem:[#allocation61_spill] sm:$0xff] }
 0x249   : > { %v9128_v56 = vunpack.i.l.bf16 %v9127_v16 }
 0x24a   : > { %v2937_v44 = vadd.f32 %v2921_v37, %v2841_v6  ;;  %v9131_v37 = vunpack.i.l.bf16 %v6793_v61 }
 0x24b   : > { %v4970_v63 = vpop.f32.mrb[8].mxu0 }
 0x24c   : > { %v2949_v62 = vpack.c.bf16 %v2937_v44, %v2936_v24  ;;  %v2124_v43 = vadd.f32 %v4970_v63, %v7286_v58  ;;  %v2115_v26 = vpop.f32.mrb[9].mxu0 }
 0x24d   : > { %v2116_v27 = vadd.f32 %v7286_v58, %v2115_v26  ;;  %v4971_v8 = vpop.f32.mrb[10].mxu0 }
 0x24e   : > { %4985 = vmatmul.mubr.msk.bf16.gmra.mrb[8].mxu1 %vm2024_vm0, %v2949_v62  ;;  %v2156_v31 = vmax.f32 %v2124_v43, 0.0  ;;  %v2127_v36 = vadd.f32 %v4971_v8, %v7286_v58  ;;  %v2118_v23 = vpop.f32.mrb[11].mxu0  ;;  %v9132_v62 = vunpack.i.h.bf16 %v9127_v16  ;;  %v9133_v43 = vld [vmem:[#allocation64_spill] sm:$0xff]  ;;  %v9135_v8 = vld [vmem:[#allocation67_spill] sm:$0xff] }
 0x24f   : > { %v2154_v9 = vmax.f32 %v2116_v27, 0.0  ;;  %v2119_v28 = vadd.f32 %v7286_v58, %v2118_v23  ;;  %v9134_v26 = vunpack.c.l.bf16 %v9133_v43 }
 0x250   : > { %v7601_v1 = vadd.f32 %v6795_v29, %v2156_v31  ;;  %v2157_v4 = vmax.f32 %v2127_v36, 0.0  ;;  %v9136_v31 = vunpack.i.l.bf16 %v9135_v8 }
 0x251   : > { %v7604_v33 = vadd.f32 %v6789_v32, %v2154_v9  ;;  %v2155_v38 = vmax.f32 %v2119_v28, 0.0  ;;  %v9137_v9 = vunpack.i.h.bf16 %v9129_v45 }
 0x252   : > { %v7607_v42 = vadd.f32 %v6797_v0, %v2157_v4  ;;  %v2221_v20 = vrot.slane %v7601_v1, %v6179_v60  ;;  %v2317_v52 = vrot.slane %v7601_v1, %v6171_v57  ;;  %v9138_v4 = vunpack.i.h.bf16 %v6793_v61 }
 0x253   : > { %v7614_v48 = vadd.f32 %v6791_v21, %v2155_v38  ;;  %v2213_v29 = vrot.slane %v7604_v33, %v6179_v60  ;;  %v2309_v32 = vrot.slane %v7604_v33, %v6171_v57  ;;  %v2405_v17 = vrot.slane %v7604_v33, %v6189_v2 }
 0x254   : > { %v2501_v0 = vrot.slane %v7604_v33, %v6203_v10  ;;  %v2597_v22 = vrot.slane %v7604_v33, %v6214_v15  ;;  %v2693_v53 = vrot.slane %v7604_v33, %v6253_v41  ;;  %v2413_v21 = vrot.slane %v7601_v1, %v6189_v2 }
 0x255   : > { %v2217_v54 = vrot.slane %v7614_v48, %v6179_v60  ;;  %v2250_v46 = vmul.f32 %v9128_v56, %v2213_v29  ;;  %v2313_v40 = vrot.slane %v7614_v48, %v6171_v57  ;;  %v2789_v6 = vrot.slane %v7604_v33, %v6260_v11 }
 0x256   : > { %v2346_v34 = vmul.f32 %v9130_v30, %v2309_v32  ;;  %v2409_v12 = vrot.slane %v7614_v48, %v6189_v2  ;;  %v2442_v24 = vmul.f32 %v9131_v37, %v2405_v17  ;;  %v2505_v44 = vrot.slane %v7614_v48, %v6203_v10 }
 0x257   : > { %v2251_v63 = vmul.f32 %v9132_v62, %v2217_v54  ;;  %v2266_v27 = vadd.f32 %v9134_v26, %v2250_v46  ;;  %v2538_v36 = vmul.f32 %v9136_v31, %v2501_v0  ;;  %v2601_v23 = vrot.slane %v7614_v48, %v6214_v15  ;;  %v9141_v0 = vld [vmem:[#allocation48_spill] sm:$0xff] }
 0x258   : > { %v2347_v28 = vmul.f32 %v9137_v9, %v2313_v40  ;;  %v2443_v38 = vmul.f32 %v9138_v4, %v2409_v12  ;;  %v9139_v29 = vunpack.i.h.bf16 %v9135_v8  ;;  %v2697_v17 = vrot.slane %v7614_v48, %v6253_v41  ;;  %v9144_v40 = vld [vmem:[#allocation72_spill] sm:$0xff]  ;;  %v9150_v4 = vld [vmem:[#allocation62_spill] sm:$0xff] }
 0x259   : > { %v9140_v54 = vunpack.c.h.bf16 %v9133_v43  ;;  %v2362_v56 = vadd.f32 %v2346_v34, %v2266_v27  ;;  %v9142_v46 = vunpack.i.l.bf16 %v9141_v0  ;;  %v9143_v37 = vunpack.i.h.bf16 %v9141_v0  ;;  %v9147_v27 = vld [vmem:[#allocation73_spill] sm:$0xff] }
 0x25a   : > { %v2539_v32 = vmul.f32 %v9139_v29, %v2505_v44  ;;  %v9145_v62 = vunpack.i.l.bf16 %v9144_v40  ;;  %v9146_v12 = vunpack.i.h.bf16 %v9144_v40  ;;  %v2793_v44 = vrot.slane %v7614_v48, %v6260_v11 }
 0x25b   : > { %v2267_v16 = vadd.f32 %v9140_v54, %v2251_v63  ;;  %v2634_v30 = vmul.f32 %v9142_v46, %v2597_v22  ;;  %v2635_v45 = vmul.f32 %v9143_v37, %v2601_v23  ;;  %v2885_v43 = vrot.slane %v7604_v33, %v6282_v55  ;;  %v9155_v37 = vld [vmem:[#allocation66_spill] sm:$0xff] }
 0x25c   : > { %v2730_v61 = vmul.f32 %v9145_v62, %v2693_v53  ;;  %v2731_v26 = vmul.f32 %v9146_v12, %v2697_v17  ;;  %v2458_v34 = vadd.f32 %v2442_v24, %v2362_v56  ;;  %v9148_v8 = vunpack.i.l.bf16 %v9147_v27  ;;  %v9157_v12 = vld [vmem:[#allocation63_spill] sm:$0xff] }
 0x25d   : > { %v2363_v63 = vadd.f32 %v2347_v28, %v2267_v16  ;;  %v2225_v31 = vrot.slane %v7607_v42, %v6179_v60  ;;  %v9149_v23 = vunpack.i.h.bf16 %v9147_v27  ;;  %v2889_v9 = vrot.slane %v7614_v48, %v6282_v55  ;;  %v9152_v16 = vld [vmem:[#allocation65_spill] sm:$0xff] }
 0x25e   : > { %v2826_v22 = vmul.f32 %v9148_v8, %v2789_v6  ;;  %v9151_v29 = vunpack.i.l.bf16 %v9150_v4  ;;  %v2321_v54 = vrot.slane %v7607_v42, %v6171_v57  ;;  %v2554_v24 = vadd.f32 %v2538_v36, %v2458_v34  ;;  %v9161_v34 = vld [vmem:[#allocation70_spill] sm:$0xff] }
 0x25f   : > { %v2827_v53 = vmul.f32 %v9149_v23, %v2793_v44  ;;  %v2459_v28 = vadd.f32 %v2443_v38, %v2363_v63  ;;  %v9153_v56 = vunpack.i.l.bf16 %v9152_v16  ;;  %v9154_v0 = vunpack.i.h.bf16 %v9150_v4 }
 0x260   : > { %v2252_v17 = vmul.f32 %v9151_v29, %v2221_v20  ;;  %v9156_v40 = vunpack.c.l.bf16 %v9155_v37  ;;  %v9158_v44 = vunpack.i.l.bf16 %v9157_v12  ;;  %v9159_v8 = vunpack.i.h.bf16 %v9157_v12 }
 0x261   : > { %v2922_v6 = vmul.f32 %v9153_v56, %v2885_v43  ;;  %v2253_v46 = vmul.f32 %v9154_v0, %v2225_v31  ;;  %v2417_v23 = vrot.slane %v7607_v42, %v6189_v2  ;;  %v2555_v38 = vadd.f32 %v2539_v32, %v2459_v28 }
 0x262   : > { %v2268_v62 = vadd.f32 %v9156_v40, %v2252_v17  ;;  %v2348_v27 = vmul.f32 %v9158_v44, %v2317_v52  ;;  %v2349_v20 = vmul.f32 %v9159_v8, %v2321_v54  ;;  %v2650_v36 = vadd.f32 %v2634_v30, %v2554_v24 }
 0x263   : > { %v9160_v63 = vunpack.c.h.bf16 %v9155_v37  ;;  %v9162_v4 = vunpack.i.l.bf16 %v9161_v34  ;;  %v9163_v17 = vunpack.i.h.bf16 %v9161_v34  ;;  %v2509_v52 = vrot.slane %v7601_v1, %v6203_v10 }
 0x264   : > { %v2364_v29 = vadd.f32 %v2348_v27, %v2268_v62  ;;  %v2513_v54 = vrot.slane %v7607_v42, %v6203_v10  ;;  %v2651_v0 = vadd.f32 %v2635_v45, %v2555_v38  ;;  %v2746_v40 = vadd.f32 %v2730_v61, %v2650_v36 }
 0x265   : > { %v2269_v43 = vadd.f32 %v9160_v63, %v2253_v46  ;;  %v2444_v31 = vmul.f32 %v9162_v4, %v2413_v21  ;;  %v2445_v56 = vmul.f32 %v9163_v17, %v2417_v23  ;;  %v2605_v30 = vrot.slane %v7601_v1, %v6214_v15  ;;  %v9165_v46 = vld [vmem:[#allocation69_spill] sm:$0xff]  ;;  %v9168_v23 = vld [vmem:[#allocation71_spill] sm:$0xff] }
 0x266   : > { %v9164_v28 = vunpack.i.h.bf16 %v9152_v16  ;;  %v9166_v37 = vunpack.i.l.bf16 %v9165_v46  ;;  %v2609_v12 = vrot.slane %v7607_v42, %v6214_v15  ;;  %v2747_v44 = vadd.f32 %v2731_v26, %v2651_v0 }
 0x267   : > { %v2365_v32 = vadd.f32 %v2349_v20, %v2269_v43  ;;  %v2460_v21 = vadd.f32 %v2444_v31, %v2364_v29  ;;  %v2842_v27 = vadd.f32 %v2826_v22, %v2746_v40  ;;  %v9167_v45 = vunpack.i.h.bf16 %v9165_v46  ;;  %v9171_v29 = vld [vmem:[#allocation56_spill] sm:$0xff] }
 0x268   : > { %v2923_v24 = vmul.f32 %v9164_v28, %v2889_v9  ;;  %v2540_v62 = vmul.f32 %v9166_v37, %v2509_v52  ;;  %v9169_v38 = vunpack.i.l.bf16 %v9168_v23  ;;  %v2701_v9 = vrot.slane %v7601_v1, %v6253_v41  ;;  %v9174_v28 = vld [vmem:[#allocation74_spill] sm:$0xff] }
 0x269   : > { %v2461_v8 = vadd.f32 %v2445_v56, %v2365_v32  ;;  %v2541_v61 = vmul.f32 %v9167_v45, %v2513_v54  ;;  %v2705_v16 = vrot.slane %v7607_v42, %v6253_v41  ;;  %v2843_v63 = vadd.f32 %v2827_v53, %v2747_v44 }
 0x26a   : > { %v2556_v20 = vadd.f32 %v2540_v62, %v2460_v21  ;;  %v2636_v36 = vmul.f32 %v9169_v38, %v2605_v30  ;;  %v9170_v34 = vunpack.i.h.bf16 %v9168_v23  ;;  %v2797_v22 = vrot.slane %v7601_v1, %v6260_v11 }
 0x26b   : > { %v2557_v43 = vadd.f32 %v2541_v61, %v2461_v8  ;;  %v2938_v4 = vadd.f32 %v2922_v6, %v2842_v27  ;;  %v9172_v17 = vunpack.i.l.bf16 %v9171_v29  ;;  %v2801_v52 = vrot.slane %v7607_v42, %v6260_v11  ;;  %v9177_v8 = vld [vmem:[#allocation75_spill] sm:$0xff] }
 0x26c   : > { %v2637_v26 = vmul.f32 %v9170_v34, %v2609_v12  ;;  %v2652_v31 = vadd.f32 %v2636_v36, %v2556_v20  ;;  %v2939_v54 = vadd.f32 %v2923_v24, %v2843_v63  ;;  %v9173_v40 = vunpack.i.h.bf16 %v9171_v29  ;;  %v5476_v63 = vld [vmem:[%s8565_s6 + $0x8] sm:$0xff]  }
 0x26d   : > { %v2732_v56 = vmul.f32 %v9172_v17, %v2701_v9  ;;  %v2893_v32 = vrot.slane %v7601_v1, %v6282_v55  ;;  %v9175_v21 = vunpack.i.l.bf16 %v9174_v28  ;;  %v2897_v6 = vrot.slane %v7607_v42, %v6282_v55 }
 0x26e   : > { %v2653_v0 = vadd.f32 %v2637_v26, %v2557_v43  ;;  %v2733_v53 = vmul.f32 %v9173_v40, %v2705_v16  ;;  %v2950_v37 = vpack.c.bf16 %v2939_v54, %v2938_v4  ;;  %v9176_v12 = vunpack.i.h.bf16 %v9174_v28  ;;  %v5475_v16 = vld [vmem:[%s8565_s6] sm:$0xff]  }
 0x26f   : > { %v2748_v30 = vadd.f32 %v2732_v56, %v2652_v31  ;;  %v2828_v46 = vmul.f32 %v9175_v21, %v2797_v22  ;;  %v9178_v45 = vunpack.i.l.bf16 %v9177_v8  ;;  %v9179_v20 = vunpack.i.h.bf16 %v9177_v8  ;;  %4996 = vmatprep.subr.bf16.mxu0 %v5475_v16  ;;  %v9182_v8 = vld [vmem:[#allocation77_spill] sm:$0xff] }
 0x270   : > { %v2749_v62 = vadd.f32 %v2733_v53, %v2653_v0  ;;  %v2829_v44 = vmul.f32 %v9176_v12, %v2801_v52  ;;  %4988 = vmatprep.mubr.msk.bf16.mxu1 %vm2024_vm0, %v2950_v37  ;;  %4997 = vmatpush3.bf16.msra.mxu0 %v5475_v16 }
 0x271   : > { %v2844_v24 = vadd.f32 %v2828_v46, %v2748_v30  ;;  %v2924_v61 = vmul.f32 %v9178_v45, %v2893_v32  ;;  %v2925_v23 = vmul.f32 %v9179_v20, %v2897_v6  ;;  %4998 = vmatprep.subr.bf16.mxu0 %v5476_v63  ;;  %v9183_v45 = vunpack.i.l.bf16 %v9182_v8 }
 0x272   : > { %v2845_v27 = vadd.f32 %v2829_v44, %v2749_v62  ;;  %v9180_v62 = vld [vmem:[#allocation76_spill] sm:$0xff] }
 0x273   : > { %v2940_v38 = vadd.f32 %v2924_v61, %v2844_v24  ;;  %v9181_v12 = vunpack.i.l.bf16 %v9180_v62 }
 0x274   : > { %v2941_v36 = vadd.f32 %v2925_v23, %v2845_v27  ;;  %4999 = vmatpush3.bf16.msra.mxu0 %v5476_v63  ;;  %v9184_v23 = vunpack.i.l.bf16 %v7095_v50  ;;  %v9186_v63 = vunpack.c.l.bf16 %v7039_v3 }
 0x276   : > { %v2951_v9 = vpack.c.bf16 %v2941_v36, %v2940_v38 }
 0x278   : > { %4989 = vmatmul.mubr.msk.bf16.gmra.mrb[12].mxu1 %vm2024_vm0, %v2951_v9  ;;  %v9185_v9 = vunpack.i.h.bf16 %v9180_v62 }
 0x27f   : > { %v4974_v43 = vpop.f32.mrb[0].mxu1 }
 0x280   : > { %v2140_v34 = vadd.f32 %v4974_v43, %v7286_v58  ;;  %v2131_v26 = vpop.f32.mrb[1].mxu1 }
 0x281   : > { %v2132_v22 = vadd.f32 %v7286_v58, %v2131_v26  ;;  %v4975_v4 = vpop.f32.mrb[2].mxu1 }
 0x282   : > { %v2160_v31 = vmax.f32 %v2140_v34, 0.0  ;;  %v2143_v29 = vadd.f32 %v4975_v4, %v7286_v58  ;;  %v2134_v17 = vpop.f32.mrb[3].mxu1  ;;  %v9187_v34 = vunpack.i.l.bf16 %v7077_v19  ;;  %v9188_v4 = vunpack.i.h.bf16 %v9182_v8 }
 0x283   : > { %v2158_v56 = vmax.f32 %v2132_v22, 0.0  ;;  %v2135_v52 = vadd.f32 %v7286_v58, %v2134_v17 }
 0x284   : > { %v7761_v54 = vadd.f32 %v7034_v47, %v2160_v31  ;;  %v2161_v0 = vmax.f32 %v2143_v29, 0.0  ;;  %v9189_v29 = vunpack.i.h.bf16 %v7095_v50 }
 0x285   : > { %v7764_v40 = vadd.f32 %v7041_v14, %v2158_v56  ;;  %v2159_v53 = vmax.f32 %v2135_v52, 0.0  ;;  %v9190_v56 = vunpack.i.h.bf16 %v7077_v19 }
 0x286   : > { %v7767_v32 = vadd.f32 %v7036_v49, %v2161_v0  ;;  %v2237_v30 = vrot.slane %v7761_v54, %v6179_v60  ;;  %v2333_v28 = vrot.slane %v7761_v54, %v6171_v57 }
 0x287   : > { %v7774_v58 = vadd.f32 %v7043_v13, %v2159_v53  ;;  %v2229_v47 = vrot.slane %v7764_v40, %v6179_v60  ;;  %v2325_v14 = vrot.slane %v7764_v40, %v6171_v57  ;;  %v2421_v21 = vrot.slane %v7764_v40, %v6189_v2 }
 0x288   : > { %v2517_v49 = vrot.slane %v7764_v40, %v6203_v10  ;;  %v2613_v46 = vrot.slane %v7764_v40, %v6214_v15  ;;  %v2709_v6 = vrot.slane %v7764_v40, %v6253_v41  ;;  %v2429_v13 = vrot.slane %v7761_v54, %v6189_v2 }
 0x289   : > { %v2233_v37 = vrot.slane %v7774_v58, %v6179_v60  ;;  %v2254_v44 = vmul.f32 %v9181_v12, %v2229_v47  ;;  %v2329_v24 = vrot.slane %v7774_v58, %v6171_v57  ;;  %v2805_v27 = vrot.slane %v7764_v40, %v6260_v11 }
 0x28a   : > { %v2350_v61 = vmul.f32 %v9183_v45, %v2325_v14  ;;  %v2425_v20 = vrot.slane %v7774_v58, %v6189_v2  ;;  %v2446_v38 = vmul.f32 %v9184_v23, %v2421_v21  ;;  %v2521_v36 = vrot.slane %v7774_v58, %v6203_v10  ;;  %v9198_v23 = vld [vmem:[#allocation68_spill] sm:$0xff] }
 0x28b   : > { %v2255_v16 = vmul.f32 %v9185_v9, %v2233_v37  ;;  %v2270_v43 = vadd.f32 %v9186_v63, %v2254_v44  ;;  %v2542_v26 = vmul.f32 %v9187_v34, %v2517_v49  ;;  %v2617_v22 = vrot.slane %v7774_v58, %v6214_v15 }
 0x28c   : > { %v2351_v31 = vmul.f32 %v9188_v4, %v2329_v24  ;;  %v2447_v17 = vmul.f32 %v9189_v29, %v2425_v20  ;;  %v2543_v52 = vmul.f32 %v9190_v56, %v2521_v36  ;;  %v2713_v0 = vrot.slane %v7774_v58, %v6253_v41  ;;  %v9202_v4 = vld [vmem:[#allocation78_spill] sm:$0xff] }
 0x28d   : > { %v9191_v53 = vunpack.c.h.bf16 %v7039_v3  ;;  %v2366_v14 = vadd.f32 %v2350_v61, %v2270_v43  ;;  %v9192_v21 = vunpack.i.l.bf16 %v7115_v35  ;;  %v9193_v37 = vunpack.i.h.bf16 %v7115_v35 }
 0x28e   : > { %v9194_v12 = vunpack.i.l.bf16 %v7167_v18  ;;  %v9195_v44 = vunpack.i.h.bf16 %v7167_v18  ;;  %v2809_v24 = vrot.slane %v7774_v58, %v6260_v11  ;;  %v2901_v3 = vrot.slane %v7764_v40, %v6282_v55 }
 0x28f   : > { %v2271_v47 = vadd.f32 %v9191_v53, %v2255_v16  ;;  %v2638_v49 = vmul.f32 %v9192_v21, %v2613_v46  ;;  %v2639_v62 = vmul.f32 %v9193_v37, %v2617_v22  ;;  %v2462_v45 = vadd.f32 %v2446_v38, %v2366_v14 }
 0x290   : > { %v2734_v50 = vmul.f32 %v9194_v12, %v2709_v6  ;;  %v2735_v19 = vmul.f32 %v9195_v44, %v2713_v0  ;;  %v9196_v61 = vunpack.i.l.bf16 %v7207_v5  ;;  %v2241_v35 = vrot.slane %v7767_v32, %v6179_v60 }
 0x291   : > { %v2367_v8 = vadd.f32 %v2351_v31, %v2271_v47  ;;  %v9197_v20 = vunpack.i.h.bf16 %v7207_v5  ;;  %v2905_v18 = vrot.slane %v7774_v58, %v6282_v55  ;;  %v9199_v36 = vunpack.i.l.bf16 %v9198_v23 }
 0x292   : > { %v2830_v46 = vmul.f32 %v9196_v61, %v2805_v27  ;;  %v2337_v16 = vrot.slane %v7767_v32, %v6171_v57  ;;  %v2558_v38 = vadd.f32 %v2542_v26, %v2462_v45  ;;  %v9200_v43 = vunpack.i.l.bf16 %v7247_v51  ;;  %v9210_v61 = vld [vmem:[#allocation79_spill] sm:$0xff] }
 0x293   : > { %v2831_v6 = vmul.f32 %v9197_v20, %v2809_v24  ;;  %v2256_v9 = vmul.f32 %v9199_v36, %v2237_v30  ;;  %v2463_v63 = vadd.f32 %v2447_v17, %v2367_v8  ;;  %v9201_v34 = vunpack.i.h.bf16 %v9198_v23 }
 0x294   : > { %v2926_v27 = vmul.f32 %v9200_v43, %v2901_v3  ;;  %v9203_v5 = vunpack.c.l.bf16 %v9202_v4  ;;  %v9204_v29 = vunpack.i.l.bf16 %v7027_v25  ;;  %v9205_v0 = vunpack.i.h.bf16 %v7027_v25 }
 0x295   : > { %v2257_v22 = vmul.f32 %v9201_v34, %v2241_v35  ;;  %v2433_v53 = vrot.slane %v7767_v32, %v6189_v2  ;;  %v2559_v17 = vadd.f32 %v2543_v52, %v2463_v63  ;;  %v2654_v26 = vadd.f32 %v2638_v49, %v2558_v38 }
 0x296   : > { %v2272_v31 = vadd.f32 %v9203_v5, %v2256_v9  ;;  %v2352_v56 = vmul.f32 %v9204_v29, %v2333_v28  ;;  %v2353_v30 = vmul.f32 %v9205_v0, %v2337_v16  ;;  %v9206_v47 = vunpack.c.h.bf16 %v9202_v4  ;;  %v9213_v16 = vld [vmem:[#allocation80_spill] sm:$0xff]  ;;  %v9216_v5 = vld [vmem:[#allocation81_spill] sm:$0xff] }
 0x297   : > { %v9207_v21 = vunpack.i.l.bf16 %v7045_v7  ;;  %v9208_v44 = vunpack.i.h.bf16 %v7045_v7  ;;  %v2525_v28 = vrot.slane %v7761_v54, %v6203_v10  ;;  %v2529_v25 = vrot.slane %v7767_v32, %v6203_v10 }
 0x298   : > { %v2273_v14 = vadd.f32 %v9206_v47, %v2257_v22  ;;  %v2368_v12 = vadd.f32 %v2352_v56, %v2272_v31  ;;  %v2655_v3 = vadd.f32 %v2639_v62, %v2559_v17  ;;  %v2750_v2 = vadd.f32 %v2734_v50, %v2654_v26  ;;  %v9219_v26 = vld [vmem:[#allocation82_spill] sm:$0xff] }
 0x299   : > { %v2448_v37 = vmul.f32 %v9207_v21, %v2429_v13  ;;  %v2449_v24 = vmul.f32 %v9208_v44, %v2433_v53  ;;  %v2621_v49 = vrot.slane %v7761_v54, %v6214_v15  ;;  %v9209_v8 = vunpack.i.h.bf16 %v7247_v51 }
 0x29a   : > { %v2369_v52 = vadd.f32 %v2353_v30, %v2273_v14  ;;  %v9211_v35 = vunpack.i.l.bf16 %v9210_v61  ;;  %v2625_v20 = vrot.slane %v7767_v32, %v6214_v15  ;;  %v2751_v23 = vadd.f32 %v2735_v19, %v2655_v3 }
 0x29b   : > { %v2927_v45 = vmul.f32 %v9209_v8, %v2905_v18  ;;  %v2464_v13 = vadd.f32 %v2448_v37, %v2368_v12  ;;  %v2846_v36 = vadd.f32 %v2830_v46, %v2750_v2  ;;  %v9212_v10 = vunpack.i.h.bf16 %v9210_v61 }
 0x29c   : > { %v2544_v7 = vmul.f32 %v9211_v35, %v2525_v28  ;;  %v2465_v9 = vadd.f32 %v2449_v24, %v2369_v52  ;;  %v9214_v63 = vunpack.i.l.bf16 %v9213_v16  ;;  %v2717_v51 = vrot.slane %v7761_v54, %v6253_v41  ;;  %v9222_v28 = vld [vmem:[#allocation83_spill] sm:$0xff] }
 0x29d   : > { %v2545_v62 = vmul.f32 %v9212_v10, %v2529_v25  ;;  %v2721_v18 = vrot.slane %v7767_v32, %v6253_v41  ;;  %v2847_v43 = vadd.f32 %v2831_v6, %v2751_v23  ;;  %v9215_v15 = vunpack.i.h.bf16 %v9213_v16 }
 0x29e   : > { %v2560_v50 = vadd.f32 %v2544_v7, %v2464_v13  ;;  %v2640_v38 = vmul.f32 %v9214_v63, %v2621_v49  ;;  %v2813_v46 = vrot.slane %v7761_v54, %v6260_v11  ;;  %v2942_v22 = vadd.f32 %v2926_v27, %v2846_v36  ;;  %v7914_v13 = vld [vmem:[%s8564_s5 + $0x1] ss:$0 sm:$0xff] }
 0x29f   : > { %v2561_v34 = vadd.f32 %v2545_v62, %v2465_v9  ;;  %v2641_v19 = vmul.f32 %v9215_v15, %v2625_v20  ;;  %v9217_v31 = vunpack.i.l.bf16 %v9216_v5  ;;  %v2817_v56 = vrot.slane %v7767_v32, %v6260_v11 }
 0x2a0   : > { %v2656_v4 = vadd.f32 %v2640_v38, %v2560_v50  ;;  %v2943_v0 = vadd.f32 %v2927_v45, %v2847_v43  ;;  %v9218_v41 = vunpack.i.h.bf16 %v9216_v5  ;;  %v2909_v53 = vrot.slane %v7761_v54, %v6282_v55  ;;  %v9226_v38 = vld [vmem:[#allocation84_spill] sm:$0xff] }
 0x2a1   : > { %v2736_v29 = vmul.f32 %v9217_v31, %v2717_v51  ;;  %v2657_v30 = vadd.f32 %v2641_v19, %v2561_v34  ;;  %v9220_v47 = vunpack.i.l.bf16 %v9219_v26  ;;  %v2913_v27 = vrot.slane %v7767_v32, %v6282_v55  ;;  %v9228_v34 = vld [vmem:[#allocation85_spill] sm:$0xff]  ;;  %v9229_v19 = vld [vmem:[#allocation87_spill] sm:$0xff] }
 0x2a2   : > { %v2737_v6 = vmul.f32 %v9218_v41, %v2721_v18  ;;  %v2952_v21 = vpack.c.bf16 %v2943_v0, %v2942_v22  ;;  %v9221_v12 = vunpack.i.h.bf16 %v9219_v26  ;;  %v9223_v25 = vunpack.i.l.bf16 %v9222_v28  ;;  %v9227_v18 = vld [vmem:[#allocation86_spill] sm:$0xff]  ;;  %v5477_v5 = vld [vmem:[%s8567_s8] ss:$8 sps:$4 sm:$0xff]   ;;  %v5479_v31 = vld [vmem:[%s8567_s8 + $0x4] ss:$8 sps:$4 sm:$0xff]  }
 0x2a3   : > { %v2752_v17 = vadd.f32 %v2736_v29, %v2656_v4  ;;  %v2832_v14 = vmul.f32 %v9220_v47, %v2813_v46  ;;  %v9224_v2 = vunpack.i.h.bf16 %v9222_v28  ;;  %v9225_v55 = vmov 0   ;;  %v5482_v29 = vld [vmem:[%s8567_s8 + $0x14] ss:$8 sps:$4 sm:$0xff]   ;;  %3400 = vmatprep.subr.bf16.mxu1 %v5479_v31  ;;  %v5480_v41 = vld [vmem:[%s8567_s8 + $0x10] ss:$8 sps:$4 sm:$0xff]   ;;  %v7956_v26 = vld [vmem:[%s7945_s26 + $0x8] sm:$0xff] }
 0x2a4   : > { %v2753_v37 = vadd.f32 %v2737_v6, %v2657_v30  ;;  %v2833_v11 = vmul.f32 %v9221_v12, %v2817_v56  ;;  %4992 = vmatprep.mubr.msk.bf16.mxu1 %vm2024_vm0, %v2952_v21  ;;  %v2928_v3 = vmul.f32 %v9223_v25, %v2909_v53  ;;  %v3569_v56 = vld [vmem:[%s8569_s10] sm:$0xff]  ;;  %3401 = vmatpush1.bf16.msra.mxu1 %v5477_v5  ;;  %v5488_v12 = vld [vmem:[%s8567_s8 + $0x30] ss:$8 sps:$4 sm:$0xff]  }
 0x2a5   : > { %v2848_v44 = vadd.f32 %v2832_v14, %v2752_v17  ;;  %v2929_v52 = vmul.f32 %v9224_v2, %v2913_v27  ;;  %v4672_v0 = vcombine.high %v3569_v56, %v3569_v56  ;;  %v4671_v30 = vcombine.low %v3569_v56, %v3569_v56  ;;  %3402 = vmatprep.subr.bf16.mxu1 %v5482_v29  ;;  %v5487_v53 = vld [vmem:[%s8567_s8 + $0x24] ss:$8 sps:$4 sm:$0xff]   ;;  %v5485_v17 = vld [vmem:[%s8567_s8 + $0x20] ss:$8 sps:$4 sm:$0xff]   ;;  %v5490_v14 = vld [vmem:[%s8567_s8 + $0x34] ss:$8 sps:$4 sm:$0xff]  }
 0x2a6   : > { %v2849_v24 = vadd.f32 %v2833_v11, %v2753_v37  ;;  %v3925_v47 = vpack.c.bf16 %v7956_v26, %v7956_v26  ;;  %v7964_v27 = vld [vmem:[%s7945_s26] sm:$0xff] }
 0x2a7   : > { %v2944_v49 = vadd.f32 %v2928_v3, %v2848_v44  ;;  %4673 = vmatprep.subr.msk.bf16.mxu0 %vm3612_vm1, %v4672_v0  ;;  %v3614_v6 = vsel %vm3612_vm1, %v4671_v30, 0  ;;  %v3924_v21 = vpack.c.bf16 %v7964_v27, %v7964_v27  ;;  %v5493_v44 = vld [vmem:[%s8567_s8 + $0x44] ss:$8 sps:$4 sm:$0xff]   ;;  %v5491_v2 = vld [vmem:[%s8567_s8 + $0x40] ss:$8 sps:$4 sm:$0xff]  }
 0x2a8   : > { %v2945_v8 = vadd.f32 %v2929_v52, %v2849_v24  ;;  %3403 = vmatpush1.bf16.msra.mxu1 %v5480_v41  ;;  %v3965_v37 = vunpack.c.l.b16 %v3925_v47 }
 0x2a9   : > { %3404 = vmatprep.subr.bf16.mxu1 %v5487_v53 }
 0x2aa   : > { %v2953_v45 = vpack.c.bf16 %v2945_v8, %v2944_v49 }
 0x2ac   : > { %4993 = vmatmul.mubr.msk.bf16.gmra.mrb[16].mxu1 %vm2024_vm0, %v2953_v45  ;;  %v3964_v45 = vunpack.c.l.b16 %v3924_v21 }
 0x2ad   : > { %3432 = vmatprep.mubr.bf16.mxu1 %v9225_v55  ;;  %3405 = vmatpush1.bf16.msra.mxu1 %v5485_v17 }
 0x2ae   : > { %3406 = vmatprep.subr.bf16.mxu1 %v5490_v14 }
 0x2b1   : > { %3407 = vmatpush1.bf16.msra.mxu1 %v5488_v12 }
 0x2b2   : > { %3408 = vmatprep.subr.bf16.mxu1 %v5493_v44 }
 0x2b5   : > { %3409 = vmatpush1.bf16.msra.mxu1 %v5491_v2  ;;  %v8032_v2 = vld [vmem:[%s7945_s26 + $0x28] sm:$0xff] }
 0x2fc   : > { %v4982_v61 = vpop.f32.mrb[4].mxu1 }
 0x2fd   : > { %v3046_v35 = vadd.f32 %v4982_v61, %v7914_v13  ;;  %v3037_v7 = vpop.f32.mrb[5].mxu1  ;;  %v3980_v61 = vrot.slane %v3965_v37, 7 }
 0x2fe   : > { %v3038_v20 = vadd.f32 %v7914_v13, %v3037_v7  ;;  %v4983_v23 = vpop.f32.mrb[6].mxu1  ;;  %v7984_v7 = vld [vmem:[%s7945_s26 + $0x18] sm:$0xff] }
 0x2ff   : > { %v3102_v36 = vmax.f32 %v3046_v35, 0.0  ;;  %v3049_v9 = vadd.f32 %v4983_v23, %v7914_v13  ;;  %v3040_v10 = vpop.f32.mrb[7].mxu1  ;;  %v7981_v35 = vld [vmem:[%s7945_s26 + $0x10] sm:$0xff] }
 0x300   : > { %v3100_v62 = vmax.f32 %v3038_v20, 0.0  ;;  %v3041_v50 = vadd.f32 %v7914_v13, %v3040_v10  ;;  %v5496_v10 = vld [vmem:[%s8567_s8 + $0x54] ss:$8 sps:$4 sm:$0xff]  }
 0x301   : > { %v3103_v16 = vmax.f32 %v3049_v9, 0.0  ;;  %v3118_v51 = vadd.f32 %v3102_v36, %v9226_v38  ;;  %v3926_v36 = vpack.c.bf16 %v7981_v35, %v7981_v35  ;;  %v3927_v9 = vpack.c.bf16 %v7984_v7, %v7984_v7  ;;  %3410 = vmatprep.subr.bf16.mxu1 %v5496_v10 }
 0x302   : > { %v3101_v63 = vmax.f32 %v3041_v50, 0.0  ;;  %v3116_v15 = vadd.f32 %v3100_v62, %v9228_v34  ;;  %v3982_v34 = vsel %vm3981_vm2, %v3980_v61, %v3964_v45 }
 0x303   : > { %v3119_v43 = vadd.f32 %v3103_v16, %v9227_v18  ;;  %v3967_v38 = vunpack.c.l.b16 %v3927_v9  ;;  %v8043_v9 = vld [vmem:[%s7945_s26 + $0x38] sm:$0xff] }
 0x304   : > { %v3117_v46 = vadd.f32 %v3101_v63, %v9229_v19  ;;  %v3966_v63 = vunpack.c.l.b16 %v3926_v36  ;;  %v9231_v19 = vld [vmem:[#allocation28_spill] sm:$0xff]  ;;  %v8040_v36 = vld [vmem:[%s7945_s26 + $0x30] sm:$0xff] }
 0x305   : > { %v3133_v22 = vpack.c.bf16 %v3119_v43, %v3118_v51  ;;  %v9230_v51 = vld [vmem:[#allocation21_spill] sm:$0xff] }
 0x306   : > { %v3132_v4 = vpack.c.bf16 %v3117_v46, %v3116_v15  ;;  %v5494_v15 = vld [vmem:[%s8567_s8 + $0x50] ss:$8 sps:$4 sm:$0xff]  }
 0x307   : > { %3411 = vmatpush1.bf16.msra.mxu1 %v5494_v15 }
 0x308   : > { %5000 = vmatprep.mubr.msk.bf16.mxu0 %vm2024_vm0, %v3132_v4  ;;  %v3986_v4 = vrot.slane %v3967_v38, 5 }
 0x309   : > { %5001 = vmatmul.mubr.msk.bf16.vlgmr.msra.gmra.mrb[12].mxu0 %vm2024_vm0, %v3133_v22  ;;  %v3983_v22 = vrot.slane %v3966_v63, 6 }
 0x30a   : > { %3620 = vmatpush1.bf16.msra.mxu0 %v3614_v6 }
 0x30b   : > { %v3985_v31 = vsel %vm3984_vm3, %v3983_v22, %v3982_v34 }
 0x321   : > { %v4986_v11 = vpop.f32.mrb[8].mxu1 }
 0x322   : > { %v3062_v24 = vadd.f32 %v4986_v11, %v7914_v13  ;;  %v3053_v28 = vpop.f32.mrb[9].mxu1 }
 0x323   : > { %v3054_v25 = vadd.f32 %v7914_v13, %v3053_v28  ;;  %v4987_v3 = vpop.f32.mrb[10].mxu1 }
 0x324   : > { %v3106_v52 = vmax.f32 %v3062_v24, 0.0  ;;  %v3065_v49 = vadd.f32 %v4987_v3, %v7914_v13  ;;  %v3056_v8 = vpop.f32.mrb[11].mxu1  ;;  %v5497_v3 = vld [vmem:[%s8567_s8 + $0x60] ss:$8 sps:$4 sm:$0xff]  }
 0x325   : > { %v3104_v20 = vmax.f32 %v3054_v25, 0.0  ;;  %v3057_v23 = vadd.f32 %v7914_v13, %v3056_v8 }
 0x326   : > { %v3107_v62 = vmax.f32 %v3065_v49, 0.0  ;;  %v3122_v50 = vadd.f32 %v3106_v52, %v7446_v39  ;;  %v3929_v49 = vpack.c.bf16 %v8032_v2, %v8032_v2 }
 0x327   : > { %v3105_v16 = vmax.f32 %v3057_v23, 0.0  ;;  %v3120_v18 = vadd.f32 %v3104_v20, %v9230_v51 }
 0x328   : > { %v3123_v43 = vadd.f32 %v3107_v62, %v7452_v59  ;;  %v3988_v59 = vsel %vm3987_vm4, %v3986_v4, %v3985_v31  ;;  %v3969_v45 = vunpack.c.l.b16 %v3929_v49  ;;  %v3930_v62 = vpack.c.bf16 %v8040_v36, %v8040_v36  ;;  %v3558_v49 = vld [vmem:[%s7945_s26 + $0x68] sm:$0xff] }
 0x329   : > { %v3121_v46 = vadd.f32 %v3105_v16, %v9231_v19 }
 0x32a   : > { %v3135_v39 = vpack.c.bf16 %v3123_v43, %v3122_v50  ;;  %v3992_v20 = vrot.slane %v3969_v45, 3  ;;  %v3931_v50 = vpack.c.bf16 %v8043_v9, %v8043_v9  ;;  %v3970_v16 = vunpack.c.l.b16 %v3930_v62 }
 0x32b   : > { %v3134_v5 = vpack.c.bf16 %v3121_v46, %v3120_v18 }
 0x32c   : > { %v3971_v63 = vunpack.c.l.b16 %v3931_v50  ;;  %v3995_v38 = vrot.slane %v3970_v16, 2 }
 0x32d   : > { %5004 = vmatprep.mubr.msk.bf16.mxu0 %vm2024_vm0, %v3134_v5 }
 0x32e   : > { %5005 = vmatmul.mubr.msk.bf16.gmra.mrb[16].mxu0 %vm2024_vm0, %v3135_v39  ;;  %v3998_v51 = vrot.slane %v3971_v63, 1 }
 0x34b   : > { %v4990_v29 = vpop.f32.mrb[12].mxu1 }
 0x34c   : > { %v3078_v56 = vadd.f32 %v4990_v29, %v7914_v13  ;;  %v3069_v0 = vpop.f32.mrb[13].mxu1 }
 0x34d   : > { %v3070_v30 = vadd.f32 %v7914_v13, %v3069_v0  ;;  %v4991_v41 = vpop.f32.mrb[14].mxu1 }
 0x34e   : > { %v3110_v6 = vmax.f32 %v3078_v56, 0.0  ;;  %v3081_v53 = vadd.f32 %v4991_v41, %v7914_v13  ;;  %v3072_v17 = vpop.f32.mrb[15].mxu1 }
 0x34f   : > { %v3108_v47 = vmax.f32 %v3070_v30, 0.0  ;;  %v3073_v14 = vadd.f32 %v7914_v13, %v3072_v17  ;;  %v3553_v17 = vld [vmem:[%s7945_s26 + $0x40] sm:$0xff] }
 0x350   : > { %v3111_v21 = vmax.f32 %v3081_v53, 0.0  ;;  %v3126_v12 = vadd.f32 %v3110_v6, %v7601_v1  ;;  %v5499_v1 = vld [vmem:[%s8567_s8 + $0x64] ss:$8 sps:$4 sm:$0xff]  }
 0x351   : > { %v3109_v37 = vmax.f32 %v3073_v14, 0.0  ;;  %v3124_v44 = vadd.f32 %v3108_v47, %v7604_v33  ;;  %3412 = vmatprep.subr.bf16.mxu1 %v5499_v1  ;;  %v5500_v33 = vld [vmem:[%s8567_s8 + $0x70] ss:$8 sps:$4 sm:$0xff]   ;;  %v3554_v47 = vld [vmem:[%s7945_s26 + $0x48] sm:$0xff]  ;;  %v3561_v1 = vpack.c.bf16 %v7956_v26, %v7964_v27  ;;  %v3564_v27 = vpack.c.bf16 %v8043_v9, %v8040_v36 }
 0x352   : > { %v3127_v11 = vadd.f32 %v3111_v21, %v7607_v42  ;;  %3413 = vmatpush1.bf16.msra.mxu1 %v5497_v3  ;;  %v5502_v42 = vld [vmem:[%s8567_s8 + $0x74] ss:$8 sps:$4 sm:$0xff]   ;;  %v3932_v21 = vpack.c.bf16 %v3553_v17, %v3553_v17 }
 0x353   : > { %v3125_v24 = vadd.f32 %v3109_v37, %v7614_v48  ;;  %3414 = vmatprep.subr.bf16.mxu1 %v5502_v42  ;;  %v8029_v48 = vld [vmem:[%s7945_s26 + $0x20] sm:$0xff]  ;;  %v3933_v37 = vpack.c.bf16 %v3554_v47, %v3554_v47 }
 0x354   : > { %v3137_v28 = vpack.c.bf16 %v3127_v11, %v3126_v12  ;;  %v3928_v52 = vpack.c.bf16 %v8029_v48, %v8029_v48  ;;  %v3555_v12 = vld [vmem:[%s7945_s26 + $0x50] sm:$0xff]  ;;  %v3556_v11 = vld [vmem:[%s7945_s26 + $0x58] sm:$0xff]  ;;  %v3563_v26 = vpack.c.bf16 %v8032_v2, %v8029_v48  ;;  %v3557_v2 = vld [vmem:[%s7945_s26 + $0x60] sm:$0xff] }
 0x355   : > { %v3136_v25 = vpack.c.bf16 %v3125_v24, %v3124_v44  ;;  %v3934_v44 = vpack.c.bf16 %v3555_v12, %v3555_v12  ;;  %v3972_v24 = vunpack.c.l.b16 %v3932_v21  ;;  %v3566_v48 = vpack.c.bf16 %v3556_v11, %v3555_v12 }
 0x356   : > { %3415 = vmatpush1.bf16.msra.mxu1 %v5500_v33  ;;  %v3968_v8 = vunpack.c.l.b16 %v3928_v52  ;;  %v3562_v52 = vpack.c.bf16 %v7984_v7, %v7981_v35  ;;  %v3565_v35 = vpack.c.bf16 %v3554_v47, %v3553_v17  ;;  %v5809_v7 = vmov 0.0  }
 0x357   : > { %5008 = vmatprep.mubr.msk.bf16.mxu0 %vm2024_vm0, %v3136_v25  ;;  %5016 = vmatprep.subr.bf16.mxu1 %v5809_v7  ;;  %v3936_v45 = vpack.c.bf16 %v3557_v2, %v3557_v2  ;;  %v3567_v16 = vpack.c.bf16 %v3558_v49, %v3557_v2  ;;  %v3570_v2 = vld [vmem:[%s8570_s11] sm:$0x3] }
 0x358   : > { %5009 = vmatmul.mubr.msk.bf16.gmra.mrb[20].mxu0 %vm2024_vm0, %v3137_v28  ;;  %v3989_v61 = vrot.slane %v3968_v8, 4  ;;  %v3559_v8 = vld [vmem:[%s7945_s26 + $0x70] sm:$0xff] }
 0x359   : > { %v3976_v9 = vunpack.c.l.b16 %v3936_v45 }
 0x35a   : > { %v3991_v23 = vsel %vm3990_vm5, %v3989_v61, %v3988_v59  ;;  %v3937_v61 = vpack.c.bf16 %v3558_v49, %v3558_v49 }
 0x35b   : > { %v3994_v10 = vsel %vm3993_vm6, %v3992_v20, %v3991_v23  ;;  %v3560_v20 = vld [vmem:[%s7945_s26 + $0x78] sm:$0xff]  ;;  %v3938_v23 = vpack.c.bf16 %v3559_v8, %v3559_v8  ;;  %v4007_v63 = vrot.slane %v3976_v9, 4  ;;  %s8413_s26 = scalar_lea.hbm %s8574_s15, %s4759_s17 }
 0x35c   : > { %v3997_v18 = vsel %vm3996_vm7, %v3995_v38, %v3994_v10  ;;  %v3939_v36 = vpack.c.bf16 %v3560_v20, %v3560_v20  ;;  %v3977_v10 = vunpack.c.l.b16 %v3937_v61  ;;  %v8178_v61 = vrot.slane %v3570_v2, %v6179_v60 }
 0x35d   : > { %v8052_v43 = vsel %vm3999_vm8, %v3998_v51, %v3997_v18  ;;  %v3978_v62 = vunpack.c.l.b16 %v3938_v23 }
 0x35e   : > { %v3979_v50 = vunpack.c.l.b16 %v3939_v36  ;;  %v4009_v38 = vrot.slane %v3977_v10, 3 }
 0x35f   : > { %v4011_v51 = vrot.slane %v3978_v62, 2 }
 0x360   : > { %v4013_v18 = vrot.slane %v3979_v50, 1 }
 0x37f   : > { %v4994_v34 = vpop.f32.mrb[16].mxu1 }
 0x380   : > { %v3094_v15 = vadd.f32 %v4994_v34, %v7914_v13  ;;  %v3085_v19 = vpop.f32.mrb[17].mxu1 }
 0x381   : > { %v3086_v46 = vadd.f32 %v7914_v13, %v3085_v19  ;;  %v4995_v22 = vpop.f32.mrb[18].mxu1 }
 0x382   : > { %v3114_v4 = vmax.f32 %v3094_v15, 0.0  ;;  %v3097_v39 = vadd.f32 %v4995_v22, %v7914_v13  ;;  %v3088_v5 = vpop.f32.mrb[19].mxu1 }
 0x383   : > { %v3112_v31 = vmax.f32 %v3086_v46, 0.0  ;;  %v3089_v59 = vadd.f32 %v7914_v13, %v3088_v5  ;;  %v3935_v13 = vpack.c.bf16 %v3556_v11, %v3556_v11  ;;  %v8108_v5 = vld [vmem:[#allocation2] ss:$0 sm:$0xff] }
 0x384   : > { %v3115_v29 = vmax.f32 %v3097_v39, 0.0  ;;  %v3130_v0 = vadd.f32 %v3114_v4, %v7761_v54  ;;  %v3973_v54 = vunpack.c.l.b16 %v3933_v37  ;;  %v3568_v4 = vpack.c.bf16 %v3560_v20, %v3559_v8 }
 0x385   : > { %v3113_v56 = vmax.f32 %v3089_v59, 0.0  ;;  %v3128_v41 = vadd.f32 %v3112_v31, %v7764_v40  ;;  %v3975_v40 = vunpack.c.l.b16 %v3935_v13 }
 0x386   : > { %v3131_v30 = vadd.f32 %v3115_v29, %v7767_v32  ;;  %v3974_v32 = vunpack.c.l.b16 %v3934_v44 }
 0x387   : > { %v3129_v6 = vadd.f32 %v3113_v56, %v7774_v58  ;;  %v4001_v58 = vrot.slane %v3973_v54, 7  ;;  %v4005_v25 = vrot.slane %v3975_v40, 5  ;;  %v3940_v56 = vld [vmem:[%s8571_s12] sm:$0xf] }
 0x388   : > { %v3139_v53 = vpack.c.bf16 %v3131_v30, %v3130_v0  ;;  %v4003_v28 = vrot.slane %v3974_v32, 6 }
 0x389   : > { %v3138_v14 = vpack.c.bf16 %v3129_v6, %v3128_v41  ;;  %v4002_v3 = vsel %vm3981_vm2, %v4001_v58, %v3972_v24  ;;  %v4020_v6 = vsel %vm3612_vm1, %v3940_v56, 0 }
 0x38a   : > { %v4004_v33 = vsel %vm3984_vm3, %v4003_v28, %v4002_v3 }
 0x38b   : > { %5012 = vmatprep.mubr.msk.bf16.mxu0 %vm2024_vm0, %v3138_v14  ;;  %v4006_v42 = vsel %vm3987_vm4, %v4005_v25, %v4004_v33 }
 0x38c   : > { %5013 = vmatmul.mubr.msk.bf16.gmra.mrb[24].mxu0 %vm2024_vm0, %v3139_v53  ;;  %v4008_v34 = vsel %vm3990_vm5, %v4007_v63, %v4006_v42 }
 0x38d   : > { %3651 = vmatprep.mubr.bf16.mxu0 %v9225_v55  ;;  %v4010_v15 = vsel %vm3993_vm6, %v4009_v38, %v4008_v34 }
 0x38e   : > { %v4012_v19 = vsel %vm3996_vm7, %v4011_v51, %v4010_v15 }
 0x38f   : > { %v8103_v46 = vsel %vm3999_vm8, %v4013_v18, %v4012_v19 }
 0x390   : > { %v4015_v22 = vpack.c.b16 %v8103_v46, %v8052_v43 }
 0x394   : > { %4674 = vmatmul.mubr.msk.bf16.vlgmr.msra.gmra.mrb[28].mxu0 %vm3587_vm9, %v3561_v1 }
 0x395   : > { %3661 = vmatprep.mubr.bf16.mxu0 %v9225_v55 }
 0x39c   : > { %4675 = vmatmul.mubr.msk.bf16.gmra.mrb[32].mxu0 %vm3587_vm9, %v3562_v52 }
 0x39d   : > { %3671 = vmatprep.mubr.bf16.mxu0 %v9225_v55 }
 0x3a4   : > { %4676 = vmatmul.mubr.msk.bf16.gmra.mrb[36].mxu0 %vm3587_vm9, %v3563_v26 }
 0x3a5   : > { %3681 = vmatprep.mubr.bf16.mxu0 %v9225_v55 }
 0x3ac   : > { %4677 = vmatmul.mubr.msk.bf16.gmra.mrb[40].mxu0 %vm3587_vm9, %v3564_v27 }
 0x3ad   : > { %3691 = vmatprep.mubr.bf16.mxu0 %v9225_v55 }
 0x3b4   : > { %4678 = vmatmul.mubr.msk.bf16.gmra.mrb[44].mxu0 %vm3587_vm9, %v3565_v35 }
 0x3b5   : > { %3701 = vmatprep.mubr.bf16.mxu0 %v9225_v55 }
 0x3bc   : > { %4679 = vmatmul.mubr.msk.bf16.gmra.mrb[48].mxu0 %vm3587_vm9, %v3566_v48 }
 0x3bd   : > { %3711 = vmatprep.mubr.bf16.mxu0 %v9225_v55 }
 0x3c4   : > { %4680 = vmatmul.mubr.msk.bf16.gmra.mrb[52].mxu0 %vm3587_vm9, %v3567_v16 }
 0x3c5   : > { %3721 = vmatprep.mubr.bf16.mxu0 %v9225_v55 }
 0x3cc   : > { %4681 = vmatmul.mubr.msk.bf16.gmra.mrb[56].mxu0 %vm3587_vm9, %v3568_v4 }
 0x3dc   : > { %v5002_v39 = vpop.f32.mrb[12].mxu0 }
 0x3dd   : > { %v3221_v31 = vpop.f32.mrb[13].mxu0  ;;  %v8127_v17 = vadd.f32 %v5002_v39, %v8108_v5 }
 0x3de   : > { %v5003_v59 = vpop.f32.mrb[14].mxu0  ;;  %v8114_v0 = vadd.f32 %v8108_v5, %v3221_v31 }
 0x3df   : > { %v3224_v29 = vpop.f32.mrb[15].mxu0  ;;  %v8124_v53 = vadd.f32 %v5003_v59, %v8108_v5 }
 0x3e0   : > { %v8117_v30 = vadd.f32 %v8108_v5, %v3224_v29 }
 0x3e1   : > { %v3285_v47 = vpack.c.bf16 %v8124_v53, %v8127_v17 }
 0x3e2   : > { %v3284_v41 = vpack.c.bf16 %v8117_v30, %v8114_v0 }
 0x3e4   : > { %3433 = vmatmul.mubr.bf16.vlgmr.msra.gmra.mrb[20].mxu1 %v3284_v41 }
 0x3e5   : > { %3442 = vmatprep.mubr.bf16.mxu1 %v9225_v55  ;;  %5017 = vmatpush3.bf16.msra.mxu1 %v4020_v6 }
 0x3ec   : > { %3443 = vmatmul.mubr.bf16.gmra.mrb[24].mxu1 %v3285_v47 }
 0x3ed   : > { %3452 = vmatprep.mubr.bf16.mxu1 %v9225_v55 }
 0x401   : > { %v5006_v14 = vpop.f32.mrb[16].mxu0 }
 0x402   : > { %v3237_v21 = vpop.f32.mrb[17].mxu0  ;;  %v8145_v54 = vadd.f32 %v5006_v14, %v8108_v5 }
 0x403   : > { %v5007_v37 = vpop.f32.mrb[18].mxu0  ;;  %v8133_v11 = vadd.f32 %v8108_v5, %v3237_v21 }
 0x404   : > { %v3240_v12 = vpop.f32.mrb[19].mxu0  ;;  %v8142_v24 = vadd.f32 %v5007_v37, %v8108_v5 }
 0x405   : > { %v8136_v44 = vadd.f32 %v8108_v5, %v3240_v12 }
 0x406   : > { %v3287_v32 = vpack.c.bf16 %v8142_v24, %v8145_v54 }
 0x407   : > { %v3286_v13 = vpack.c.bf16 %v8136_v44, %v8133_v11 }
 0x409   : > { %3453 = vmatmul.mubr.bf16.gmra.mrb[28].mxu1 %v3286_v13 }
 0x40a   : > { %3462 = vmatprep.mubr.bf16.mxu1 %v9225_v55 }
 0x411   : > { %3463 = vmatmul.mubr.bf16.gmra.mrb[32].mxu1 %v3287_v32 }
 0x412   : > { %3472 = vmatprep.mubr.bf16.mxu1 %v9225_v55 }
 0x42b   : > { %v5010_v40 = vpop.f32.mrb[20].mxu0 }
 0x42c   : > { %v3253_v58 = vpop.f32.mrb[21].mxu0  ;;  %v8163_v52 = vadd.f32 %v5010_v40, %v8108_v5 }
 0x42d   : > { %v5011_v28 = vpop.f32.mrb[22].mxu0  ;;  %v8151_v3 = vadd.f32 %v8108_v5, %v3253_v58  ;;  %v8236_v58 = vrot.slane %v3570_v2, %v6171_v57 }
 0x42e   : > { %v3256_v25 = vpop.f32.mrb[23].mxu0  ;;  %v8160_v42 = vadd.f32 %v5011_v28, %v8108_v5 }
 0x42f   : > { %v8154_v1 = vadd.f32 %v8108_v5, %v3256_v25 }
 0x430   : > { %v3289_v26 = vpack.c.bf16 %v8160_v42, %v8163_v52 }
 0x431   : > { %v3288_v33 = vpack.c.bf16 %v8154_v1, %v8151_v3 }
 0x433   : > { %3473 = vmatmul.mubr.bf16.gmra.mrb[36].mxu1 %v3288_v33 }
 0x434   : > { %3482 = vmatprep.mubr.bf16.mxu1 %v9225_v55 }
 0x43b   : > { %3483 = vmatmul.mubr.bf16.gmra.mrb[40].mxu1 %v3289_v26 }
 0x43c   : > { %3492 = vmatprep.mubr.bf16.mxu1 %v9225_v55 }
 0x45f   : > { %v5014_v27 = vpop.f32.mrb[24].mxu0 }
 0x460   : > { %v3269_v35 = vpop.f32.mrb[25].mxu0  ;;  %v8189_v63 = vadd.f32 %v5014_v27, %v8108_v5 }
 0x461   : > { %v5015_v48 = vpop.f32.mrb[26].mxu0  ;;  %v8172_v8 = vadd.f32 %v8108_v5, %v3269_v35 }
 0x462   : > { %v3272_v49 = vpop.f32.mrb[27].mxu0  ;;  %v8185_v10 = vadd.f32 %v5015_v48, %v8108_v5  ;;  %9235 = vst [vmem:[#allocation38_spill] sm:$0xff] %v8189_v63 }
 0x463   : > { %9232 = vst [vmem:[#allocation24_spill] sm:$0xff] %v8172_v8  ;;  %v8175_v45 = vadd.f32 %v8108_v5, %v3272_v49 }
 0x464   : > { %9234 = vst [vmem:[#allocation50_spill] sm:$0xff] %v8185_v10  ;;  %v3291_v38 = vpack.c.bf16 %v8185_v10, %v8189_v63 }
 0x465   : > { %9233 = vst [vmem:[#allocation26_spill] sm:$0xff] %v8175_v45  ;;  %v3290_v20 = vpack.c.bf16 %v8175_v45, %v8172_v8 }
 0x467   : > { %3493 = vmatmul.mubr.bf16.gmra.mrb[44].mxu1 %v3290_v20  ;;  %v3653_v23 = vpop.f32.mrb[28].mxu0 }
 0x468   : > { %3502 = vmatprep.mubr.bf16.mxu1 %v9225_v55  ;;  %v3654_v36 = vadd.f32 %v3653_v23, %v8178_v61  ;;  %v3655_v9 = vpop.f32.mrb[29].mxu0 }
 0x469   : > { %v3657_v62 = vpop.f32.mrb[30].mxu0  ;;  %v3656_v26 = vadd.f32 %v3655_v9, %v8236_v58 }
 0x46a   : > { %v3658_v50 = vadd.f32 %v3657_v62, %v8178_v61  ;;  %v3659_v16 = vpop.f32.mrb[31].mxu0  ;;  %v4682_v35 = vmul.f32 -1.442695, %v3654_v36 }
 0x46b   : > { %v3660_v27 = vadd.f32 %v3659_v16, %v8236_v58  ;;  %v4683_v48 = vmul.f32 -1.442695, %v3656_v26 }
 0x46c   : > { %v4684_v49 = vmul.f32 -1.442695, %v3658_v50  ;;  %5503 = vpow2.f32 %v4682_v35 }
 0x46d   : > { %v4685_v20 = vmul.f32 -1.442695, %v3660_v27  ;;  %5505 = vpow2.f32 %v4683_v48 }
 0x46e   : > { %5507 = vpow2.f32 %v4684_v49 }
 0x46f   : > { %3503 = vmatmul.mubr.bf16.gmra.mrb[48].mxu1 %v3291_v38  ;;  %v3663_v51 = vpop.f32.mrb[32].mxu0  ;;  %5509 = vpow2.f32 %v4685_v20 }
 0x470   : > { %5018 = vmatprep.mubr.msk.bf16.mxu1 %vm5810_vm10, %v5809_v7  ;;  %v3664_v55 = vadd.f32 %v3663_v51, %v8178_v61  ;;  %v3665_v18 = vpop.f32.mrb[33].mxu0 }
 0x471   : > { %v3667_v34 = vpop.f32.mrb[34].mxu0  ;;  %v3666_v23 = vadd.f32 %v3665_v18, %v8236_v58 }
 0x472   : > { %v3668_v15 = vadd.f32 %v3667_v34, %v8178_v61  ;;  %v3669_v19 = vpop.f32.mrb[35].mxu0  ;;  %v4686_v62 = vmul.f32 -1.442695, %v3664_v55 }
 0x473   : > { %v3670_v2 = vadd.f32 %v3669_v19, %v8236_v58  ;;  %v4687_v38 = vmul.f32 -1.442695, %v3666_v23  ;;  %v3308_v23 = vld [vmem:[#allocation5] sm:$0x3] }
 0x474   : > { %v4688_v51 = vmul.f32 -1.442695, %v3668_v15  ;;  %5511 = vpow2.f32 %v4686_v62 }
 0x475   : > { %v4689_v34 = vmul.f32 -1.442695, %v3670_v2  ;;  %5513 = vpow2.f32 %v4687_v38 }
 0x476   : > { %v5504_v16 = vpop.eup %5503  ;;  %5515 = vpow2.f32 %v4688_v51 }
 0x477   : > { %5019 = vmatmul.mubr.msk.bf16.vlgmr.msra.gmra.mrb[52].mxu1 %vm3587_vm9, %v4015_v22  ;;  %v3673_v4 = vpop.f32.mrb[36].mxu0  ;;  %v5506_v55 = vpop.eup %5505  ;;  %5517 = vpow2.f32 %v4689_v34  ;;  %v8268_v34 = vrot.slane %v3308_v23, %v6179_v60 }
 0x478   : > { %v8201_v39 = vadd.f32 %v3673_v4, %v8178_v61  ;;  %v8203_v5 = vpop.f32.mrb[37].mxu0  ;;  %v5508_v19 = vpop.eup %5507 }
 0x479   : > { %v3677_v31 = vpop.f32.mrb[38].mxu0  ;;  %v3830_v35 = vadd.f32 1.0, %v5508_v19 }
 0x47a   : > { %v8206_v7 = vadd.f32 %v3677_v31, %v8178_v61  ;;  %v8208_v59 = vpop.f32.mrb[39].mxu0  ;;  %v4690_v60 = vmul.f32 -1.442695, %v8201_v39 }
 0x47f   : > { %v3683_v29 = vpop.f32.mrb[40].mxu0 }
 0x480   : > { %v8211_v56 = vadd.f32 %v3683_v29, %v8178_v61  ;;  %v8213_v41 = vpop.f32.mrb[41].mxu0 }
 0x481   : > { %v3687_v43 = vpop.f32.mrb[42].mxu0 }
 0x482   : > { %v8216_v46 = vadd.f32 %v3687_v43, %v8178_v61  ;;  %v8218_v22 = vpop.f32.mrb[43].mxu0 }
 0x487   : > { %v3693_v6 = vpop.f32.mrb[44].mxu0 }
 0x488   : > { %v8221_v47 = vadd.f32 %v3693_v6, %v8178_v61  ;;  %v8223_v14 = vpop.f32.mrb[45].mxu0  ;;  %v5510_v6 = vpop.eup %5509 }
 0x489   : > { %v3697_v21 = vpop.f32.mrb[46].mxu0  ;;  %v3831_v48 = vadd.f32 1.0, %v5510_v6  ;;  %v5512_v49 = vpop.eup %5511 }
 0x48a   : > { %v8226_v37 = vadd.f32 %v3697_v21, %v8178_v61  ;;  %v8228_v12 = vpop.f32.mrb[47].mxu0  ;;  %v3828_v21 = vadd.f32 1.0, %v5504_v16  ;;  %v5514_v20 = vpop.eup %5513  ;;  %v3832_v38 = vadd.f32 1.0, %v5512_v49  ;;  %v4692_v49 = vmul.f32 -1.442695, %v8206_v7 }
 0x48b   : > { %v5516_v2 = vpop.eup %5515  ;;  %v3833_v51 = vadd.f32 1.0, %v5514_v20 }
 0x48c   : > { %5519 = vrcp.f32 %v3828_v21  ;;  %v5518_v62 = vpop.eup %5517 }
 0x48d   : > { %v3835_v16 = vadd.f32 1.0, %v5518_v62 }
 0x48f   : > { %v3703_v13 = vpop.f32.mrb[48].mxu0 }
 0x490   : > { %v8231_v32 = vadd.f32 %v3703_v13, %v8178_v61  ;;  %v8233_v40 = vpop.f32.mrb[49].mxu0 }
 0x491   : > { %v3707_v28 = vpop.f32.mrb[50].mxu0 }
 0x492   : > { %v8239_v25 = vadd.f32 %v3707_v28, %v8178_v61  ;;  %v8241_v33 = vpop.f32.mrb[51].mxu0  ;;  %v3829_v28 = vadd.f32 1.0, %v5506_v55 }
 0x494   : > { %5521 = vrcp.f32 %v3829_v28 }
 0x495   : > { %5523 = vrcp.f32 %v3830_v35 }
 0x496   : > { %5525 = vrcp.f32 %v3831_v48  ;;  %v5520_v21 = vpop.eup %5519 }
 0x497   : > { %v3713_v4 = vpop.f32.mrb[52].mxu0  ;;  %5527 = vrcp.f32 %v3832_v38 }
 0x498   : > { %v8248_v9 = vadd.f32 %v3713_v4, %v8178_v61  ;;  %v8250_v36 = vpop.f32.mrb[53].mxu0  ;;  %v8271_v4 = vrot.slane %v3308_v23, %v6171_v57  ;;  %5529 = vrcp.f32 %v3833_v51 }
 0x499   : > { %v3717_v50 = vpop.f32.mrb[54].mxu0 }
 0x49a   : > { %v8253_v18 = vadd.f32 %v3717_v50, %v8178_v61  ;;  %v8255_v31 = vpop.f32.mrb[55].mxu0  ;;  %v3676_v50 = vadd.f32 %v8203_v5, %v8236_v58 }
 0x49c   : > { %v4691_v28 = vmul.f32 -1.442695, %v3676_v50 }
 0x49e   : > { %v5522_v5 = vpop.eup %5521 }
 0x49f   : > { %v3723_v15 = vpop.f32.mrb[56].mxu0  ;;  %v5524_v20 = vpop.eup %5523 }
 0x4a0   : > { %v8258_v29 = vadd.f32 %v3723_v15, %v8178_v61  ;;  %v8260_v43 = vpop.f32.mrb[57].mxu0  ;;  %v3680_v15 = vadd.f32 %v8208_v59, %v8236_v58  ;;  %v5526_v62 = vpop.eup %5525 }
 0x4a1   : > { %v3727_v13 = vpop.f32.mrb[58].mxu0 }
 0x4a2   : > { %v8263_v26 = vadd.f32 %v3727_v13, %v8178_v61  ;;  %v8265_v27 = vpop.f32.mrb[59].mxu0  ;;  %v3834_v61 = vadd.f32 1.0, %v5516_v2  ;;  %v4693_v2 = vmul.f32 -1.442695, %v3680_v15  ;;  %v3690_v15 = vadd.f32 %v8218_v22, %v8236_v58 }
 0x4a4   : > { %5531 = vrcp.f32 %v3834_v61 }
 0x4a5   : > { %5533 = vrcp.f32 %v3835_v16  ;;  %v3686_v16 = vadd.f32 %v8213_v41, %v8236_v58 }
 0x4a6   : > { %5535 = vpow2.f32 %v4690_v60  ;;  %v4694_v60 = vmul.f32 -1.442695, %v8211_v56 }
 0x4a7   : > { %5537 = vpow2.f32 %v4691_v28  ;;  %v4695_v41 = vmul.f32 -1.442695, %v3686_v16 }
 0x4a8   : > { %5539 = vpow2.f32 %v4692_v49 }
 0x4a9   : > { %5541 = vpow2.f32 %v4693_v2 }
 0x4aa   : > { %5543 = vpow2.f32 %v4694_v60 }
 0x4ab   : > { %5545 = vpow2.f32 %v4695_v41 }
 0x4b7   : > { %v3434_v55 = vpop.f32.mrb[20].mxu1 }
 0x4b8   : > { %v3435_v19 = vadd.f32 %v3434_v55, %v8268_v34  ;;  %v3436_v6 = vpop.f32.mrb[21].mxu1 }
 0x4b9   : > { %v3437_v57 = vadd.f32 %v3436_v6, %v8271_v4  ;;  %v3438_v13 = vpop.f32.mrb[22].mxu1 }
 0x4ba   : > { %v3513_v35 = vmax.f32 %v3435_v19, 0.0  ;;  %v3439_v48 = vadd.f32 %v3438_v13, %v8268_v34  ;;  %v3440_v59 = vpop.f32.mrb[23].mxu1 }
 0x4bb   : > { %v3514_v23 = vmax.f32 %v3437_v57, 0.0  ;;  %v3441_v39 = vadd.f32 %v3440_v59, %v8271_v4  ;;  %v5528_v57 = vpop.eup %5527 }
 0x4bc   : > { %v8286_v38 = vmul.f32 %v5520_v21, %v3513_v35  ;;  %v3515_v51 = vmax.f32 %v3439_v48, 0.0  ;;  %v5530_v35 = vpop.eup %5529 }
 0x4bd   : > { %v4316_v61 = vmul.f32 %v5522_v5, %v3514_v23  ;;  %v3516_v50 = vmax.f32 %v3441_v39, 0.0  ;;  %v5532_v23 = vpop.eup %5531  ;;  %v4697_v39 = vmul.f32 -1.442695, %v3690_v15 }
 0x4be   : > { %v8291_v55 = vmul.f32 %v5524_v20, %v3515_v51  ;;  %v4696_v20 = vmul.f32 -1.442695, %v8216_v46  ;;  %v5534_v2 = vpop.eup %5533 }
 0x4bf   : > { %v4317_v7 = vmul.f32 %v5526_v62, %v3516_v50  ;;  %v3444_v19 = vpop.f32.mrb[24].mxu1  ;;  %v5536_v16 = vpop.eup %5535 }
 0x4c0   : > { %v3445_v6 = vadd.f32 %v3444_v19, %v8268_v34  ;;  %v3446_v21 = vpop.f32.mrb[25].mxu1  ;;  %5547 = vpow2.f32 %v4696_v20 }
 0x4c1   : > { %v4859_v13 = vpack.c.bf16 %v4317_v7, %v4316_v61  ;;  %v3447_v28 = vadd.f32 %v3446_v21, %v8271_v4  ;;  %v3448_v5 = vpop.f32.mrb[26].mxu1  ;;  %v5538_v7 = vpop.eup %5537  ;;  %5549 = vpow2.f32 %v4697_v39 }
 0x4c2   : > { %v3517_v48 = vmax.f32 %v3445_v6, 0.0  ;;  %v3449_v59 = vadd.f32 %v3448_v5, %v8268_v34  ;;  %v3450_v49 = vpop.f32.mrb[27].mxu1  ;;  %v5540_v6 = vpop.eup %5539 }
 0x4c3   : > { %4860 = vst [vmem:[%s8300_s20] sm:$0xff] %v4859_v13   ;;  %v3518_v22 = vmax.f32 %v3447_v28, 0.0  ;;  %v3451_v56 = vadd.f32 %v3450_v49, %v8271_v4  ;;  %v5542_v21 = vpop.eup %5541  ;;  %v3836_v13 = vadd.f32 1.0, %v5536_v16  ;;  %v3837_v28 = vadd.f32 1.0, %v5538_v7 }
 0x4c4   : > { %v8304_v62 = vmul.f32 %v5528_v57, %v3517_v48  ;;  %v3519_v51 = vmax.f32 %v3449_v59, 0.0  ;;  %v3838_v57 = vadd.f32 1.0, %v5540_v6  ;;  %v3839_v5 = vadd.f32 1.0, %v5542_v21  ;;  %v5544_v60 = vpop.eup %5543 }
 0x4c5   : > { %v4318_v61 = vmul.f32 %v5530_v35, %v3518_v22  ;;  %v3520_v50 = vmax.f32 %v3451_v56, 0.0  ;;  %5551 = vrcp.f32 %v3836_v13  ;;  %v5546_v35 = vpop.eup %5545  ;;  %v3840_v59 = vadd.f32 1.0, %v5544_v60 }
 0x4c6   : > { %v8306_v46 = vmul.f32 %v5532_v23, %v3519_v51  ;;  %5553 = vrcp.f32 %v3837_v28  ;;  %v3841_v49 = vadd.f32 1.0, %v5546_v35 }
 0x4c7   : > { %v4319_v19 = vmul.f32 %v5534_v2, %v3520_v50  ;;  %5555 = vrcp.f32 %v3838_v57 }
 0x4c8   : > { %5557 = vrcp.f32 %v3839_v5 }
 0x4c9   : > { %v4864_v15 = vpack.c.bf16 %v4319_v19, %v4318_v61  ;;  %5559 = vrcp.f32 %v3840_v59 }
 0x4ca   : > { %v5548_v41 = vpop.eup %5547  ;;  %5561 = vrcp.f32 %v3841_v49 }
 0x4cb   : > { %4917 = vst [vmem:[%s8300_s20 + $0x8] sm:$0xff] %v4864_v15   ;;  %v5550_v48 = vpop.eup %5549  ;;  %v3842_v20 = vadd.f32 1.0, %v5548_v41 }
 0x4cc   : > { %v3843_v23 = vadd.f32 1.0, %v5550_v48 }
 0x4cd   : > { %5563 = vrcp.f32 %v3842_v20 }
 0x4ce   : > { %5565 = vrcp.f32 %v3843_v23 }
 0x4cf   : > { %v5552_v2 = vpop.eup %5551 }
 0x4d0   : > { %v5554_v50 = vpop.eup %5553 }
 0x4d1   : > { %v5556_v6 = vpop.eup %5555 }
 0x4d2   : > { %v5558_v15 = vpop.eup %5557 }
 0x4d3   : > { %v5560_v20 = vpop.eup %5559 }
 0x4dc   : > { %v3454_v22 = vpop.f32.mrb[28].mxu1 }
 0x4dd   : > { %v3455_v56 = vadd.f32 %v3454_v22, %v8268_v34  ;;  %v3456_v39 = vpop.f32.mrb[29].mxu1 }
 0x4de   : > { %v3457_v51 = vadd.f32 %v3456_v39, %v8271_v4  ;;  %v3458_v61 = vpop.f32.mrb[30].mxu1  ;;  %v5562_v39 = vpop.eup %5561 }
 0x4df   : > { %v3521_v16 = vmax.f32 %v3455_v56, 0.0  ;;  %v3459_v7 = vadd.f32 %v3458_v61, %v8268_v34  ;;  %v3460_v19 = vpop.f32.mrb[31].mxu1 }
 0x4e0   : > { %v3522_v21 = vmax.f32 %v3457_v51, 0.0  ;;  %v3461_v13 = vadd.f32 %v3460_v19, %v8271_v4 }
 0x4e1   : > { %v8313_v28 = vmul.f32 %v5552_v2, %v3521_v16  ;;  %v3523_v57 = vmax.f32 %v3459_v7, 0.0 }
 0x4e2   : > { %v4320_v5 = vmul.f32 %v5554_v50, %v3522_v21  ;;  %v3524_v60 = vmax.f32 %v3461_v13, 0.0  ;;  %v5564_v50 = vpop.eup %5563 }
 0x4e3   : > { %v8315_v35 = vmul.f32 %v5556_v6, %v3523_v57  ;;  %v5566_v19 = vpop.eup %5565 }
 0x4e4   : > { %v4321_v41 = vmul.f32 %v5558_v15, %v3524_v60  ;;  %v3464_v48 = vpop.f32.mrb[32].mxu1 }
 0x4e5   : > { %v3465_v59 = vadd.f32 %v3464_v48, %v8268_v34  ;;  %v3466_v49 = vpop.f32.mrb[33].mxu1  ;;  %v3700_v48 = vadd.f32 %v8228_v12, %v8236_v58  ;;  %v4704_v12 = vmul.f32 -1.442695, %v8239_v25 }
 0x4e6   : > { %v4869_v23 = vpack.c.bf16 %v4321_v41, %v4320_v5  ;;  %v3467_v22 = vadd.f32 %v3466_v49, %v8271_v4  ;;  %v3468_v56 = vpop.f32.mrb[34].mxu1  ;;  %v3696_v41 = vadd.f32 %v8223_v14, %v8236_v58  ;;  %v3710_v14 = vadd.f32 %v8241_v33, %v8236_v58 }
 0x4e7   : > { %v3525_v51 = vmax.f32 %v3465_v59, 0.0  ;;  %v3469_v2 = vadd.f32 %v3468_v56, %v8268_v34  ;;  %v3470_v61 = vpop.f32.mrb[35].mxu1  ;;  %v4698_v59 = vmul.f32 -1.442695, %v8221_v47  ;;  %v4702_v56 = vmul.f32 -1.442695, %v8231_v32 }
 0x4e8   : > { %4918 = vst [vmem:[%s8300_s20 + $0x10] sm:$0xff] %v4869_v23   ;;  %v3526_v16 = vmax.f32 %v3467_v22, 0.0  ;;  %v3471_v7 = vadd.f32 %v3470_v61, %v8271_v4  ;;  %v4699_v49 = vmul.f32 -1.442695, %v3696_v41  ;;  %v4701_v23 = vmul.f32 -1.442695, %v3700_v48 }
 0x4e9   : > { %v8322_v6 = vmul.f32 %v5560_v20, %v3525_v51  ;;  %v3527_v21 = vmax.f32 %v3469_v2, 0.0  ;;  %v4700_v20 = vmul.f32 -1.442695, %v8226_v37  ;;  %5567 = vpow2.f32 %v4698_v59 }
 0x4ea   : > { %v4322_v13 = vmul.f32 %v5562_v39, %v3526_v16  ;;  %v3528_v15 = vmax.f32 %v3471_v7, 0.0  ;;  %5569 = vpow2.f32 %v4699_v49  ;;  %v3706_v22 = vadd.f32 %v8233_v40, %v8236_v58 }
 0x4eb   : > { %v8324_v57 = vmul.f32 %v5564_v50, %v3527_v21  ;;  %5571 = vpow2.f32 %v4700_v20  ;;  %v4705_v47 = vmul.f32 -1.442695, %v3710_v14 }
 0x4ec   : > { %v4323_v5 = vmul.f32 %v5566_v19, %v3528_v15  ;;  %5573 = vpow2.f32 %v4701_v23  ;;  %v4703_v39 = vmul.f32 -1.442695, %v3706_v22 }
 0x4ed   : > { %5575 = vpow2.f32 %v4702_v56 }
 0x4ee   : > { %v4874_v60 = vpack.c.bf16 %v4323_v5, %v4322_v13  ;;  %5577 = vpow2.f32 %v4703_v39 }
 0x4ef   : > { %5579 = vpow2.f32 %v4704_v12 }
 0x4f0   : > { %4919 = vst [vmem:[%s8300_s20 + $0x18] sm:$0xff] %v4874_v60   ;;  %5581 = vpow2.f32 %v4705_v47 }
 0x4f3   : > { %v5568_v37 = vpop.eup %5567 }
 0x4f4   : > { %v5570_v51 = vpop.eup %5569  ;;  %v3844_v40 = vadd.f32 1.0, %v5568_v37 }
 0x4f5   : > { %v5572_v2 = vpop.eup %5571  ;;  %v3845_v50 = vadd.f32 1.0, %v5570_v51 }
 0x4f6   : > { %v5574_v61 = vpop.eup %5573  ;;  %v3846_v16 = vadd.f32 1.0, %v5572_v2  ;;  %5583 = vrcp.f32 %v3844_v40 }
 0x4f7   : > { %v3847_v7 = vadd.f32 1.0, %v5574_v61  ;;  %v5576_v33 = vpop.eup %5575  ;;  %5585 = vrcp.f32 %v3845_v50 }
 0x4f8   : > { %v5578_v32 = vpop.eup %5577  ;;  %5587 = vrcp.f32 %v3846_v16  ;;  %v3848_v21 = vadd.f32 1.0, %v5576_v33 }
 0x4f9   : > { %v5580_v19 = vpop.eup %5579  ;;  %5589 = vrcp.f32 %v3847_v7  ;;  %v3849_v13 = vadd.f32 1.0, %v5578_v32 }
 0x4fa   : > { %v5582_v25 = vpop.eup %5581  ;;  %v3850_v15 = vadd.f32 1.0, %v5580_v19  ;;  %5591 = vrcp.f32 %v3848_v21 }
 0x4fb   : > { %v3851_v5 = vadd.f32 1.0, %v5582_v25  ;;  %5593 = vrcp.f32 %v3849_v13 }
 0x4fc   : > { %5595 = vrcp.f32 %v3850_v15 }
 0x4fd   : > { %5597 = vrcp.f32 %v3851_v5 }
 0x500   : > { %v5584_v59 = vpop.eup %5583 }
 0x501   : > { %v5586_v23 = vpop.eup %5585 }
 0x502   : > { %v5588_v39 = vpop.eup %5587 }
 0x503   : > { %v5590_v37 = vpop.eup %5589 }
 0x504   : > { %v5592_v19 = vpop.eup %5591 }
 0x505   : > { %v5594_v15 = vpop.eup %5593 }
 0x506   : > { %v3474_v60 = vpop.f32.mrb[36].mxu1 }
 0x507   : > { %v3475_v41 = vadd.f32 %v3474_v60, %v8268_v34  ;;  %v3476_v48 = vpop.f32.mrb[37].mxu1 }
 0x508   : > { %v3477_v49 = vadd.f32 %v3476_v48, %v8271_v4  ;;  %v3478_v20 = vpop.f32.mrb[38].mxu1  ;;  %v5596_v48 = vpop.eup %5595 }
 0x509   : > { %v3529_v22 = vmax.f32 %v3475_v41, 0.0  ;;  %v3479_v14 = vadd.f32 %v3478_v20, %v8268_v34  ;;  %v3480_v56 = vpop.f32.mrb[39].mxu1  ;;  %v5598_v20 = vpop.eup %5597 }
 0x50a   : > { %v3530_v12 = vmax.f32 %v3477_v49, 0.0  ;;  %v3481_v47 = vadd.f32 %v3480_v56, %v8271_v4 }
 0x50b   : > { %v8343_v51 = vmul.f32 %v5584_v59, %v3529_v22  ;;  %v3531_v2 = vmax.f32 %v3479_v14, 0.0 }
 0x50c   : > { %v4324_v61 = vmul.f32 %v5586_v23, %v3530_v12  ;;  %v3532_v40 = vmax.f32 %v3481_v47, 0.0 }
 0x50d   : > { %v8345_v50 = vmul.f32 %v5588_v39, %v3531_v2  ;;  %v3720_v2 = vadd.f32 %v8255_v31, %v8236_v58  ;;  %v4712_v31 = vmul.f32 -1.442695, %v8263_v26 }
 0x50e   : > { %v4325_v16 = vmul.f32 %v5590_v37, %v3532_v40  ;;  %v3484_v7 = vpop.f32.mrb[40].mxu1  ;;  %v3716_v37 = vadd.f32 %v8250_v36, %v8236_v58  ;;  %v4710_v36 = vmul.f32 -1.442695, %v8258_v29 }
 0x50f   : > { %v3485_v33 = vadd.f32 %v3484_v7, %v8268_v34  ;;  %v3486_v32 = vpop.f32.mrb[41].mxu1  ;;  %v4709_v7 = vmul.f32 -1.442695, %v3720_v2 }
 0x510   : > { %v4879_v25 = vpack.c.bf16 %v4325_v16, %v4324_v61  ;;  %v3487_v21 = vadd.f32 %v3486_v32, %v8271_v4  ;;  %v3488_v13 = vpop.f32.mrb[42].mxu1  ;;  %v4706_v61 = vmul.f32 -1.442695, %v8248_v9  ;;  %v4707_v40 = vmul.f32 -1.442695, %v3716_v37 }
 0x511   : > { %v3533_v5 = vmax.f32 %v3485_v33, 0.0  ;;  %v3489_v60 = vadd.f32 %v3488_v13, %v8268_v34  ;;  %v3490_v41 = vpop.f32.mrb[43].mxu1  ;;  %v4708_v16 = vmul.f32 -1.442695, %v8253_v18  ;;  %v3726_v33 = vadd.f32 %v8260_v43, %v8236_v58 }
 0x512   : > { %4920 = vst [vmem:[%s8300_s20 + $0x20] sm:$0xff] %v4879_v25   ;;  %v3534_v59 = vmax.f32 %v3487_v21, 0.0  ;;  %v3491_v49 = vadd.f32 %v3490_v41, %v8271_v4  ;;  %5599 = vpow2.f32 %v4706_v61  ;;  %v3730_v32 = vadd.f32 %v8265_v27, %v8236_v58 }
 0x513   : > { %v8352_v23 = vmul.f32 %v5592_v19, %v3533_v5  ;;  %v3535_v22 = vmax.f32 %v3489_v60, 0.0  ;;  %5601 = vpow2.f32 %v4707_v40  ;;  %v4711_v19 = vmul.f32 -1.442695, %v3726_v33 }
 0x514   : > { %v4326_v14 = vmul.f32 %v5594_v15, %v3534_v59  ;;  %v3536_v56 = vmax.f32 %v3491_v49, 0.0  ;;  %5603 = vpow2.f32 %v4708_v16  ;;  %v4713_v9 = vmul.f32 -1.442695, %v3730_v32 }
 0x515   : > { %v8354_v39 = vmul.f32 %v5596_v48, %v3535_v22  ;;  %5605 = vpow2.f32 %v4709_v7 }
 0x516   : > { %v4327_v12 = vmul.f32 %v5598_v20, %v3536_v56  ;;  %5607 = vpow2.f32 %v4710_v36 }
 0x517   : > { %5609 = vpow2.f32 %v4711_v19 }
 0x518   : > { %v4884_v47 = vpack.c.bf16 %v4327_v12, %v4326_v14  ;;  %5611 = vpow2.f32 %v4712_v31 }
 0x519   : > { %5613 = vpow2.f32 %v4713_v9 }
 0x51a   : > { %4921 = vst [vmem:[%s8300_s20 + $0x28] sm:$0xff] %v4884_v47  }
 0x51c   : > { %v5600_v18 = vpop.eup %5599 }
 0x51d   : > { %v5602_v25 = vpop.eup %5601  ;;  %v3852_v43 = vadd.f32 1.0, %v5600_v18 }
 0x51e   : > { %v5604_v21 = vpop.eup %5603  ;;  %v3853_v15 = vadd.f32 1.0, %v5602_v25  ;;  %v4139_v25 = vrot.slane %v8286_v38, 4 }
 0x51f   : > { %v5606_v13 = vpop.eup %5605  ;;  %v3854_v5 = vadd.f32 1.0, %v5604_v21  ;;  %5615 = vrcp.f32 %v3852_v43  ;;  %v4145_v21 = vrot.slane %v8291_v55, 4 }
 0x520   : > { %v3855_v60 = vadd.f32 1.0, %v5606_v13  ;;  %v5608_v58 = vpop.eup %5607  ;;  %5617 = vrcp.f32 %v3853_v15 }
 0x521   : > { %v5610_v29 = vpop.eup %5609  ;;  %5619 = vrcp.f32 %v3854_v5  ;;  %v3856_v41 = vadd.f32 1.0, %v5608_v58 }
 0x522   : > { %v5612_v27 = vpop.eup %5611  ;;  %5621 = vrcp.f32 %v3855_v60  ;;  %v3857_v48 = vadd.f32 1.0, %v5610_v29 }
 0x523   : > { %v5614_v26 = vpop.eup %5613  ;;  %v3858_v59 = vadd.f32 1.0, %v5612_v27  ;;  %5623 = vrcp.f32 %v3856_v41 }
 0x524   : > { %v3859_v49 = vadd.f32 1.0, %v5614_v26  ;;  %5625 = vrcp.f32 %v3857_v48 }
 0x525   : > { %5627 = vrcp.f32 %v3858_v59 }
 0x526   : > { %5629 = vrcp.f32 %v3859_v49 }
 0x529   : > { %v5616_v56 = vpop.eup %5615 }
 0x52a   : > { %v5618_v37 = vpop.eup %5617 }
 0x52b   : > { %v5620_v16 = vpop.eup %5619 }
 0x52c   : > { %v5622_v32 = vpop.eup %5621 }
 0x52d   : > { %v5624_v60 = vpop.eup %5623 }
 0x52e   : > { %v5626_v26 = vpop.eup %5625 }
 0x52f   : > { %v5628_v49 = vpop.eup %5627 }
 0x53a   : > { %v3494_v20 = vpop.f32.mrb[44].mxu1 }
 0x53b   : > { %v3495_v22 = vadd.f32 %v3494_v20, %v8268_v34  ;;  %v3496_v14 = vpop.f32.mrb[45].mxu1  ;;  %v8383_v20 = vadd.f32 %v4139_v25, %v8286_v38  ;;  %v4169_v25 = vrot.slane %v8315_v35, 4 }
 0x53c   : > { %v3497_v12 = vadd.f32 %v3496_v14, %v8271_v4  ;;  %v3498_v47 = vpop.f32.mrb[46].mxu1 }
 0x53d   : > { %v3537_v2 = vmax.f32 %v3495_v22, 0.0  ;;  %v3499_v61 = vadd.f32 %v3498_v47, %v8268_v34  ;;  %v3500_v40 = vpop.f32.mrb[47].mxu1  ;;  %v8386_v22 = vadd.f32 %v4145_v21, %v8291_v55  ;;  %v4151_v47 = vrot.slane %v8304_v62, 4  ;;  %v4714_v55 = vld [vmem:[%s8572_s13] ss:$0 sm:$0xff] }
 0x53e   : > { %v3538_v7 = vmax.f32 %v3497_v12, 0.0  ;;  %v3501_v33 = vadd.f32 %v3500_v40, %v8271_v4  ;;  %v5630_v12 = vpop.eup %5629  ;;  %v4175_v21 = vrot.slane %v8322_v6, 4 }
 0x53f   : > { %v8373_v36 = vmul.f32 %v5616_v56, %v3537_v2  ;;  %v3539_v19 = vmax.f32 %v3499_v61, 0.0 }
 0x540   : > { %v4328_v31 = vmul.f32 %v5618_v37, %v3538_v7  ;;  %v3540_v9 = vmax.f32 %v3501_v33, 0.0  ;;  %v4157_v37 = vrot.slane %v8306_v46, 4  ;;  %v4147_v33 = vrot.slane %v8386_v22, 2 }
 0x541   : > { %v8375_v18 = vmul.f32 %v5620_v16, %v3539_v19 }
 0x542   : > { %v4329_v13 = vmul.f32 %v5622_v32, %v3540_v9  ;;  %v3504_v43 = vpop.f32.mrb[48].mxu1  ;;  %v8404_v32 = vadd.f32 %v4151_v47, %v8304_v62  ;;  %v8407_v19 = vadd.f32 %v4157_v37, %v8306_v46 }
 0x543   : > { %v3505_v15 = vadd.f32 %v3504_v43, %v8268_v34  ;;  %v3506_v5 = vpop.f32.mrb[49].mxu1  ;;  %v4181_v43 = vrot.slane %v8324_v57, 4 }
 0x544   : > { %v4889_v58 = vpack.c.bf16 %v4329_v13, %v4328_v31  ;;  %v3507_v29 = vadd.f32 %v3506_v5, %v8271_v4  ;;  %v3508_v27 = vpop.f32.mrb[50].mxu1  ;;  %v4163_v31 = vrot.slane %v8313_v28, 4  ;;  %v4193_v5 = vrot.slane %v8345_v50, 4 }
 0x545   : > { %v3541_v41 = vmax.f32 %v3505_v15, 0.0  ;;  %v3509_v48 = vadd.f32 %v3508_v27, %v8268_v34  ;;  %v3510_v59 = vpop.f32.mrb[51].mxu1  ;;  %v4187_v15 = vrot.slane %v8343_v51, 4  ;;  %v4211_v27 = vrot.slane %v8373_v36, 4 }
 0x546   : > { %4922 = vst [vmem:[%s8300_s20 + $0x30] sm:$0xff] %v4889_v58   ;;  %v3542_v14 = vmax.f32 %v3507_v29, 0.0  ;;  %v3511_v56 = vadd.f32 %v3510_v59, %v8271_v4  ;;  %v4141_v4 = vrot.slane %v8383_v20, 2  ;;  %v4205_v29 = vrot.slane %v8354_v39, 4 }
 0x547   : > { %v8392_v2 = vmul.f32 %v5624_v60, %v3541_v41  ;;  %v3543_v34 = vmax.f32 %v3509_v48, 0.0  ;;  %v4199_v60 = vrot.slane %v8352_v23, 4  ;;  %v8427_v48 = vadd.f32 %v4163_v31, %v8313_v28 }
 0x548   : > { %v4330_v61 = vmul.f32 %v5626_v26, %v3542_v14  ;;  %v3544_v40 = vmax.f32 %v3511_v56, 0.0  ;;  %v4217_v59 = vrot.slane %v8375_v18, 4 }
 0x549   : > { %v8396_v38 = vmul.f32 %v5628_v49, %v3543_v34  ;;  %v4223_v49 = vrot.slane %v8392_v2, 4 }
 0x54a   : > { %v4331_v16 = vmul.f32 %v5630_v12, %v3544_v40  ;;  %v4056_v7 = vpop.f32.mrb[52].mxu1 }
 0x54b   : > { %v5020_v9 = vpop.f32.mrb[53].mxu1  ;;  %v4057_v13 = vadd.f32 %v4714_v55, %v4056_v7  ;;  %v4229_v14 = vrot.slane %v8396_v38, 4 }
 0x54c   : > { %v4894_v62 = vpack.c.bf16 %v4331_v16, %v4330_v61  ;;  %v4059_v46 = vpop.f32.mrb[54].mxu1 }
 0x54d   : > { %v5021_v58 = vpop.f32.mrb[55].mxu1  ;;  %v4716_v26 = vmul.f32 -1.442695, %v4057_v13  ;;  %v4060_v41 = vadd.f32 %v4714_v55, %v4059_v46 }
 0x54e   : > { %4923 = vst [vmem:[%s8300_s20 + $0x38] sm:$0xff] %v4894_v62   ;;  %s5701_s20 = scalar_lea.vmem %s5700_s23, 2048 }
 0x54f   : > { %p5703_p7 = scmp.lt.s32.totalorder %s5701_s20, %s5695_s29 }
 0x551   : > { %p5704_p8 = por %p5703_p7, %p5702_p4 }
 0x553   : > { %p5705_p11 = pnand %p5704_p8, %p5698_p3 }
 0x555   : > { %5708 = shalt.err (!%p5705_p11)
}
 0x556   : > { %s5709_s17 = scalar_lea.hbm %s8413_s26, 1024  ;;  %s5713_s18 = scalar_lea.hbm %s8574_s15, 2048 }
 0x557   : > { %p5710_p13 = scmp.ne.s32.totalorder %s8413_s26, %s5709_s17  ;;  %p5714_p5 = scmp.lt.u32.totalorder %s8413_s26, %s8574_s15 }
 0x558   : > { %p5715_p9 = scmp.lt.u32.totalorder %s5713_s18, %s5709_s17  ;;  %p5717_p10 = scmp.lt.u32.totalorder %s5709_s17, %s8413_s26 }
 0x559   : > { %p5711_p6 = pnand %p5710_p13, %p9236_p1 }
 0x55a   : > { %p5716_p12 = por %p5715_p9, %p5714_p5 }
 0x55b   : > { %p5712_p0 = pneg %p5711_p6 }
 0x55c   : > { %p5718_p2 = por %p5717_p10, %p5716_p12 }
 0x55e   : > { %p5719_p3 = pnand %p5718_p2, %p5712_p0 }
 0x560   : > { %5722 = shalt.err (!%p5719_p3)
}
 0x561   : > { %s5812_s29 = smov 64   ;;  %s5813_s23 = smov 4   ;;  %v4170_v28 = vadd.f32 %v4169_v25, %v8315_v35  ;;  %v4176_v56 = vadd.f32 %v4175_v21, %v8322_v6  ;;  %5631 = vpow2.f32 %v4716_v26  ;;  %v4717_v12 = vmul.f32 -1.442695, %v4060_v41 }
 0x562   : > { %5035 = dma.vmem_to_hbm [thread:$0]  (%p9236_p1), %s8415_s14, 1024, %s8413_s26, %s4418_s24, %s5812_s29, %s5812_s29, %s5813_s23   ;;  %v4153_v47 = vrot.slane %v8404_v32, 2  ;;  %v4182_v37 = vadd.f32 %v4181_v43, %v8324_v57  ;;  %v4188_v34 = vadd.f32 %v4187_v15, %v8343_v51  ;;  %v4194_v61 = vadd.f32 %v4193_v5, %v8345_v50 }
 0x563   : > { %v4200_v40 = vadd.f32 %v4199_v60, %v8352_v23  ;;  %v4206_v55 = vadd.f32 %v4205_v29, %v8354_v39  ;;  %v4212_v16 = vadd.f32 %v4211_v27, %v8373_v36  ;;  %5633 = vpow2.f32 %v4717_v12  ;;  %s4607_s14 = sshll.u32 %s8282_s21, 4  ;;  %s4758_s26 = sshll.u32 %s5918_s22, 8 }
 0x564   : > { %v4142_v35 = vadd.f32 %v4141_v4, %v8383_v20  ;;  %v4218_v6 = vadd.f32 %v4217_v59, %v8375_v18  ;;  %v4224_v7 = vadd.f32 %v4223_v49, %v8392_v2  ;;  %v4230_v57 = vadd.f32 %v4229_v14, %v8396_v38  ;;  %s566_s24 = scalar_lea.vmem [#allocation7], %s4607_s14  ;;  %s9241_s27 = sld [smem:[#allocation88_spill]] }
 0x565   : > { %v4159_v51 = vrot.slane %v8407_v19, 2  ;;  %v4165_v50 = vrot.slane %v8427_v48, 2  ;;  %v4171_v23 = vrot.slane %v4170_v28, 2  ;;  %v4177_v31 = vrot.slane %v4176_v56, 2  ;;  %s4431_s20 = sshll.u32 %s566_s24, 4  ;;  %s4413_s18 = scalar_lea.sflag [#allocation4], %s8282_s21  ;;  %s8514_s20 = int_to_ptr.vmem [resolvable:$true] %s4431_s20 }
 0x566   : > { %v4148_v39 = vadd.f32 %v4147_v33, %v8386_v22  ;;  %v4154_v36 = vadd.f32 %v4153_v47, %v8404_v32  ;;  %v4183_v9 = vrot.slane %v4182_v37, 2  ;;  %v4189_v20 = vrot.slane %v4188_v34, 2  ;;  %s5723_s30 = scalar_lea.vmem %s8514_s20, 256  ;;  %s5814_s16 = smov [#allocation7]  }
 0x567   : > { %v4195_v4 = vrot.slane %v4194_v61, 2  ;;  %v4201_v18 = vrot.slane %v4200_v40, 2  ;;  %v4207_v25 = vrot.slane %v4206_v55, 2  ;;  %v4213_v2 = vrot.slane %v4212_v16, 2  ;;  %p5724_p4 = scmp.ne.s32.totalorder %s8514_s20, %s5723_s30  ;;  %s5727_s29 = sshll.u32 %s5814_s16, 4  ;;  %s5728_s29 = int_to_ptr.vmem [resolvable:$false] %s5727_s29 }
 0x568   : > { %v4143_v21 = vrot.slane %v4142_v35, 1  ;;  %v4219_v38 = vrot.slane %v4218_v6, 2  ;;  %v4225_v62 = vrot.slane %v4224_v7, 2  ;;  %v4231_v13 = vrot.slane %v4230_v57, 2  ;;  %s5729_s23 = scalar_lea.vmem %s5728_s29, 512  ;;  %p5730_p11 = scmp.lt.s32.totalorder %s8514_s20, %s5728_s29 }
 0x569   : > { %v4160_v46 = vadd.f32 %v4159_v51, %v8407_v19  ;;  %v4166_v43 = vadd.f32 %v4165_v50, %v8427_v48  ;;  %v4172_v15 = vadd.f32 %v4171_v23, %v4170_v28  ;;  %v4178_v5 = vadd.f32 %v4177_v31, %v4176_v56  ;;  %p5725_p7 = pnand %p5724_p4, %p9236_p1  ;;  %p5731_p13 = scmp.lt.s32.totalorder %s5729_s23, %s5723_s30 }
 0x56a   : > { %v4149_v60 = vrot.slane %v4148_v39, 1  ;;  %v4155_v22 = vrot.slane %v4154_v36, 1  ;;  %v4184_v33 = vadd.f32 %v4183_v9, %v4182_v37  ;;  %v4190_v32 = vadd.f32 %v4189_v20, %v4188_v34  ;;  %s8512_s25 = scalar_lea.hbm %s9241_s27, %s4758_s26 }
 0x56b   : > { %v5632_v58 = vpop.eup %5631  ;;  %v4196_v29 = vadd.f32 %v4195_v4, %v4194_v61  ;;  %v4202_v27 = vadd.f32 %v4201_v18, %v4200_v40  ;;  %v4208_v26 = vadd.f32 %v4207_v25, %v4206_v55  ;;  %v4214_v41 = vadd.f32 %v4213_v2, %v4212_v16  ;;  %p5726_p8 = pneg %p5725_p7  ;;  %p5732_p6 = por %p5731_p13, %p5730_p11 }
 0x56c   : > { %v4220_v59 = vadd.f32 %v4219_v38, %v4218_v6  ;;  %v4226_v49 = vadd.f32 %v4225_v62, %v4224_v7  ;;  %v4232_v14 = vadd.f32 %v4231_v13, %v4230_v57  ;;  %v4069_v12 = vadd.f32 1.0, %v5632_v58 }
 0x56d   : > { %v5634_v47 = vpop.eup %5633  ;;  %v4161_v10 = vrot.slane %v4160_v46, 1  ;;  %v4167_v19 = vrot.slane %v4166_v43, 1  ;;  %v4173_v51 = vrot.slane %v4172_v15, 1  ;;  %v4179_v48 = vrot.slane %v4178_v5, 1  ;;  %p5733_p0 = pnand %p5732_p6, %p5726_p8 }
 0x56e   : > { %v4185_v28 = vrot.slane %v4184_v33, 1  ;;  %v4191_v56 = vrot.slane %v4190_v32, 1  ;;  %5635 = vrcp.f32 %v4069_v12  ;;  %v4070_v50 = vadd.f32 1.0, %v5634_v47 }
 0x56f   : > { %v4197_v37 = vrot.slane %v4196_v29, 1  ;;  %v4203_v34 = vrot.slane %v4202_v27, 1  ;;  %v4209_v23 = vrot.slane %v4208_v26, 1  ;;  %v4215_v61 = vrot.slane %v4214_v41, 1 }
 0x570   : > { %v4221_v40 = vrot.slane %v4220_v59, 1  ;;  %v4227_v55 = vrot.slane %v4226_v49, 1  ;;  %v4233_v16 = vrot.slane %v4232_v14, 1  ;;  %5637 = vrcp.f32 %v4070_v50 }
 0x571   : > { %v4144_v6 = vadd.f32 %v4143_v21, %v4142_v35  ;;  %v4150_v7 = vadd.f32 %v4149_v60, %v4148_v39  ;;  %v4156_v57 = vadd.f32 %v4155_v22, %v4154_v36  ;;  %v4162_v31 = vadd.f32 %v4161_v10, %v4160_v46 }
 0x572   : > { %v4168_v9 = vadd.f32 %v4167_v19, %v4166_v43  ;;  %v4174_v20 = vadd.f32 %v4173_v51, %v4172_v15  ;;  %v4180_v4 = vadd.f32 %v4179_v48, %v4178_v5  ;;  %v4186_v18 = vadd.f32 %v4185_v28, %v4184_v33 }
 0x573   : > { %v4192_v25 = vadd.f32 %v4191_v56, %v4190_v32  ;;  %v4198_v2 = vadd.f32 %v4197_v37, %v4196_v29  ;;  %v4204_v38 = vadd.f32 %v4203_v34, %v4202_v27  ;;  %v4210_v62 = vadd.f32 %v4209_v23, %v4208_v26 }
 0x574   : > { %v4216_v13 = vadd.f32 %v4215_v61, %v4214_v41  ;;  %v4222_v58 = vadd.f32 %v4221_v40, %v4220_v59  ;;  %v4228_v12 = vadd.f32 %v4227_v55, %v4226_v49  ;;  %v4234_v47 = vadd.f32 %v4233_v16, %v4232_v14 }
 0x575   : > { %v4236_v63 = vmul.f32 0.125, %v4144_v6  ;;  %v4237_v45 = vmul.f32 0.125, %v4150_v7  ;;  %v4238_v8 = vmul.f32 0.125, %v4156_v57  ;;  %v4239_v50 = vmul.f32 0.125, %v4162_v31 }
 0x576   : > { %v4240_v35 = vmul.f32 0.125, %v4168_v9  ;;  %v4241_v39 = vmul.f32 0.125, %v4174_v20  ;;  %v4242_v36 = vmul.f32 0.125, %v4180_v4  ;;  %v4243_v10 = vmul.f32 0.125, %v4186_v18 }
 0x577   : > { %v4244_v21 = vmul.f32 0.125, %v4192_v25  ;;  %v4245_v46 = vmul.f32 0.125, %v4198_v2  ;;  %v4246_v43 = vmul.f32 0.125, %v4204_v38  ;;  %v4247_v15 = vmul.f32 0.125, %v4210_v62 }
 0x578   : > { %v5636_v5 = vpop.eup %5635  ;;  %v4248_v60 = vmul.f32 0.125, %v4216_v13  ;;  %v4249_v22 = vmul.f32 0.125, %v4222_v58  ;;  %v4250_v33 = vmul.f32 0.125, %v4228_v12  ;;  %v4251_v32 = vmul.f32 0.125, %v4234_v47 }
 0x579   : > { %v4077_v29 = vrot.slane %v5636_v5, 1  ;;  %v4078_v27 = vrot.slane %v5636_v5, 2  ;;  %v4079_v26 = vrot.slane %v5636_v5, 3  ;;  %v4080_v41 = vrot.slane %v5636_v5, 4 }
 0x57a   : > { %v5638_v59 = vpop.eup %5637  ;;  %v4081_v49 = vrot.slane %v5636_v5, 5  ;;  %v4082_v14 = vrot.slane %v5636_v5, 6  ;;  %v4083_v19 = vrot.slane %v5636_v5, 7  ;;  %v4107_v51 = vmul.f32 %v5636_v5, %v8114_v0 }
 0x57b   : > { %v4084_v48 = vrot.slane %v5638_v59, 1  ;;  %v4085_v28 = vrot.slane %v5638_v59, 2  ;;  %v4086_v56 = vrot.slane %v5638_v59, 3  ;;  %v4087_v37 = vrot.slane %v5638_v59, 4 }
 0x57c   : > { %v4088_v34 = vrot.slane %v5638_v59, 5  ;;  %v4089_v23 = vrot.slane %v5638_v59, 6  ;;  %v4090_v61 = vrot.slane %v5638_v59, 7  ;;  %v4108_v40 = vmul.f32 %v4077_v29, %v8117_v30 }
 0x57d   : > { %v4109_v55 = vmul.f32 %v4078_v27, %v8127_v17  ;;  %v4110_v16 = vmul.f32 %v4079_v26, %v8124_v53  ;;  %v4111_v6 = vmul.f32 %v4080_v41, %v8133_v11  ;;  %v4112_v7 = vmul.f32 %v4081_v49, %v8136_v44  ;;  %v9237_v17 = vld [vmem:[#allocation24_spill] sm:$0xff]  ;;  %v9238_v53 = vld [vmem:[#allocation26_spill] sm:$0xff] }
 0x57e   : > { %v4113_v57 = vmul.f32 %v4082_v14, %v8145_v54  ;;  %v4114_v0 = vmul.f32 %v4083_v19, %v8142_v24  ;;  %v4115_v31 = vmul.f32 %v5638_v59, %v8151_v3  ;;  %v4116_v9 = vmul.f32 %v4084_v48, %v8154_v1  ;;  %v9239_v11 = vld [vmem:[#allocation38_spill] sm:$0xff] }
 0x57f   : > { %v4117_v20 = vmul.f32 %v4085_v28, %v8163_v52  ;;  %v4118_v30 = vmul.f32 %v4086_v56, %v8160_v42  ;;  %v4119_v4 = vmul.f32 %v4087_v37, %v9237_v17  ;;  %v4120_v18 = vmul.f32 %v4088_v34, %v9238_v53  ;;  %v9240_v44 = vld [vmem:[#allocation50_spill] sm:$0xff] }
 0x580   : > { %v4121_v25 = vmul.f32 %v4089_v23, %v9239_v11  ;;  %v4122_v2 = vmul.f32 %v4090_v61, %v9240_v44  ;;  %v4252_v54 = vadd.f32 %v4236_v63, %v4107_v51  ;;  %v4253_v38 = vadd.f32 %v4237_v45, %v4108_v40 }
 0x581   : > { %v4254_v24 = vadd.f32 %v4238_v8, %v4109_v55  ;;  %v4255_v62 = vadd.f32 %v4239_v50, %v4110_v16  ;;  %v4256_v3 = vadd.f32 %v4240_v35, %v4111_v6  ;;  %v4257_v13 = vadd.f32 %v4241_v39, %v4112_v7 }
 0x582   : > { %v4258_v1 = vadd.f32 %v4242_v36, %v4113_v57  ;;  %v4259_v58 = vadd.f32 %v4243_v10, %v4114_v0  ;;  %v4260_v52 = vadd.f32 %v4244_v21, %v4115_v31  ;;  %v4261_v12 = vadd.f32 %v4245_v46, %v4116_v9 }
 0x583   : > { %v4262_v42 = vadd.f32 %v4246_v43, %v4117_v20  ;;  %v4263_v47 = vadd.f32 %v4247_v15, %v4118_v30  ;;  %v4264_v5 = vadd.f32 %v4248_v60, %v4119_v4  ;;  %v4265_v29 = vadd.f32 %v4249_v22, %v4120_v18 }
 0x584   : > { %v4266_v27 = vadd.f32 %v4250_v33, %v4121_v25  ;;  %v4267_v26 = vadd.f32 %v4251_v32, %v4122_v2  ;;  %v4284_v41 = vrot.slane %v4253_v38, 7  ;;  %v4286_v59 = vrot.slane %v4254_v24, 6 }
 0x585   : > { %v4288_v8 = vrot.slane %v4255_v62, 5  ;;  %v4298_v63 = vrot.slane %v4261_v12, 7  ;;  %v4300_v50 = vrot.slane %v4262_v42, 6  ;;  %v4290_v39 = vrot.slane %v4256_v3, 4 }
 0x586   : > { %v4285_v45 = vsel %vm3981_vm2, %v4284_v41, %v4252_v54  ;;  %v4292_v10 = vrot.slane %v4257_v13, 3  ;;  %v4302_v46 = vrot.slane %v4263_v47, 5  ;;  %v4294_v15 = vrot.slane %v4258_v1, 2 }
 0x587   : > { %v4287_v35 = vsel %vm3984_vm3, %v4286_v59, %v4285_v45  ;;  %v4299_v21 = vsel %vm3981_vm2, %v4298_v63, %v4260_v52  ;;  %v4304_v22 = vrot.slane %v4264_v5, 4  ;;  %v4296_v32 = vrot.slane %v4259_v58, 1 }
 0x588   : > { %v4289_v36 = vsel %vm3987_vm4, %v4288_v8, %v4287_v35  ;;  %v4301_v60 = vsel %vm3984_vm3, %v4300_v50, %v4299_v21  ;;  %v4306_v14 = vrot.slane %v4265_v29, 3  ;;  %v4308_v48 = vrot.slane %v4266_v27, 2 }
 0x589   : > { %v4291_v43 = vsel %vm3990_vm5, %v4290_v39, %v4289_v36  ;;  %v4303_v49 = vsel %vm3987_vm4, %v4302_v46, %v4301_v60  ;;  %v4310_v37 = vrot.slane %v4267_v26, 1 }
 0x58a   : > { %v4293_v33 = vsel %vm3993_vm6, %v4292_v10, %v4291_v43  ;;  %v4305_v51 = vsel %vm3990_vm5, %v4304_v22, %v4303_v49 }
 0x58b   : > { %v4295_v19 = vsel %vm3996_vm7, %v4294_v15, %v4293_v33  ;;  %v4307_v56 = vsel %vm3993_vm6, %v4306_v14, %v4305_v51 }
 0x58c   : > { %v4297_v28 = vsel %vm3999_vm8, %v4296_v32, %v4295_v19  ;;  %v4309_v34 = vsel %vm3996_vm7, %v4308_v48, %v4307_v56 }
 0x58d   : > { %4314 = vst [vmem:[%s566_s24] sm:$0xff] %v4297_v28  ;;  %v4311_v23 = vsel %vm3999_vm8, %v4310_v37, %v4309_v34 }
 0x58e   : > { %4315 = vst [vmem:[%s566_s24 + $0x8] sm:$0xff] %v4311_v23 }
 0x58f   : > { %5736 = shalt.err (!%p5733_p0)
}
 0x590   : > { %s5737_s14 = scalar_lea.hbm %s8512_s25, 256  ;;  %s5741_s22 = scalar_lea.hbm %s9241_s27, 512 }
 0x591   : > { %p5738_p5 = scmp.ne.s32.totalorder %s8512_s25, %s5737_s14  ;;  %p5742_p10 = scmp.lt.u32.totalorder %s8512_s25, %s9241_s27 }
 0x592   : > { %p5743_p2 = scmp.lt.u32.totalorder %s5741_s22, %s5737_s14  ;;  %p5745_p4 = scmp.lt.u32.totalorder %s5737_s14, %s8512_s25 }
 0x593   : > { %p5739_p9 = pnand %p5738_p5, %p9236_p1 }
 0x594   : > { %p5744_p3 = por %p5743_p2, %p5742_p10 }
 0x595   : > { %p5740_p12 = pneg %p5739_p9 }
 0x596   : > { %p5746_p7 = por %p5745_p4, %p5744_p3 }
 0x598   : > { %p5747_p8 = pnand %p5746_p7, %p5740_p12 }
 0x59a   : > { %5750 = shalt.err (!%p5747_p8)
}
 0x59b   : > { %s5815_s30 = smov 128   ;;  %s5816_s29 = smov 8  }
 0x59c   : > { %5034 = dma.vmem_to_hbm [thread:$0]  (%p9236_p1), %s8514_s20, 256, %s8512_s25, %s4413_s18, %s5815_s30, %s5815_s30, %s5816_s29  }
 0x59d PF: > { %s9242_s23 = sld [smem:[#allocation16_spill]]  ;;  %s9243_s26 = sld [smem:[#allocation14_spill]] }
 0x59e   : > { %s9244_s24 = sld [smem:[#allocation19_spill]] }
 0x5a3   : > { %p5056_p11 = scmp.ge.s32.totalorder %s9242_s23, 2  ;;  %s4462_s22 = sand.u32 1, %s9243_s26  }
 0x5a4   : > { %p9245_p13 = scmp.ne.s32.totalorder %s9244_s24, 0  ;;  %s4463_s14 = scalar_lea.sflag [#allocation4], %s4462_s22 }
 0x5a6   : > { %p5046_p6 = pnand %p5056_p11, %p9245_p13 }
 0x5a8   : > { %5776 = dma.done.wait (!%p5046_p6), %s4463_s14, 256  }
 0x5a9   : > { %5778 = vsyncadd (!%p5046_p6), %s4463_s14, 4294967040  ;;  %s4472_s17 = scalar_lea.sflag [#allocation9], %s4462_s22 }
 0x5aa   : > { %5780 = dma.done.wait (!%p5046_p6), %s4472_s17, 1024  }
 0x5ab   : > { %5782 = vsyncadd (!%p5046_p6), %s4472_s17, 4294966272  ;;  %s9246_s21 = sld [smem:[#allocation17_spill]]  ;;  %s9247_s16 = sld [smem:[#allocation15_spill]] }
 0x5ac   : > { %s9248_s20 = sld [smem:[#allocation18_spill]]  ;;  %s9249_s18 = smov %s5789_s19 }
 0x5b1   : > { %p31_p1 = scmp.ge.s32.totalorder %s9246_s21, 4   ;;  %s9250_s19 = smov %s9247_s16 }
 0x5b3   :  { %33 = sbr.rel (!%p31_p1) target bundleno = 9 (0x9), region = 148 }
 0x5ba   :  { %4477 = vsyncpa [#allocation3], 1 }
 0x5bb   :  { %4479 = vsyncpa [#allocation3 + $0x1], 1 }
 0x5bc   :  { %4480 = vsyncpa [#allocation6], 1 }
 0x5bd   :  { %4481 = vsyncpa [#allocation4], 1 }
 0x5be   :  { %4483 = vsyncpa [#allocation4 + $0x1], 1 }
 0x5bf   :  { %4484 = vsyncpa [#allocation9], 1 }
 0x5c0   :  { %4486 = vsyncpa [#allocation9 + $0x1], 1 }

</bundles_post_ra>
